<compile_context>
chip_gen: v5e
topology: v5e:2x2
jax: 0.10.0
libtpu: 0.0.40
codegen_flags: <defaults>
</compile_context>

<pallas_src>
import functools
import math

import jax
import jax.numpy as jnp
from jax import lax
from jax.experimental import pallas as pl
from jax.experimental.pallas import tpu as pltpu


_MASK_VALUE = -0.7 * float(jnp.finfo(jnp.float32).max)   # finite "-inf"


def _detect_vmem_limit():
    """Generation-aware VMEM budget: ~3/4 of physical (96 MiB on v5e/v6e's
    128 MiB, 48 MiB on v7x's 64 MiB).  Conservative fallback if the query
    is unavailable."""
    try:
        cap = int(pltpu.get_tpu_info().vmem_capacity_bytes)
    except Exception:
        cap = 64 * 1024 * 1024
    return min((cap * 3) // 4, 96 * 1024 * 1024)


_VMEM_LIMIT = _detect_vmem_limit()


def _pick_tile(dim, pref, align):
    """Largest tile <= pref that divides dim and is a multiple of `align`;
    falls back to the full extent (always legal) if none exists."""
    if dim <= pref:
        return dim
    t = (pref // align) * align
    while t >= align:
        if dim % t == 0:
            return t
        t -= align
    return dim


# ---------------------------------------------------------------------------
# Tiled linear kernels:  y = x @ w (+ b)
# ---------------------------------------------------------------------------
def _linear_resident_kernel(x_ref, w_ref, o_ref):
    acc = jnp.dot(x_ref[...], w_ref[...], preferred_element_type=jnp.float32)
    o_ref[...] = acc.astype(o_ref.dtype)


def _linear_resident_bias_kernel(x_ref, w_ref, b_ref, o_ref):
    acc = jnp.dot(x_ref[...], w_ref[...], preferred_element_type=jnp.float32)
    o_ref[...] = (acc + b_ref[...].astype(jnp.float32)).astype(o_ref.dtype)


def _linear_tiled_kernel(x_ref, w_ref, o_ref, acc_ref):
    @pl.when(pl.program_id(2) == 0)
    def _():
        acc_ref[...] = jnp.zeros(acc_ref.shape, jnp.float32)

    acc_ref[...] += jnp.dot(x_ref[...], w_ref[...],
                            preferred_element_type=jnp.float32)

    @pl.when(pl.program_id(2) == pl.num_programs(2) - 1)
    def _():
        o_ref[...] = acc_ref[...].astype(o_ref.dtype)


def _linear_tiled_bias_kernel(x_ref, w_ref, b_ref, o_ref, acc_ref):
    @pl.when(pl.program_id(2) == 0)
    def _():
        acc_ref[...] = jnp.zeros(acc_ref.shape, jnp.float32)

    acc_ref[...] += jnp.dot(x_ref[...], w_ref[...],
                            preferred_element_type=jnp.float32)

    @pl.when(pl.program_id(2) == pl.num_programs(2) - 1)
    def _():
        o_ref[...] = (acc_ref[...] + b_ref[...].astype(jnp.float32)
                      ).astype(o_ref.dtype)


def _linear_resident(x, w, b, *, tm, out_dtype):
    """Weight-resident path: W gets a constant-index full-extent BlockSpec so
    it is DMA'd to VMEM exactly once (no per-row-tile re-streaming)."""
    M, K = x.shape
    _, N = w.shape
    in_specs = [
        pl.BlockSpec((tm, K), lambda i: (i, 0)),
        pl.BlockSpec((K, N), lambda i: (0, 0)),     # resident: one DMA total
    ]
    operands = [x, w]
    kernel = _linear_resident_kernel
    if b is not None:
        in_specs.append(pl.BlockSpec((1, N), lambda i: (0, 0)))
        operands.append(b.reshape(1, N))
        kernel = _linear_resident_bias_kernel

    return pl.pallas_call(
        kernel,
        out_shape=jax.ShapeDtypeStruct((M, N), out_dtype),
        grid_spec=pltpu.PrefetchScalarGridSpec(
            num_scalar_prefetch=0,
            grid=(M // tm,),
            in_specs=in_specs,
            out_specs=pl.BlockSpec((tm, N), lambda i: (i, 0)),
        ),
        compiler_params=pltpu.CompilerParams(
            dimension_semantics=("parallel",),
            vmem_limit_bytes=_VMEM_LIMIT),
    )(*operands)


def _linear_tiled(x, w, b, *, tm, tn, tk, out_dtype):
    """General path with a K-reduction grid axis and f32 accumulator — caps
    per-step VMEM for large d_model (v7x 64 MiB budget)."""
    M, K = x.shape
    _, N = w.shape
    in_specs = [
        pl.BlockSpec((tm, tk), lambda i, j, k: (i, k)),
        pl.BlockSpec((tk, tn), lambda i, j, k: (k, j)),
    ]
    operands = [x, w]
    kernel = _linear_tiled_kernel
    if b is not None:
        in_specs.append(pl.BlockSpec((1, tn), lambda i, j, k: (0, j)))
        operands.append(b.reshape(1, N))
        kernel = _linear_tiled_bias_kernel

    return pl.pallas_call(
        kernel,
        out_shape=jax.ShapeDtypeStruct((M, N), out_dtype),
        grid_spec=pltpu.PrefetchScalarGridSpec(
            num_scalar_prefetch=0,
            grid=(M // tm, N // tn, K // tk),
            in_specs=in_specs,
            out_specs=pl.BlockSpec((tm, tn), lambda i, j, k: (i, j)),
            scratch_shapes=[pltpu.VMEM((tm, tn), jnp.float32)],
        ),
        compiler_params=pltpu.CompilerParams(
            dimension_semantics=("parallel", "parallel", "arbitrary"),
            vmem_limit_bytes=_VMEM_LIMIT),
    )(*operands)


def _linear(x, w, b=None, *, out_dtype=None):
    M, K = x.shape
    K2, N = w.shape
    assert K == K2
    out_dtype = out_dtype or x.dtype

    tm = _pick_tile(M, 512, align=8)
    # Double-buffered VMEM estimate for the weight-resident path.
    w_bytes = 2 * K * N * w.dtype.itemsize
    x_bytes = 2 * tm * K * x.dtype.itemsize
    o_bytes = 2 * tm * N * jnp.dtype(out_dtype).itemsize
    if w_bytes + x_bytes + o_bytes <= _VMEM_LIMIT // 2:
        return _linear_resident(x, w, b, tm=tm, out_dtype=out_dtype)

    tm = _pick_tile(M, 256, align=8)
    tn = _pick_tile(N, 256, align=128)
    tk = _pick_tile(K, 512, align=128)
    return _linear_tiled(x, w, b, tm=tm, tn=tn, tk=tk, out_dtype=out_dtype)


# ---------------------------------------------------------------------------
# Flash-style causal attention reading straight out of the fused QKV buffer
# ---------------------------------------------------------------------------
def _flash_attn_kernel(q_ref, k_ref, v_ref, o_ref, m_ref, l_ref, acc_ref,
                       *, tq, tk):
    qi = pl.program_id(1)
    ki = pl.program_id(2)

    @pl.when(ki == 0)
    def _():
        m_ref[...] = jnp.full(m_ref.shape, _MASK_VALUE, jnp.float32)
        l_ref[...] = jnp.zeros(l_ref.shape, jnp.float32)
        acc_ref[...] = jnp.zeros(acc_ref.shape, jnp.float32)

    q_start = qi * tq
    k_start = ki * tk
    # Tile classification w.r.t. the causal diagonal.
    is_skip = k_start > q_start + (tq - 1)               # fully masked
    is_interior = (k_start + (tk - 1)) <= q_start        # fully unmasked

    def update(apply_mask):
        # q is pre-scaled by 1/sqrt(head_dim) (folded into the QKV weight).
        s = lax.dot_general(q_ref[...], k_ref[...], (((1,), (1,)), ((), ())),
                            preferred_element_type=jnp.float32)
        if apply_mask:
            rows = q_start + lax.broadcasted_iota(jnp.int32, (tq, tk), 0)
            cols = k_start + lax.broadcasted_iota(jnp.int32, (tq, tk), 1)
            s = jnp.where(rows >= cols, s, _MASK_VALUE)
        m_prev = m_ref[...]
        m_new = jnp.maximum(m_prev, jnp.max(s, axis=-1, keepdims=True))
        alpha = jnp.exp(m_prev - m_new)
        p = jnp.exp(s - m_new)
        l_ref[...] = alpha * l_ref[...] + jnp.sum(p, axis=-1, keepdims=True)
        acc_ref[...] = alpha * acc_ref[...] + jnp.dot(
            p.astype(v_ref.dtype), v_ref[...],
            preferred_element_type=jnp.float32)
        m_ref[...] = m_new

    @pl.when(is_interior)
    def _():
        update(apply_mask=False)

    @pl.when(jnp.logical_and(jnp.logical_not(is_interior),
                             jnp.logical_not(is_skip)))
    def _():
        update(apply_mask=True)

    @pl.when(ki == pl.num_programs(2) - 1)
    def _():
        inv_l = pl.reciprocal(l_ref[...], approx=True)
        o_ref[...] = (acc_ref[...] * inv_l).astype(o_ref.dtype)


def _flash_attention_fused(qkv, *, num_heads, head_dim, tq=256, tk=256,
                           out_dtype=None):
    """Causal flash attention over qkv laid out as (B, T, 3*H*hd).

    Heads are addressed purely through column-block index maps (no wrapper
    transposes); the output is written directly in merged (B, T, H*hd) form.
    """
    B, T, three_d = qkv.shape
    H, hd = num_heads, head_dim
    assert three_d == 3 * H * hd
    assert hd % 128 == 0, "fused-layout flash attention needs head_dim % 128 == 0"
    tq = _pick_tile(T, tq, align=128)
    tk = _pick_tile(T, tk, align=128)
    out_dtype = out_dtype or qkv.dtype

    kernel = functools.partial(_flash_attn_kernel, tq=tq, tk=tk)

    def q_map(b, qi, ki):
        return (b // H, qi, b % H)

    def make_kv_map(section):
        def kv_map(b, qi, ki):
            # Clamp to the last causally-valid key block so fully-masked
            # iterations re-request the previous block and the DMA is elided.
            kmax = (qi * tq + (tq - 1)) // tk
            return (b // H, jnp.minimum(ki, kmax), section * H + (b % H))
        return kv_map

    return pl.pallas_call(
        kernel,
        out_shape=jax.ShapeDtypeStruct((B, T, H * hd), out_dtype),
        grid_spec=pltpu.PrefetchScalarGridSpec(
            num_scalar_prefetch=0,
            grid=(B * H, T // tq, T // tk),
            in_specs=[
                pl.BlockSpec((None, tq, hd), q_map),
                pl.BlockSpec((None, tk, hd), make_kv_map(1)),
                pl.BlockSpec((None, tk, hd), make_kv_map(2)),
            ],
            out_specs=pl.BlockSpec((None, tq, hd), q_map),
            scratch_shapes=[
                pltpu.VMEM((tq, 1), jnp.float32),    # running max
                pltpu.VMEM((tq, 1), jnp.float32),    # running denom
                pltpu.VMEM((tq, hd), jnp.float32),   # output accumulator
            ],
        ),
        compiler_params=pltpu.CompilerParams(
            dimension_semantics=("parallel", "parallel", "arbitrary"),
            vmem_limit_bytes=_VMEM_LIMIT),
    )(qkv, qkv, qkv)


# ---------------------------------------------------------------------------
# Full multi-head attention forward (eval mode)
# ---------------------------------------------------------------------------
def fuse_qkv_weights(wq, wk, wv, *, num_heads):
    """Pre-fused, pre-scaled QKV weight.  Done ONCE at parameter setup
    (hoisted out of the forward path).  The 1/sqrt(head_dim) attention scale
    is folded into the Q columns so the attention kernel never multiplies
    score tiles by it."""
    d_out = wq.shape[1]
    hd = d_out // num_heads
    scale = 1.0 / math.sqrt(hd)
    wq_scaled = (wq.astype(jnp.float32) * scale).astype(wq.dtype)
    return jnp.concatenate([wq_scaled, wk, wv], axis=1)   # (d_in, 3*d_out)


def multi_head_attention(x, wqkv, wp, bp, *, num_heads):
    """x: (B, T, d_in); wqkv: fused pre-scaled (d_in, 3*d_out); wp: (d_out, d_out)."""
    B, T, d_in = x.shape
    three_d_out = wqkv.shape[1]
    d_out = three_d_out // 3
    assert d_out % num_heads == 0
    hd = d_out // num_heads

    # 1) Fused QKV projection (single weight-resident matmul over tokens).
    qkv = _linear(x.reshape(B * T, d_in), wqkv)            # (B*T, 3*d_out)
    qkv = qkv.reshape(B, T, three_d_out)                   # free reshape

    # 2) Causal flash attention; heads handled by BlockSpec column indexing,
    #    output already in merged (B, T, d_out) layout.  Dropout = identity
    #    in eval mode.
    o = _flash_attention_fused(qkv, num_heads=num_heads, head_dim=hd)

    # 3) Output projection (+ bias).
    y = _linear(o.reshape(B * T, d_out), wp, bp, out_dtype=x.dtype)
    return y.reshape(B, T, d_out)


def mha_reference(x, wq, wk, wv, wp, bp, *, num_heads):
    """Pure-JAX f32 reference mirroring the PyTorch forward (eval mode)."""
    x = x.astype(jnp.float32)
    wq, wk, wv, wp = (w.astype(jnp.float32) for w in (wq, wk, wv, wp))
    bp = bp.astype(jnp.float32)
    B, T, d_in = x.shape
    d_out = wq.shape[1]
    hd = d_out // num_heads

    def tr(y):  # (B, T, d_out) -> (B, H, T, hd)
        return y.reshape(B, T, num_heads, hd).transpose(0, 2, 1, 3)

    q, k, v = tr(x @ wq), tr(x @ wk), tr(x @ wv)
    scores = jnp.einsum("bhtd,bhsd->bhts", q, k) / jnp.sqrt(jnp.float32(hd))
    mask = jnp.tril(jnp.ones((T, T), bool))
    scores = jnp.where(mask[None, None], scores, -jnp.inf)
    w = jax.nn.softmax(scores, axis=-1)
    o = jnp.einsum("bhts,bhsd->bhtd", w, v)
    o = o.transpose(0, 2, 1, 3).reshape(B, T, d_out)
    return o @ wp + bp[None, None, :]


if __name__ == "__main__":
    # Small but lane-dense shapes: head_dim = 128, T a multiple of the 256
    # attention tiles so interior / diagonal / skipped key tiles all occur.
    B, T = 2, 512
    d_in = d_out = 256
    num_heads = 2

    key = jax.random.PRNGKey(0)
    kx, kq, kk, kv, kp, kb = jax.random.split(key, 6)

    scale_in = 1.0 / math.sqrt(d_in)
    scale_out = 1.0 / math.sqrt(d_out)
    x = jax.random.normal(kx, (B, T, d_in), jnp.float32)
    wq = jax.random.uniform(kq, (d_in, d_out), jnp.float32, -scale_in, scale_in)
    wk = jax.random.uniform(kk, (d_in, d_out), jnp.float32, -scale_in, scale_in)
    wv = jax.random.uniform(kv, (d_in, d_out), jnp.float32, -scale_in, scale_in)
    wp = jax.random.uniform(kp, (d_out, d_out), jnp.float32, -scale_out, scale_out)
    bp = jax.random.uniform(kb, (d_out,), jnp.float32, -scale_out, scale_out)

    # bf16 operands for the MXU (f32 accumulation inside the kernels).
    xb = x.astype(jnp.bfloat16)
    wqb, wkb, wvb, wpb = (w.astype(jnp.bfloat16) for w in (wq, wk, wv, wp))

    # Parameter-setup-time weight fusion (hoisted out of the forward path).
    wqkv = fuse_qkv_weights(wqb, wkb, wvb, num_heads=num_heads)

    out = multi_head_attention(xb, wqkv, wpb, bp, num_heads=num_heads)
    out = jax.block_until_ready(out)

    # f32 reference on the same (bf16-rounded) parameters.
    ref = mha_reference(xb, wqb, wkb, wvb, wpb, bp, num_heads=num_heads)

    assert out.shape == (B, T, d_out)
    assert jnp.allclose(out.astype(jnp.float32), ref, atol=2e-2, rtol=2e-2), \
        "mismatch vs reference"

    print("KERNEL_OK")
</pallas_src>

<mosaic_0001>
module attributes {stable_mosaic.version = 11 : i64} {
  func.func @_linear_resident_kernel(%arg0: i32, %arg1: memref<512x256xbf16, #tpu.memory_space<vmem>>, %arg2: memref<256x768xbf16, #tpu.memory_space<vmem>>, %arg3: memref<512x768xbf16, #tpu.memory_space<vmem>>) attributes {dimension_semantics = [#tpu.dimension_semantics<parallel>], iteration_bounds = array<i64: 2>, scalar_prefetch = 0 : i64, scratch_operands = 0 : i64, tpu.core_type = #tpu.core_type<tc>, window_params = [{transform_indices = @transform_0, window_bounds = array<i64: 512, 256>}, {pipeline_mode = #tpu.pipeline_mode<synchronous>, transform_indices = @transform_1, window_bounds = array<i64: 256, 768>}, {transform_indices = @transform_2, window_bounds = array<i64: 512, 768>}]} {
    %c0 = arith.constant 0 : index
    %c0_0 = arith.constant 0 : index
    %0 = vector.load %arg1[%c0, %c0_0] : memref<512x256xbf16, #tpu.memory_space<vmem>>, vector<512x256xbf16>
    %c0_1 = arith.constant 0 : index
    %c0_2 = arith.constant 0 : index
    %1 = vector.load %arg2[%c0_1, %c0_2] : memref<256x768xbf16, #tpu.memory_space<vmem>>, vector<256x768xbf16>
    %cst = arith.constant dense<0.000000e+00> : vector<512x768xf32>
    %2 = tpu.matmul %0, %1, %cst {dimension_numbers = #tpu.dot_dimension_numbers<[1], [0], [0], [1], [0, 0, 1, 1], [], []>} : vector<512x256xbf16>, vector<256x768xbf16>, vector<512x768xf32> -> vector<512x768xf32>
    %3 = arith.truncf %2 : vector<512x768xf32> to vector<512x768xbf16>
    %c0_3 = arith.constant 0 : index
    %c0_4 = arith.constant 0 : index
    %4 = vector.load %arg3[%c0_3, %c0_4] : memref<512x768xbf16, #tpu.memory_space<vmem>>, vector<512x768xbf16>
    tpu.vector_store %arg3[%c0_3, %c0_4], %3 {strides = array<i32>} : memref<512x768xbf16, #tpu.memory_space<vmem>>, vector<512x768xbf16>,
    return
  }
  func.func @transform_0(%arg0: i32) -> (i32, i32) {
    %c0_i32 = arith.constant 0 : i32
    %c0_i32_0 = arith.constant 0 : i32
    return %arg0, %c0_i32 : i32, i32
  }
  func.func @transform_1(%arg0: i32) -> (i32, i32) {
    %c0_i32 = arith.constant 0 : i32
    %c0_i32_0 = arith.constant 0 : i32
    %c0_i32_1 = arith.constant 0 : i32
    return %c0_i32, %c0_i32_0 : i32, i32
  }
  func.func @transform_2(%arg0: i32) -> (i32, i32) {
    %c0_i32 = arith.constant 0 : i32
    %c0_i32_0 = arith.constant 0 : i32
    return %arg0, %c0_i32 : i32, i32
  }
}

</mosaic_0001>

<bundles_post_ra>
// kernel: tpu_custom_call.1
= control target key start
LH: loop header
LB: loop body
LE: loop exit
PB: predicated region body
PF: predicated region fallthrough
CT: control target
= control target key end

     0   :  { %7 = vsyncpa [#allocation3], 0  ;;  %s5671_s0 = inlined_call_operand.hbm [shape: bf16[1024,256], index: 0, kind: input, shape index: {}]   ;;  %s5672_s1 = inlined_call_operand.hbm [shape: bf16[256,768], index: 1, kind: input, shape index: {}]   ;;  %s5673_s2 = inlined_call_operand.hbm [shape: bf16[1024,768], index: 2, kind: output, shape index: {}]  }
   0x1   :  { %9 = vsyncpa [#allocation3 + $0x1], 0 }
   0x2   :  { %10 = vsyncpa [#allocation6], 0 }
   0x3   :  { %11 = vsyncpa [#allocation4], 0 }
   0x4   :  { %13 = vsyncpa [#allocation4 + $0x1], 0  ;;  %s4693_s9 = smov 0   ;;  %s4695_s10 = smov 0  }
   0x5   :  { %s4697_s11 = smov 0   ;;  %s4699_s12 = smov 0  }
   0x6 LB: > { %s4714_s13 = sadd.s32 4294967295, %s4669_s12   ;;  %s3656_s14 = sadd.s32 4294967294, %s4669_s12   ;;  %s4669_s12 = sphi %s4699_s12, %s5799_s12   ;;  %s4665_s11 = sphi %s4697_s11, %s5798_s11   ;;  %s4661_s10 = sphi %s4695_s10, %s5797_s10   ;;  %s4657_s9 = sphi %s4693_s9, %s5796_s9  }
   0x7   : > { %p39_p0 = scmp.ne.s32.totalorder %s4661_s10, %s4657_s9  ;;  %p40_p1 = scmp.eq.s32.totalorder %s4714_s13, 0 }
   0x8   : > { %p84_p2 = scmp.eq.s32.totalorder %s4714_s13, 1  ;;  %p90_p3 = scmp.eq.s32.totalorder %s3656_s14, 1 }
   0x9   : > { %p4723_p4 = por %p40_p1, %p39_p0  ;;  %p3657_p5 = scmp.ge.s32.totalorder %s4669_s12, 1 }
   0xa   : > { %p4728_p6 = por %p90_p3, %p39_p0  ;;  %p97_p7 = scmp.lt.s32.totalorder %s4669_s12, 3 }
   0xb   : > { %s108_s19 = sshll.u32 %s5672_s1, 4  ;;  %s4671_s21 = smov [#allocation5]   ;;  %s109_s19 = int_to_ptr.hbm [resolvable:$true] %s108_s19 }
   0xc   : > { %p4736_p8 = pnand %p3657_p5, %p97_p7  ;;  %s110_s22 = sshll.u32 %s4671_s21, 4  ;;  %s111_s22 = int_to_ptr.vmem [resolvable:$true] %s110_s22 }
   0xd   : > { %s4746_s23 = sadd.s32 1, %s4669_s12   ;;  %s4672_s24 = smov 384  }
   0xe   : > { %p4484_p9 = pneg %p4736_p8  ;;  %s4673_s25 = smov 24  }
   0xf   : > { %s23_s26 = ssub.s32 %s4669_s12, %s4746_s23  ;;  %s26_s27 = sadd.s32 1, %s4665_s11 }
  0x10   : > { %p4485_p10 = pnand %p4484_p9, %p40_p1  ;;  %p24_p12 = scmp.eq.s32.totalorder %s23_s26, 0 }
  0x11   : > { %p33_p13 = scmp.ne.s32.totalorder %s4665_s11, %s4661_s10  ;;  %p34_p0 = scmp.eq.s32.totalorder %s4669_s12, 0 }
  0x12   : > { %4487 = dma.hbm_to_vmem [thread:$0]  (!%p4485_p10), %s109_s19, 12288, %s111_s22, [#allocation6], %s4672_s24, %s4672_s24, %s4673_s25  }
  0x13   : > { %p4497_p3 = scmp.lt.s32.totalorder %s4669_s12, 2  ;;  %p35_p5 = por %p34_p0, %p33_p13 }
  0x14   : > { %s4756_s28 = scalar_select %p24_p12, %s4665_s11, %s26_s27  }
  0x15   : > { %p4760_p7 = por %p84_p2, %p33_p13  ;;  %s124_s30 = sand.u32 1, %s4665_s11  }
  0x16   : > { %s4313_s3 = sshll.u32 %s4669_s12, 9  ;;  %s3660_s4 = sshll.u32 %s124_s30, 9 }
  0x17   : > { %s134_s7 = scalar_lea.hbm %s5671_s0, %s4313_s3  ;;  %s128_s14 = scalar_lea.vmem [#allocation2], %s3660_s4 }
  0x18   : > { %s135_s8 = sshll.u32 %s134_s7, 4  ;;  %s137_s17 = sshll.u32 %s128_s14, 4  ;;  %s136_s8 = int_to_ptr.hbm [resolvable:$true] %s135_s8  ;;  %s138_s17 = int_to_ptr.vmem [resolvable:$true] %s137_s17 }
  0x19   : > { %p4771_p9 = pnand %p4497_p3, %p35_p5  ;;  %s125_s19 = scalar_lea.sflag [#allocation3], %s124_s30 }
  0x1a   : > { %s4569_s21 = sshra.s32 %s136_s8, 4  ;;  %s4576_s26 = scalar_lea.hbm %s5671_s0, 1024  ;;  %s4570_s21 = int_to_ptr.hbm [resolvable:$true] %s4569_s21 }
  0x1b   : > { %s4571_s22 = scalar_lea.hbm %s4570_s21, 512  ;;  %p4573_p10 = pneg %p4771_p9 }
  0x1c   : > { %p4572_p2 = scmp.ne.s32.totalorder %s4570_s21, %s4571_s22  ;;  %p4577_p0 = scmp.lt.s32.totalorder %s4570_s21, %s5671_s0 }
  0x1d   : > { %p4578_p3 = scmp.lt.s32.totalorder %s4576_s26, %s4571_s22 }
  0x1e   : > { %p4574_p12 = pnand %p4573_p10, %p4572_p2 }
  0x1f   : > { %p4579_p5 = por %p4578_p3, %p4577_p0 }
  0x20   : > { %p4575_p13 = pneg %p4574_p12 }
  0x22   : > { %p4580_p11 = pnand %p4579_p5, %p4575_p13 }
  0x24   : > { %4583 = shalt.err (!%p4580_p11)
}
  0x25   : > { %s4674_s30 = smov 128   ;;  %s4675_s4 = smov 8  }
  0x26   : > { %4491 = dma.hbm_to_vmem [thread:$0]  (!%p4771_p9), %s136_s8, 8192, %s138_s17, %s125_s19, %s4674_s30, %s4674_s30, %s4675_s4  }
  0x27   : > { %149 = sbr.rel (%p4736_p8) target bundleno = 1755 (0x6db), region = 28 }
  0x2c   : > { %s4788_s5 = sand.u32 1, %s4661_s10  }
  0x2d   : > { %s3665_s6 = sshll.u32 %s4788_s5, 9  ;;  %s152_s7 = scalar_lea.sflag [#allocation3], %s4788_s5 }
  0x2e   : > { %s4792_s14 = scalar_lea.vmem [#allocation2], %s3665_s6 }
  0x2f   : > { %4644 = dma.done.wait (%p4723_p4), %s152_s7, 8192  }
  0x30   : > { %4646 = vsyncadd (%p4723_p4), %s152_s7, 4294959104 }
  0x31   : > { %4648 = dma.done.wait (%p40_p1), [#allocation6], 12288  }
  0x32   : > { %4650 = vsyncadd (%p40_p1), [#allocation6], 4294955008  ;;  %v4093_v0 = vld [vmem:[#allocation5 + $0x150] sm:$0xf]  ;;  %v4423_v1 = vld [vmem:[#allocation5 + $0x164] sm:$0xf0] }
  0x33   : > { %v4285_v2 = vld [vmem:[#allocation5 + $0x2d0] sm:$0xf]  ;;  %v4094_v3 = vor.u32 %v4423_v1, %v4093_v0  ;;  %v4471_v4 = vld [vmem:[#allocation5 + $0x2e4] sm:$0xf0]  ;;  %v4420_v5 = vld [vmem:[#allocation5 + $0x154] sm:$0xf] }
  0x34   : > { %v4095_v6 = vld [vmem:[#allocation5 + $0x168] sm:$0xf0]  ;;  %v4286_v7 = vor.u32 %v4471_v4, %v4285_v2  ;;  %v4468_v9 = vld [vmem:[#allocation5 + $0x2d4] sm:$0xf]  ;;  %v4069_v11 = vld [vmem:[#allocation5 + $0x120] sm:$0xf] }
  0x35   : > { %v4098_v8 = vor.u32 %v4420_v5, %v4095_v6  ;;  %v4287_v10 = vld [vmem:[#allocation5 + $0x2e8] sm:$0xf0]  ;;  %1144 = vmatpush.bf16.msra.mxu0 %v4094_v3  ;;  %v4417_v13 = vld [vmem:[#allocation5 + $0x134] sm:$0xf0]  ;;  %v4261_v14 = vld [vmem:[#allocation5 + $0x2a0] sm:$0xf] }
  0x36   : > { %v4290_v12 = vor.u32 %v4468_v9, %v4287_v10  ;;  %v4465_v15 = vld [vmem:[#allocation5 + $0x2b4] sm:$0xf0]  ;;  %1313 = vmatpush.bf16.msra.mxu1 %v4286_v7  ;;  %v4070_v16 = vor.u32 %v4417_v13, %v4069_v11  ;;  %v4414_v18 = vld [vmem:[#allocation5 + $0x124] sm:$0xf]  ;;  %v4071_v19 = vld [vmem:[#allocation5 + $0x138] sm:$0xf0] }
  0x37   : > { %1482 = vmatpush.bf16.msra.mxu2 %v4098_v8  ;;  %v4262_v17 = vor.u32 %v4465_v15, %v4261_v14  ;;  %v4462_v20 = vld [vmem:[#allocation5 + $0x2a4] sm:$0xf]  ;;  %v4074_v21 = vor.u32 %v4414_v18, %v4071_v19  ;;  %v4263_v22 = vld [vmem:[#allocation5 + $0x2b8] sm:$0xf0]  ;;  %v4045_v23 = vld [vmem:[#allocation5 + $0xf0] sm:$0xf] }
  0x38   : > { %1651 = vmatpush.bf16.msra.mxu3 %v4290_v12  ;;  %v4411_v24 = vld [vmem:[#allocation5 + $0x104] sm:$0xf0]  ;;  %v4266_v25 = vor.u32 %v4462_v20, %v4263_v22  ;;  %v4237_v26 = vld [vmem:[#allocation5 + $0x270] sm:$0xf]  ;;  %v4408_v28 = vld [vmem:[#allocation5 + $0xf4] sm:$0xf] }
  0x39   : > { %v4459_v27 = vld [vmem:[#allocation5 + $0x284] sm:$0xf0]  ;;  %1145 = vmatpush.bf16.msra.mxu0 %v4070_v16  ;;  %v4046_v29 = vor.u32 %v4411_v24, %v4045_v23  ;;  %v4047_v30 = vld [vmem:[#allocation5 + $0x108] sm:$0xf0]  ;;  %v4456_v31 = vld [vmem:[#allocation5 + $0x274] sm:$0xf] }
  0x3a   : > { %v4239_v32 = vld [vmem:[#allocation5 + $0x288] sm:$0xf0]  ;;  %1314 = vmatpush.bf16.msra.mxu1 %v4262_v17  ;;  %v4238_v33 = vor.u32 %v4459_v27, %v4237_v26  ;;  %v4050_v34 = vor.u32 %v4408_v28, %v4047_v30  ;;  %v4021_v35 = vld [vmem:[#allocation5 + $0xc0] sm:$0xf]  ;;  %v4405_v36 = vld [vmem:[#allocation5 + $0xd4] sm:$0xf0] }
  0x3b   : > { %1483 = vmatpush.bf16.msra.mxu2 %v4074_v21  ;;  %v4213_v37 = vld [vmem:[#allocation5 + $0x240] sm:$0xf]  ;;  %v4242_v38 = vor.u32 %v4456_v31, %v4239_v32  ;;  %v4453_v39 = vld [vmem:[#allocation5 + $0x254] sm:$0xf0]  ;;  %v4402_v40 = vld [vmem:[#allocation5 + $0xc4] sm:$0xf]  ;;  %v4022_v44 = vor.u32 %v4405_v36, %v4021_v35 }
  0x3c   : > { %1652 = vmatpush.bf16.msra.mxu3 %v4266_v25  ;;  %v4023_v41 = vld [vmem:[#allocation5 + $0xd8] sm:$0xf0]  ;;  %v4450_v42 = vld [vmem:[#allocation5 + $0x244] sm:$0xf]  ;;  %v4214_v45 = vor.u32 %v4453_v39, %v4213_v37  ;;  %v3997_v47 = vld [vmem:[#allocation5 + $0x90] sm:$0xf] }
  0x3d   : > { %v4215_v43 = vld [vmem:[#allocation5 + $0x258] sm:$0xf0]  ;;  %1146 = vmatpush.bf16.msra.mxu0 %v4046_v29  ;;  %v4026_v46 = vor.u32 %v4402_v40, %v4023_v41  ;;  %v4399_v48 = vld [vmem:[#allocation5 + $0xa4] sm:$0xf0]  ;;  %v4189_v49 = vld [vmem:[#allocation5 + $0x210] sm:$0xf] }
  0x3e   : > { %1315 = vmatpush.bf16.msra.mxu1 %v4238_v33  ;;  %v4218_v50 = vor.u32 %v4450_v42, %v4215_v43  ;;  %v4447_v51 = vld [vmem:[#allocation5 + $0x224] sm:$0xf0]  ;;  %v4396_v52 = vld [vmem:[#allocation5 + $0x94] sm:$0xf]  ;;  %v3999_v53 = vld [vmem:[#allocation5 + $0xa8] sm:$0xf0]  ;;  %v3998_v56 = vor.u32 %v4399_v48, %v3997_v47 }
  0x3f   : > { %1484 = vmatpush.bf16.msra.mxu2 %v4050_v34  ;;  %v4444_v54 = vld [vmem:[#allocation5 + $0x214] sm:$0xf]  ;;  %v4191_v55 = vld [vmem:[#allocation5 + $0x228] sm:$0xf0]  ;;  %v4190_v57 = vor.u32 %v4447_v51, %v4189_v49  ;;  %v4002_v58 = vor.u32 %v4396_v52, %v3999_v53  ;;  %v3973_v59 = vld [vmem:[#allocation5 + $0x60] sm:$0xf] }
  0x40   : > { %1653 = vmatpush.bf16.msra.mxu3 %v4242_v38  ;;  %v4393_v60 = vld [vmem:[#allocation5 + $0x74] sm:$0xf0]  ;;  %v4165_v61 = vld [vmem:[#allocation5 + $0x1e0] sm:$0xf]  ;;  %v4194_v62 = vor.u32 %v4444_v54, %v4191_v55  ;;  %v4390_v0 = vld [vmem:[#allocation5 + $0x64] sm:$0xf] }
  0x41   : > { %1147 = vmatpush.bf16.msra.mxu0 %v4022_v44  ;;  %v4441_v63 = vld [vmem:[#allocation5 + $0x1f4] sm:$0xf0]  ;;  %v3975_v1 = vld [vmem:[#allocation5 + $0x78] sm:$0xf0]  ;;  %v4438_v2 = vld [vmem:[#allocation5 + $0x1e4] sm:$0xf]  ;;  %v3974_v4 = vor.u32 %v4393_v60, %v3973_v59 }
  0x42   : > { %1316 = vmatpush.bf16.msra.mxu1 %v4214_v45  ;;  %v4167_v3 = vld [vmem:[#allocation5 + $0x1f8] sm:$0xf0]  ;;  %v4166_v5 = vor.u32 %v4441_v63, %v4165_v61  ;;  %v3978_v6 = vor.u32 %v4390_v0, %v3975_v1  ;;  %v3949_v7 = vld [vmem:[#allocation5 + $0x30] sm:$0xf]  ;;  %v4387_v8 = vld [vmem:[#allocation5 + $0x44] sm:$0xf0] }
  0x43   : > { %1485 = vmatpush.bf16.msra.mxu2 %v4026_v46  ;;  %v4141_v9 = vld [vmem:[#allocation5 + $0x1b0] sm:$0xf]  ;;  %v4170_v10 = vor.u32 %v4438_v2, %v4167_v3  ;;  %v4435_v11 = vld [vmem:[#allocation5 + $0x1c4] sm:$0xf0]  ;;  %v4384_v12 = vld [vmem:[#allocation5 + $0x34] sm:$0xf]  ;;  %v3950_v16 = vor.u32 %v4387_v8, %v3949_v7 }
  0x44   : > { %1654 = vmatpush.bf16.msra.mxu3 %v4218_v50  ;;  %v3951_v13 = vld [vmem:[#allocation5 + $0x48] sm:$0xf0]  ;;  %v4432_v14 = vld [vmem:[#allocation5 + $0x1b4] sm:$0xf]  ;;  %v3925_v17 = vld [vmem:[#allocation5] sm:$0xf]  ;;  %v4142_v19 = vor.u32 %v4435_v11, %v4141_v9 }
  0x45   : > { %1148 = vmatpush.bf16.msra.mxu0 %v3998_v56  ;;  %v4143_v15 = vld [vmem:[#allocation5 + $0x1c8] sm:$0xf0]  ;;  %v4381_v18 = vld [vmem:[#allocation5 + $0x14] sm:$0xf0]  ;;  %v3954_v20 = vor.u32 %v4384_v12, %v3951_v13  ;;  %v4117_v21 = vld [vmem:[#allocation5 + $0x180] sm:$0xf] }
  0x46   : > { %1317 = vmatpush.bf16.msra.mxu1 %v4190_v57  ;;  %v4429_v22 = vld [vmem:[#allocation5 + $0x194] sm:$0xf0]  ;;  %v4378_v23 = vld [vmem:[#allocation5 + $0x4] sm:$0xf]  ;;  %v4146_v24 = vor.u32 %v4432_v14, %v4143_v15  ;;  %v3927_v25 = vld [vmem:[#allocation5 + $0x18] sm:$0xf0]  ;;  %v3926_v31 = vor.u32 %v4381_v18, %v3925_v17 }
  0x47   : > { %1486 = vmatpush.bf16.msra.mxu2 %v4002_v58  ;;  %v4426_v26 = vld [vmem:[#allocation5 + $0x184] sm:$0xf]  ;;  %v4119_v27 = vld [vmem:[#allocation5 + $0x198] sm:$0xf0]  ;;  %v3669_v28 = vld [vmem:[%s4792_s14] sm:$0xf]  ;;  %v4118_v35 = vor.u32 %v4429_v22, %v4117_v21  ;;  %v3930_v36 = vor.u32 %v4378_v23, %v3927_v25 }
  0x48   : > { %1655 = vmatpush.bf16.msra.mxu3 %v4194_v62  ;;  %v4421_v29 = vld [vmem:[#allocation5 + $0x15c] sm:$0xf]  ;;  %v4103_v30 = vld [vmem:[#allocation5 + $0x170] sm:$0xf0]  ;;  %v4315_v32 = vld [vmem:[%s4792_s14 + $0x4] sm:$0xf0]  ;;  %v4122_v39 = vor.u32 %v4426_v26, %v4119_v27 }
  0x49   : > { %1149 = vmatpush.bf16.msra.mxu0 %v3974_v4  ;;  %v4469_v33 = vld [vmem:[#allocation5 + $0x2dc] sm:$0xf]  ;;  %v4295_v34 = vld [vmem:[#allocation5 + $0x2f0] sm:$0xf0]  ;;  %v4314_v37 = vld [vmem:[%s4792_s14 + $0x4] sm:$0xf]  ;;  %v4106_v40 = vor.u32 %v4421_v29, %v4103_v30  ;;  %v4806_v43 = vor.u32 %v4315_v32, %v3669_v28 }
  0x4a   : > { %1318 = vmatpush.bf16.msra.mxu1 %v4166_v5  ;;  %v3671_v38 = vld [vmem:[%s4792_s14 + $0x8] sm:$0xf0]  ;;  %v4101_v41 = vld [vmem:[#allocation5 + $0x158] sm:$0xf]  ;;  %v4424_v42 = vld [vmem:[#allocation5 + $0x16c] sm:$0xf0]  ;;  %v4298_v44 = vor.u32 %v4469_v33, %v4295_v34 }
  0x4b   : > { %1487 = vmatpush.bf16.msra.mxu2 %v3978_v6  ;;  %v4293_v45 = vld [vmem:[#allocation5 + $0x2d8] sm:$0xf]  ;;  %v4472_v46 = vld [vmem:[#allocation5 + $0x2ec] sm:$0xf0]  ;;  %v4808_v47 = vor.u32 %v4314_v37, %v3671_v38  ;;  %v4102_v48 = vor.u32 %v4424_v42, %v4101_v41  ;;  %v4316_v52 = vld [vmem:[%s4792_s14 + $0x14] sm:$0xf] }
  0x4c   : > { %1656 = vmatpush.bf16.msra.mxu3 %v4170_v10  ;;  %v4294_v49 = vor.u32 %v4472_v46, %v4293_v45  ;;  %v3677_v50 = vld [vmem:[%s4792_s14 + $0x10] sm:$0xf]  ;;  %v4317_v51 = vld [vmem:[%s4792_s14 + $0x14] sm:$0xf0]  ;;  %v3679_v53 = vld [vmem:[%s4792_s14 + $0x18] sm:$0xf0] }
  0x4d   : > { %1150 = vmatpush.bf16.msra.mxu0 %v3950_v16  ;;  %v4818_v54 = vor.u32 %v4317_v51, %v3677_v50  ;;  %v4820_v55 = vor.u32 %v4316_v52, %v3679_v53  ;;  %v3685_v56 = vld [vmem:[%s4792_s14 + $0x20] sm:$0xf]  ;;  %v4319_v57 = vld [vmem:[%s4792_s14 + $0x24] sm:$0xf0]  ;;  %v4318_v58 = vld [vmem:[%s4792_s14 + $0x24] sm:$0xf] }
  0x4e   : > { %1319 = vmatpush.bf16.msra.mxu1 %v4142_v19  ;;  %v3687_v59 = vld [vmem:[%s4792_s14 + $0x28] sm:$0xf0]  ;;  %v4830_v60 = vor.u32 %v4319_v57, %v3685_v56  ;;  %v4079_v63 = vld [vmem:[#allocation5 + $0x140] sm:$0xf0]  ;;  %v4077_v3 = vld [vmem:[#allocation5 + $0x128] sm:$0xf] }
  0x4f   : > { %1488 = vmatpush.bf16.msra.mxu2 %v3954_v20  ;;  %v4832_v61 = vor.u32 %v4318_v58, %v3687_v59  ;;  %v4415_v62 = vld [vmem:[#allocation5 + $0x12c] sm:$0xf]  ;;  %v4271_v2 = vld [vmem:[#allocation5 + $0x2c0] sm:$0xf0]  ;;  %v4418_v4 = vld [vmem:[#allocation5 + $0x13c] sm:$0xf0] }
  0x50   : > { %1657 = vmatpush.bf16.msra.mxu3 %v4146_v24  ;;  %v4463_v0 = vld [vmem:[#allocation5 + $0x2ac] sm:$0xf]  ;;  %v4082_v1 = vor.u32 %v4415_v62, %v4079_v63  ;;  %v4078_v6 = vor.u32 %v4418_v4, %v4077_v3  ;;  %v4269_v7 = vld [vmem:[#allocation5 + $0x2a8] sm:$0xf]  ;;  %v4466_v8 = vld [vmem:[#allocation5 + $0x2bc] sm:$0xf0] }
  0x51   : > { %1151 = vmatpush.bf16.msra.mxu0 %v3926_v31  ;;  %5737 = vst [vmem:[#allocation11_spill] sm:$0xff] %v4832_v61  ;;  %v4274_v5 = vor.u32 %v4463_v0, %v4271_v2  ;;  %v4270_v9 = vor.u32 %v4466_v8, %v4269_v7  ;;  %v3693_v10 = vld [vmem:[%s4792_s14 + $0x30] sm:$0xf]  ;;  %v4321_v11 = vld [vmem:[%s4792_s14 + $0x34] sm:$0xf0]  ;;  %s4474_s15 = smul.u32 1536, %s4788_s5 }
  0x52   : > { %1320 = vmatpush.bf16.msra.mxu1 %v4118_v35  ;;  %v4320_v12 = vld [vmem:[%s4792_s14 + $0x34] sm:$0xf]  ;;  %v3695_v13 = vld [vmem:[%s4792_s14 + $0x38] sm:$0xf0]  ;;  %v4842_v14 = vor.u32 %v4321_v11, %v3693_v10  ;;  %v3701_v16 = vld [vmem:[%s4792_s14 + $0x40] sm:$0xf] }
  0x53   : > { %1489 = vmatpush.bf16.msra.mxu2 %v3930_v36  ;;  %v4844_v15 = vor.u32 %v4320_v12, %v3695_v13  ;;  %v4323_v17 = vld [vmem:[%s4792_s14 + $0x44] sm:$0xf0]  ;;  %v4322_v18 = vld [vmem:[%s4792_s14 + $0x44] sm:$0xf]  ;;  %v3703_v19 = vld [vmem:[%s4792_s14 + $0x48] sm:$0xf0] }
  0x54   : > { %1658 = vmatpush.bf16.msra.mxu3 %v4122_v39  ;;  %1152 = vmatmul.bf16.vlgmr.msra.gmra.mxu0 %v4806_v43  ;;  %v4854_v20 = vor.u32 %v4323_v17, %v3701_v16  ;;  %v4856_v21 = vor.u32 %v4322_v18, %v3703_v19  ;;  %v3709_v22 = vld [vmem:[%s4792_s14 + $0x50] sm:$0xf]  ;;  %v4325_v23 = vld [vmem:[%s4792_s14 + $0x54] sm:$0xf0]  ;;  %v4324_v24 = vld [vmem:[%s4792_s14 + $0x54] sm:$0xf] }
  0x55   : > { %1321 = vmatmul.bf16.vlgmr.msra.gmra.mxu1 %v4808_v47  ;;  %1820 = vmatpush.bf16.msrb.mxu0 %v4102_v48  ;;  %v3711_v25 = vld [vmem:[%s4792_s14 + $0x58] sm:$0xf0]  ;;  %v4866_v26 = vor.u32 %v4325_v23, %v3709_v22  ;;  %v3717_v28 = vld [vmem:[%s4792_s14 + $0x60] sm:$0xf]  ;;  %v4327_v29 = vld [vmem:[%s4792_s14 + $0x64] sm:$0xf0] }
  0x56   : > { %1490 = vmatmul.bf16.vlgmr.msra.gmra.mxu2 %v4806_v43  ;;  %1989 = vmatpush.bf16.msrb.mxu1 %v4294_v49  ;;  %v4868_v27 = vor.u32 %v4324_v24, %v3711_v25  ;;  %v4326_v30 = vld [vmem:[%s4792_s14 + $0x64] sm:$0xf]  ;;  %v3719_v31 = vld [vmem:[%s4792_s14 + $0x68] sm:$0xf0]  ;;  %v4878_v32 = vor.u32 %v4327_v29, %v3717_v28  ;;  %v4409_v34 = vld [vmem:[#allocation5 + $0xfc] sm:$0xf] }
  0x57   : > { %2158 = vmatpush.bf16.msrb.mxu2 %v4106_v40  ;;  %1659 = vmatmul.bf16.vlgmr.msra.gmra.mxu3 %v4808_v47  ;;  %v4880_v33 = vor.u32 %v4326_v30, %v3719_v31  ;;  %v4055_v35 = vld [vmem:[#allocation5 + $0x110] sm:$0xf0]  ;;  %v4457_v36 = vld [vmem:[#allocation5 + $0x27c] sm:$0xf]  ;;  %v3725_v40 = vld [vmem:[%s4792_s14 + $0x70] sm:$0xf] }
  0x58   : > { %2327 = vmatpush.bf16.msrb.mxu3 %v4298_v44  ;;  %v4058_v37 = vor.u32 %v4409_v34, %v4055_v35  ;;  %v4247_v38 = vld [vmem:[#allocation5 + $0x290] sm:$0xf0]  ;;  %v4329_v41 = vld [vmem:[%s4792_s14 + $0x74] sm:$0xf0]  ;;  %v3727_v44 = vld [vmem:[%s4792_s14 + $0x78] sm:$0xf0] }
  0x59   : > { %1821 = vmatpush.bf16.msrb.mxu0 %v4078_v6  ;;  %v4250_v39 = vor.u32 %v4457_v36, %v4247_v38  ;;  %v4328_v42 = vld [vmem:[%s4792_s14 + $0x74] sm:$0xf]  ;;  %v4053_v45 = vld [vmem:[#allocation5 + $0xf8] sm:$0xf]  ;;  %v4412_v46 = vld [vmem:[#allocation5 + $0x10c] sm:$0xf0]  ;;  %v4890_v51 = vor.u32 %v4329_v41, %v3725_v40 }
  0x5a   : > { %1990 = vmatpush.bf16.msrb.mxu1 %v4270_v9  ;;  %v4245_v48 = vld [vmem:[#allocation5 + $0x278] sm:$0xf]  ;;  %v4054_v49 = vor.u32 %v4412_v46, %v4053_v45  ;;  %v4460_v50 = vld [vmem:[#allocation5 + $0x28c] sm:$0xf0]  ;;  %v4892_v53 = vor.u32 %v4328_v42, %v3727_v44  ;;  %v3733_v56 = vld [vmem:[%s4792_s14 + $0x80] sm:$0xf] }
  0x5b   : > { %2159 = vmatpush.bf16.msrb.mxu2 %v4082_v1  ;;  %v4246_v52 = vor.u32 %v4460_v50, %v4245_v48  ;;  %v4331_v57 = vld [vmem:[%s4792_s14 + $0x84] sm:$0xf0]  ;;  %v4330_v58 = vld [vmem:[%s4792_s14 + $0x84] sm:$0xf]  ;;  %v3735_v59 = vld [vmem:[%s4792_s14 + $0x88] sm:$0xf0] }
  0x5c   : > { %2328 = vmatpush.bf16.msrb.mxu3 %v4274_v5  ;;  %v4902_v62 = vor.u32 %v4331_v57, %v3733_v56  ;;  %v4904_v0 = vor.u32 %v4330_v58, %v3735_v59  ;;  %v3741_v9 = vld [vmem:[%s4792_s14 + $0x90] sm:$0xf]  ;;  %v4333_v10 = vld [vmem:[%s4792_s14 + $0x94] sm:$0xf0]  ;;  %s4913_s20 = scalar_lea.vmem [#allocation7], %s4474_s15  ;;  %s4475_s8 = smul.u32 1536, %s4714_s13 }
  0x5d   : > { %1822 = vmatpush.bf16.msrb.mxu0 %v4054_v49  ;;  %v4332_v11 = vld [vmem:[%s4792_s14 + $0x94] sm:$0xf]  ;;  %v3743_v12 = vld [vmem:[%s4792_s14 + $0x98] sm:$0xf0]  ;;  %v4918_v16 = vor.u32 %v4333_v10, %v3741_v9  ;;  %v4335_v38 = vld [vmem:[%s4792_s14 + $0xa4] sm:$0xf0] }
  0x5e   : > { %1991 = vmatpush.bf16.msrb.mxu1 %v4246_v52  ;;  %v4920_v19 = vor.u32 %v4332_v11, %v3743_v12  ;;  %v3751_v40 = vld [vmem:[%s4792_s14 + $0xa8] sm:$0xf0]  ;;  %v4031_v57 = vld [vmem:[#allocation5 + $0xe0] sm:$0xf0]  ;;  %v3757_v9 = vld [vmem:[%s4792_s14 + $0xb0] sm:$0xf]  ;;  %s3569_s19 = scalar_lea.hbm %s5673_s2, %s4475_s8 }
  0x5f   : > { %2160 = vmatpush.bf16.msrb.mxu2 %v4058_v37  ;;  %v3749_v37 = vld [vmem:[%s4792_s14 + $0xa0] sm:$0xf]  ;;  %v4403_v56 = vld [vmem:[#allocation5 + $0xcc] sm:$0xf]  ;;  %v4337_v10 = vld [vmem:[%s4792_s14 + $0xb4] sm:$0xf0] }
  0x60   : > { %2329 = vmatpush.bf16.msrb.mxu3 %v4250_v39  ;;  %v4334_v39 = vld [vmem:[%s4792_s14 + $0xa4] sm:$0xf]  ;;  %v4932_v42 = vor.u32 %v4335_v38, %v3749_v37  ;;  %v4034_v58 = vor.u32 %v4403_v56, %v4031_v57  ;;  %v4451_v59 = vld [vmem:[#allocation5 + $0x24c] sm:$0xf]  ;;  %v4336_v11 = vld [vmem:[%s4792_s14 + $0xb4] sm:$0xf] }
  0x61   : > { %v4934_v46 = vor.u32 %v4334_v39, %v3751_v40  ;;  %v3759_v12 = vld [vmem:[%s4792_s14 + $0xb8] sm:$0xf0]  ;;  %v3767_v56 = vld [vmem:[%s4792_s14 + $0xc8] sm:$0xf0]  ;;  %s3570_s21 = sshll.u32 %s4913_s20, 4  ;;  %s3572_s22 = sshll.u32 %s3569_s19, 4  ;;  %s3571_s21 = int_to_ptr.vmem [resolvable:$true] %s3570_s21  ;;  %s3573_s22 = int_to_ptr.hbm [resolvable:$true] %s3572_s22 }
  0x62   : > { %s3557_s13 = scalar_lea.sflag [#allocation4], %s4788_s5  ;;  %s4613_s24 = sshra.s32 %s3573_s22, 4  ;;  %s4614_s24 = int_to_ptr.hbm [resolvable:$true] %s4613_s24 }
  0x63   : > { %2161 = vmatpush.bf16.msrb.mxu2 %v4034_v58  ;;  %s4615_s25 = scalar_lea.hbm %s4614_s24, 1536  ;;  %s4619_s3 = scalar_lea.hbm %s5673_s2, 3072 }
  0x64   : > { %1157 = vmatmul.bf16.gmra.mxu0 %v4818_v54  ;;  %p4616_p1 = scmp.ne.s32.totalorder %s4614_s24, %s4615_s25  ;;  %p4620_p11 = scmp.lt.s32.totalorder %s4614_s24, %s5673_s2 }
  0x65   : > { %1326 = vmatmul.bf16.gmra.mxu1 %v4820_v55  ;;  %p4621_p9 = scmp.lt.s32.totalorder %s4619_s3, %s4615_s25 }
  0x66   : > { %1495 = vmatmul.bf16.gmra.mxu2 %v4818_v54  ;;  %p4617_p4 = pnand %p4616_p1, %p4760_p7 }
  0x67   : > { %1664 = vmatmul.bf16.gmra.mxu3 %v4820_v55  ;;  %p4622_p2 = por %p4621_p9, %p4620_p11 }
  0x68   : > { %p4618_p8 = pneg %p4617_p4 }
  0x6a   : > { %p4623_p10 = pnand %p4622_p2, %p4618_p8 }
  0x74   : > { %1162 = vmatmul.bf16.gmra.mxu0 %v4830_v60 }
  0x75   : > { %1331 = vmatmul.bf16.gmra.mxu1 %v4832_v61 }
  0x76   : > { %1500 = vmatmul.bf16.gmra.mxu2 %v4830_v60 }
  0x77   : > { %1669 = vmatmul.bf16.gmra.mxu3 %v4832_v61 }
  0x84   : > { %1167 = vmatmul.bf16.gmra.mxu0 %v4842_v14 }
  0x85   : > { %1336 = vmatmul.bf16.gmra.mxu1 %v4844_v15 }
  0x86   : > { %1505 = vmatmul.bf16.gmra.mxu2 %v4842_v14 }
  0x87   : > { %1674 = vmatmul.bf16.gmra.mxu3 %v4844_v15 }
  0x94   : > { %1172 = vmatmul.bf16.gmra.mxu0 %v4854_v20 }
  0x95   : > { %1341 = vmatmul.bf16.gmra.mxu1 %v4856_v21 }
  0x96   : > { %1510 = vmatmul.bf16.gmra.mxu2 %v4854_v20 }
  0x97   : > { %1679 = vmatmul.bf16.gmra.mxu3 %v4856_v21 }
  0xa4   : > { %1177 = vmatmul.bf16.gmra.mxu0 %v4866_v26 }
  0xa5   : > { %1346 = vmatmul.bf16.gmra.mxu1 %v4868_v27 }
  0xa6   : > { %1515 = vmatmul.bf16.gmra.mxu2 %v4866_v26 }
  0xa7   : > { %1684 = vmatmul.bf16.gmra.mxu3 %v4868_v27 }
  0xb4   : > { %1182 = vmatmul.bf16.gmra.mxu0 %v4878_v32 }
  0xb5   : > { %1351 = vmatmul.bf16.gmra.mxu1 %v4880_v33 }
  0xb6   : > { %1520 = vmatmul.bf16.gmra.mxu2 %v4878_v32 }
  0xb7   : > { %1689 = vmatmul.bf16.gmra.mxu3 %v4880_v33 }
  0xc4   : > { %1187 = vmatmul.bf16.gmra.mxu0 %v4890_v51 }
  0xc5   : > { %1356 = vmatmul.bf16.gmra.mxu1 %v4892_v53 }
  0xc6   : > { %1525 = vmatmul.bf16.gmra.mxu2 %v4890_v51 }
  0xc7   : > { %1694 = vmatmul.bf16.gmra.mxu3 %v4892_v53 }
  0xd1   : > { %v1153_v63 = vpop.f32.mrf.mxu0 }
  0xd2   : > { %v1322_v1 = vpop.f32.mrf.mxu1 }
  0xd3   : > { %v1323_v2 = vadd.f32 %v1322_v1, %v1153_v63  ;;  %v4223_v63 = vld [vmem:[#allocation5 + $0x260] sm:$0xf0] }
  0xd4   : > { %1192 = vmatmul.bf16.gmra.mxu0 %v4902_v62 }
  0xd5   : > { %1361 = vmatmul.bf16.gmra.mxu1 %v4904_v0 }
  0xd6   : > { %1530 = vmatmul.bf16.gmra.mxu2 %v4902_v62 }
  0xd7   : > { %1699 = vmatmul.bf16.gmra.mxu3 %v4904_v0 }
  0xd9   : > { %v1491_v3 = vpop.f32.mrf.mxu2  ;;  %v1155_v5 = vpop.f32.mrf.mxu0 }
  0xda   : > { %v1660_v4 = vpop.f32.mrf.mxu3  ;;  %v1324_v7 = vpop.f32.mrf.mxu1 }
  0xdb   : > { %v1661_v6 = vadd.f32 %v1660_v4, %v1491_v3  ;;  %v1325_v22 = vadd.f32 %v1324_v7, %v1155_v5  ;;  %v4226_v3 = vor.u32 %v4451_v59, %v4223_v63 }
  0xdd   : > { %v3172_v8 = vpack.c.bf16 %v1661_v6, %v1323_v2  ;;  %2330 = vmatpush.bf16.msrb.mxu3 %v4226_v3 }
  0xdf   : > { %3364 = vst [vmem:[%s4913_s20] sm:$0xff] %v3172_v8 }
  0xe1   : > { %v1493_v13 = vpop.f32.mrf.mxu2  ;;  %v1158_v18 = vpop.f32.mrf.mxu0 }
  0xe2   : > { %v1662_v17 = vpop.f32.mrf.mxu3  ;;  %v1327_v24 = vpop.f32.mrf.mxu1 }
  0xe3   : > { %v1663_v23 = vadd.f32 %v1662_v17, %v1493_v13  ;;  %v1328_v28 = vadd.f32 %v1327_v24, %v1158_v18  ;;  %v4029_v13 = vld [vmem:[#allocation5 + $0xc8] sm:$0xf]  ;;  %v4406_v17 = vld [vmem:[#allocation5 + $0xdc] sm:$0xf0] }
  0xe4   : > { %1197 = vmatmul.bf16.gmra.mxu0 %v4918_v16  ;;  %v4030_v18 = vor.u32 %v4406_v17, %v4029_v13  ;;  %v3773_v13 = vld [vmem:[%s4792_s14 + $0xd0] sm:$0xf]  ;;  %v4341_v17 = vld [vmem:[%s4792_s14 + $0xd4] sm:$0xf0] }
  0xe5   : > { %v3175_v25 = vpack.c.bf16 %v1663_v23, %v1325_v22  ;;  %1366 = vmatmul.bf16.gmra.mxu1 %v4920_v19  ;;  %v4221_v22 = vld [vmem:[#allocation5 + $0x248] sm:$0xf]  ;;  %v4454_v23 = vld [vmem:[#allocation5 + $0x25c] sm:$0xf0] }
  0xe6   : > { %1535 = vmatmul.bf16.gmra.mxu2 %v4918_v16  ;;  %1823 = vmatpush.bf16.msrb.mxu0 %v4030_v18  ;;  %v4340_v18 = vld [vmem:[%s4792_s14 + $0xd4] sm:$0xf] }
  0xe7   : > { %3367 = vst [vmem:[%s4913_s20 + $0x18] sm:$0xff] %v3175_v25  ;;  %1704 = vmatmul.bf16.gmra.mxu3 %v4920_v19  ;;  %v4946_v25 = vor.u32 %v4337_v10, %v3757_v9 }
  0xe9   : > { %v1496_v29 = vpop.f32.mrf.mxu2  ;;  %v1160_v31 = vpop.f32.mrf.mxu0 }
  0xea   : > { %v1665_v30 = vpop.f32.mrf.mxu3  ;;  %v1329_v35 = vpop.f32.mrf.mxu1 }
  0xeb   : > { %v1666_v34 = vadd.f32 %v1665_v30, %v1496_v29  ;;  %v1330_v48 = vadd.f32 %v1329_v35, %v1160_v31  ;;  %v4948_v31 = vor.u32 %v4336_v11, %v3759_v12 }
  0xed   : > { %v3178_v36 = vpack.c.bf16 %v1666_v34, %v1328_v28  ;;  %v4222_v28 = vor.u32 %v4454_v23, %v4221_v22  ;;  %v3775_v22 = vld [vmem:[%s4792_s14 + $0xd8] sm:$0xf0] }
  0xef   : > { %3370 = vst [vmem:[%s4913_s20 + $0x30] sm:$0xff] %v3178_v36  ;;  %1992 = vmatpush.bf16.msrb.mxu1 %v4222_v28 }
  0xf1   : > { %v1498_v41 = vpop.f32.mrf.mxu2  ;;  %v1163_v45 = vpop.f32.mrf.mxu0 }
  0xf2   : > { %v1667_v44 = vpop.f32.mrf.mxu3  ;;  %v1332_v50 = vpop.f32.mrf.mxu1 }
  0xf3   : > { %v1668_v49 = vadd.f32 %v1667_v44, %v1498_v41  ;;  %v1333_v1 = vadd.f32 %v1332_v50, %v1163_v45  ;;  %v4339_v50 = vld [vmem:[%s4792_s14 + $0xc4] sm:$0xf0] }
  0xf4   : > { %1202 = vmatmul.bf16.gmra.mxu0 %v4932_v42 }
  0xf5   : > { %v3181_v52 = vpack.c.bf16 %v1668_v49, %v1330_v48  ;;  %1371 = vmatmul.bf16.gmra.mxu1 %v4934_v46  ;;  %v3765_v49 = vld [vmem:[%s4792_s14 + $0xc0] sm:$0xf] }
  0xf6   : > { %1540 = vmatmul.bf16.gmra.mxu2 %v4932_v42  ;;  %v4960_v58 = vor.u32 %v4339_v50, %v3765_v49  ;;  %v3781_v49 = vld [vmem:[%s4792_s14 + $0xe0] sm:$0xf]  ;;  %v4343_v50 = vld [vmem:[%s4792_s14 + $0xe4] sm:$0xf0] }
  0xf7   : > { %3373 = vst [vmem:[%s4913_s20 + $0x48] sm:$0xff] %v3181_v52  ;;  %1709 = vmatmul.bf16.gmra.mxu3 %v4934_v46  ;;  %v4338_v52 = vld [vmem:[%s4792_s14 + $0xc4] sm:$0xf] }
  0xf9   : > { %v1501_v2 = vpop.f32.mrf.mxu2  ;;  %v1165_v5 = vpop.f32.mrf.mxu0 }
  0xfa   : > { %v1670_v4 = vpop.f32.mrf.mxu3  ;;  %v1334_v7 = vpop.f32.mrf.mxu1 }
  0xfb   : > { %v1671_v6 = vadd.f32 %v1670_v4, %v1501_v2  ;;  %v1335_v34 = vadd.f32 %v1334_v7, %v1165_v5 }
  0xfd   : > { %v3184_v8 = vpack.c.bf16 %v1671_v6, %v1333_v1  ;;  %v4962_v1 = vor.u32 %v4338_v52, %v3767_v56  ;;  %v4342_v52 = vld [vmem:[%s4792_s14 + $0xe4] sm:$0xf]  ;;  %v3783_v56 = vld [vmem:[%s4792_s14 + $0xe8] sm:$0xf0] }
  0xff   : > { %3376 = vst [vmem:[%s4913_s20 + $0x60] sm:$0xff] %v3184_v8 }
 0x101   : > { %v1503_v24 = vpop.f32.mrf.mxu2  ;;  %v1168_v30 = vpop.f32.mrf.mxu0 }
 0x102   : > { %v1672_v29 = vpop.f32.mrf.mxu3  ;;  %v1337_v36 = vpop.f32.mrf.mxu1 }
 0x103   : > { %v1673_v35 = vadd.f32 %v1672_v29, %v1503_v24  ;;  %v1338_v38 = vadd.f32 %v1337_v36, %v1168_v30  ;;  %v4974_v24 = vor.u32 %v4341_v17, %v3773_v13  ;;  %v4976_v30 = vor.u32 %v4340_v18, %v3775_v22 }
 0x104   : > { %1207 = vmatmul.bf16.gmra.mxu0 %v4946_v25 }
 0x105   : > { %v3187_v37 = vpack.c.bf16 %v1673_v35, %v1335_v34  ;;  %1376 = vmatmul.bf16.gmra.mxu1 %v4948_v31 }
 0x106   : > { %1545 = vmatmul.bf16.gmra.mxu2 %v4946_v25 }
 0x107   : > { %3379 = vst [vmem:[%s4913_s20 + $0x78] sm:$0xff] %v3187_v37  ;;  %1714 = vmatmul.bf16.gmra.mxu3 %v4948_v31 }
 0x109   : > { %v1506_v39 = vpop.f32.mrf.mxu2  ;;  %v1170_v41 = vpop.f32.mrf.mxu0 }
 0x10a   : > { %v1675_v40 = vpop.f32.mrf.mxu3  ;;  %v1339_v45 = vpop.f32.mrf.mxu1 }
 0x10b   : > { %v1676_v44 = vadd.f32 %v1675_v40, %v1506_v39  ;;  %v1340_v2 = vadd.f32 %v1339_v45, %v1170_v41 }
 0x10d   : > { %v3190_v48 = vpack.c.bf16 %v1676_v44, %v1338_v38 }
 0x10f   : > { %3382 = vst [vmem:[%s4913_s20 + $0x90] sm:$0xff] %v3190_v48 }
 0x111   : > { %v1508_v57 = vpop.f32.mrf.mxu2  ;;  %v1173_v63 = vpop.f32.mrf.mxu0 }
 0x112   : > { %v1677_v59 = vpop.f32.mrf.mxu3  ;;  %v1342_v4 = vpop.f32.mrf.mxu1 }
 0x113   : > { %v1678_v3 = vadd.f32 %v1677_v59, %v1508_v57  ;;  %v1343_v6 = vadd.f32 %v1342_v4, %v1173_v63  ;;  %v4988_v59 = vor.u32 %v4343_v50, %v3781_v49 }
 0x114   : > { %1212 = vmatmul.bf16.gmra.mxu0 %v4960_v58 }
 0x115   : > { %v3193_v5 = vpack.c.bf16 %v1678_v3, %v1340_v2  ;;  %1381 = vmatmul.bf16.gmra.mxu1 %v4962_v1  ;;  %v4990_v3 = vor.u32 %v4342_v52, %v3783_v56 }
 0x116   : > { %1550 = vmatmul.bf16.gmra.mxu2 %v4960_v58 }
 0x117   : > { %3385 = vst [vmem:[%s4913_s20 + $0xa8] sm:$0xff] %v3193_v5  ;;  %1719 = vmatmul.bf16.gmra.mxu3 %v4962_v1 }
 0x119   : > { %v1511_v7 = vpop.f32.mrf.mxu2  ;;  %v1175_v9 = vpop.f32.mrf.mxu0 }
 0x11a   : > { %v1680_v8 = vpop.f32.mrf.mxu3  ;;  %v1344_v11 = vpop.f32.mrf.mxu1 }
 0x11b   : > { %v1681_v10 = vadd.f32 %v1680_v8, %v1511_v7  ;;  %v1345_v34 = vadd.f32 %v1344_v11, %v1175_v9  ;;  %v4397_v8 = vld [vmem:[#allocation5 + $0x9c] sm:$0xf]  ;;  %v4007_v9 = vld [vmem:[#allocation5 + $0xb0] sm:$0xf0] }
 0x11c   : > { %v4445_v11 = vld [vmem:[#allocation5 + $0x21c] sm:$0xf] }
 0x11d   : > { %v3196_v12 = vpack.c.bf16 %v1681_v10, %v1343_v6  ;;  %v4010_v10 = vor.u32 %v4397_v8, %v4007_v9 }
 0x11f   : > { %3388 = vst [vmem:[%s4913_s20 + $0xc0] sm:$0xff] %v3196_v12  ;;  %v4199_v12 = vld [vmem:[#allocation5 + $0x230] sm:$0xf0]  ;;  %2162 = vmatpush.bf16.msrb.mxu2 %v4010_v10 }
 0x120   : > { %v4202_v18 = vor.u32 %v4445_v11, %v4199_v12 }
 0x121   : > { %v1513_v23 = vpop.f32.mrf.mxu2  ;;  %v1178_v29 = vpop.f32.mrf.mxu0 }
 0x122   : > { %v1682_v28 = vpop.f32.mrf.mxu3  ;;  %v1347_v36 = vpop.f32.mrf.mxu1  ;;  %2331 = vmatpush.bf16.msrb.mxu3 %v4202_v18  ;;  %v4346_v18 = vld [vmem:[%s4792_s14 + $0x104] sm:$0xf] }
 0x123   : > { %v1683_v35 = vadd.f32 %v1682_v28, %v1513_v23  ;;  %v1348_v38 = vadd.f32 %v1347_v36, %v1178_v29  ;;  %v4345_v36 = vld [vmem:[%s4792_s14 + $0xf4] sm:$0xf0] }
 0x124   : > { %1217 = vmatmul.bf16.gmra.mxu0 %v4974_v24 }
 0x125   : > { %v3199_v37 = vpack.c.bf16 %v1683_v35, %v1345_v34  ;;  %1386 = vmatmul.bf16.gmra.mxu1 %v4976_v30  ;;  %v3789_v35 = vld [vmem:[%s4792_s14 + $0xf0] sm:$0xf] }
 0x126   : > { %1555 = vmatmul.bf16.gmra.mxu2 %v4974_v24  ;;  %v5002_v49 = vor.u32 %v4345_v36, %v3789_v35 }
 0x127   : > { %3391 = vst [vmem:[%s4913_s20 + $0xd8] sm:$0xff] %v3199_v37  ;;  %1724 = vmatmul.bf16.gmra.mxu3 %v4976_v30  ;;  %v4344_v37 = vld [vmem:[%s4792_s14 + $0xf4] sm:$0xf] }
 0x129   : > { %v1516_v39 = vpop.f32.mrf.mxu2  ;;  %v1180_v41 = vpop.f32.mrf.mxu0 }
 0x12a   : > { %v1685_v40 = vpop.f32.mrf.mxu3  ;;  %v1349_v45 = vpop.f32.mrf.mxu1 }
 0x12b   : > { %v1686_v44 = vadd.f32 %v1685_v40, %v1516_v39  ;;  %v1350_v4 = vadd.f32 %v1349_v45, %v1180_v41  ;;  %v4005_v39 = vld [vmem:[#allocation5 + $0x98] sm:$0xf]  ;;  %v4400_v40 = vld [vmem:[#allocation5 + $0xac] sm:$0xf0] }
 0x12c   : > { %v4006_v41 = vor.u32 %v4400_v40, %v4005_v39  ;;  %v4448_v45 = vld [vmem:[#allocation5 + $0x22c] sm:$0xf0] }
 0x12d   : > { %v3202_v48 = vpack.c.bf16 %v1686_v44, %v1348_v38  ;;  %v3791_v38 = vld [vmem:[%s4792_s14 + $0xf8] sm:$0xf0]  ;;  %v4197_v44 = vld [vmem:[#allocation5 + $0x218] sm:$0xf] }
 0x12e   : > { %v4198_v50 = vor.u32 %v4448_v45, %v4197_v44  ;;  %1824 = vmatpush.bf16.msrb.mxu0 %v4006_v41 }
 0x12f   : > { %3394 = vst [vmem:[%s4913_s20 + $0xf0] sm:$0xff] %v3202_v48 }
 0x130   : > { %1993 = vmatpush.bf16.msrb.mxu1 %v4198_v50 }
 0x131   : > { %v1518_v57 = vpop.f32.mrf.mxu2  ;;  %v1183_v2 = vpop.f32.mrf.mxu0 }
 0x132   : > { %v1687_v63 = vpop.f32.mrf.mxu3  ;;  %v1352_v6 = vpop.f32.mrf.mxu1 }
 0x133   : > { %v1688_v5 = vadd.f32 %v1687_v63, %v1518_v57  ;;  %v1353_v13 = vadd.f32 %v1352_v6, %v1183_v2  ;;  %v5004_v57 = vor.u32 %v4344_v37, %v3791_v38 }
 0x134   : > { %1222 = vmatmul.bf16.gmra.mxu0 %v4988_v59 }
 0x135   : > { %v3205_v7 = vpack.c.bf16 %v1688_v5, %v1350_v4  ;;  %1391 = vmatmul.bf16.gmra.mxu1 %v4990_v3 }
 0x136   : > { %1560 = vmatmul.bf16.gmra.mxu2 %v4988_v59 }
 0x137   : > { %3397 = vst [vmem:[%s4913_s20 + $0x108] sm:$0xff] %v3205_v7  ;;  %1729 = vmatmul.bf16.gmra.mxu3 %v4990_v3 }
 0x139   : > { %v1521_v17 = vpop.f32.mrf.mxu2  ;;  %v1185_v23 = vpop.f32.mrf.mxu0 }
 0x13a   : > { %v1690_v22 = vpop.f32.mrf.mxu3  ;;  %v1354_v29 = vpop.f32.mrf.mxu1 }
 0x13b   : > { %v1691_v28 = vadd.f32 %v1690_v22, %v1521_v17  ;;  %v1355_v63 = vadd.f32 %v1354_v29, %v1185_v23  ;;  %v4347_v17 = vld [vmem:[%s4792_s14 + $0x104] sm:$0xf0]  ;;  %v3799_v22 = vld [vmem:[%s4792_s14 + $0x108] sm:$0xf0] }
 0x13c   : > { %v5018_v35 = vor.u32 %v4346_v18, %v3799_v22 }
 0x13d   : > { %v3208_v34 = vpack.c.bf16 %v1691_v28, %v1353_v13  ;;  %v3797_v13 = vld [vmem:[%s4792_s14 + $0x100] sm:$0xf] }
 0x13e   : > { %v5016_v28 = vor.u32 %v4347_v17, %v3797_v13 }
 0x13f   : > { %3400 = vst [vmem:[%s4913_s20 + $0x120] sm:$0xff] %v3208_v34 }
 0x141   : > { %v1523_v48 = vpop.f32.mrf.mxu2  ;;  %v1188_v56 = vpop.f32.mrf.mxu0 }
 0x142   : > { %v1692_v52 = vpop.f32.mrf.mxu3  ;;  %v1357_v4 = vpop.f32.mrf.mxu1 }
 0x143   : > { %v1693_v2 = vadd.f32 %v1692_v52, %v1523_v48  ;;  %v1358_v6 = vadd.f32 %v1357_v4, %v1188_v56  ;;  %v3805_v56 = vld [vmem:[%s4792_s14 + $0x110] sm:$0xf]  ;;  %v3807_v4 = vld [vmem:[%s4792_s14 + $0x118] sm:$0xf0] }
 0x144   : > { %1227 = vmatmul.bf16.gmra.mxu0 %v5002_v49 }
 0x145   : > { %v3211_v5 = vpack.c.bf16 %v1693_v2, %v1355_v63  ;;  %1396 = vmatmul.bf16.gmra.mxu1 %v5004_v57  ;;  %v4349_v63 = vld [vmem:[%s4792_s14 + $0x114] sm:$0xf0]  ;;  %v4348_v2 = vld [vmem:[%s4792_s14 + $0x114] sm:$0xf] }
 0x146   : > { %1565 = vmatmul.bf16.gmra.mxu2 %v5002_v49 }
 0x147   : > { %3403 = vst [vmem:[%s4913_s20 + $0x138] sm:$0xff] %v3211_v5  ;;  %1734 = vmatmul.bf16.gmra.mxu3 %v5004_v57 }
 0x149   : > { %v1526_v7 = vpop.f32.mrf.mxu2  ;;  %v1190_v9 = vpop.f32.mrf.mxu0 }
 0x14a   : > { %v1695_v8 = vpop.f32.mrf.mxu3  ;;  %v1359_v11 = vpop.f32.mrf.mxu1 }
 0x14b   : > { %v1696_v10 = vadd.f32 %v1695_v8, %v1526_v7  ;;  %v1360_v36 = vadd.f32 %v1359_v11, %v1190_v9  ;;  %v5032_v9 = vor.u32 %v4348_v2, %v3807_v4  ;;  %v4391_v4 = vld [vmem:[#allocation5 + $0x6c] sm:$0xf] }
 0x14d   : > { %v3214_v12 = vpack.c.bf16 %v1696_v10, %v1358_v6  ;;  %v5030_v6 = vor.u32 %v4349_v63, %v3805_v56 }
 0x14f   : > { %3406 = vst [vmem:[%s4913_s20 + $0x150] sm:$0xff] %v3214_v12 }
 0x151   : > { %v1528_v23 = vpop.f32.mrf.mxu2  ;;  %v1193_v34 = vpop.f32.mrf.mxu0 }
 0x152   : > { %v1697_v29 = vpop.f32.mrf.mxu3  ;;  %v1362_v38 = vpop.f32.mrf.mxu1 }
 0x153   : > { %v1698_v37 = vadd.f32 %v1697_v29, %v1528_v23  ;;  %v1363_v40 = vadd.f32 %v1362_v38, %v1193_v34  ;;  %v4351_v38 = vld [vmem:[%s4792_s14 + $0x124] sm:$0xf0] }
 0x154   : > { %1232 = vmatmul.bf16.gmra.mxu0 %v5016_v28 }
 0x155   : > { %v3217_v39 = vpack.c.bf16 %v1698_v37, %v1360_v36  ;;  %1401 = vmatmul.bf16.gmra.mxu1 %v5018_v35  ;;  %v3813_v37 = vld [vmem:[%s4792_s14 + $0x120] sm:$0xf] }
 0x156   : > { %1570 = vmatmul.bf16.gmra.mxu2 %v5016_v28 }
 0x157   : > { %3409 = vst [vmem:[%s4913_s20 + $0x168] sm:$0xff] %v3217_v39  ;;  %1739 = vmatmul.bf16.gmra.mxu3 %v5018_v35  ;;  %v4350_v39 = vld [vmem:[%s4792_s14 + $0x124] sm:$0xf] }
 0x159   : > { %v1531_v41 = vpop.f32.mrf.mxu2  ;;  %v1195_v45 = vpop.f32.mrf.mxu0 }
 0x15a   : > { %v1700_v44 = vpop.f32.mrf.mxu3  ;;  %v1364_v50 = vpop.f32.mrf.mxu1 }
 0x15b   : > { %v1701_v48 = vadd.f32 %v1700_v44, %v1531_v41  ;;  %v1365_v10 = vadd.f32 %v1364_v50, %v1195_v45  ;;  %v5044_v44 = vor.u32 %v4351_v38, %v3813_v37  ;;  %v4352_v37 = vld [vmem:[%s4792_s14 + $0x134] sm:$0xf]  ;;  %v3823_v38 = vld [vmem:[%s4792_s14 + $0x138] sm:$0xf0] }
 0x15d   : > { %v3220_v52 = vpack.c.bf16 %v1701_v48, %v1363_v40  ;;  %v3815_v40 = vld [vmem:[%s4792_s14 + $0x128] sm:$0xf0] }
 0x15e   : > { %v5046_v50 = vor.u32 %v4350_v39, %v3815_v40  ;;  %v3981_v39 = vld [vmem:[#allocation5 + $0x68] sm:$0xf]  ;;  %v4394_v40 = vld [vmem:[#allocation5 + $0x7c] sm:$0xf0] }
 0x15f   : > { %3412 = vst [vmem:[%s4913_s20 + $0x180] sm:$0xff] %v3220_v52 }
 0x161   : > { %v1533_v5 = vpop.f32.mrf.mxu2  ;;  %v1198_v8 = vpop.f32.mrf.mxu0 }
 0x162   : > { %v1702_v7 = vpop.f32.mrf.mxu3  ;;  %v1367_v12 = vpop.f32.mrf.mxu1 }
 0x163   : > { %v1703_v11 = vadd.f32 %v1702_v7, %v1533_v5  ;;  %v1368_v17 = vadd.f32 %v1367_v12, %v1198_v8  ;;  %v3983_v5 = vld [vmem:[#allocation5 + $0x80] sm:$0xf0]  ;;  %v4439_v8 = vld [vmem:[#allocation5 + $0x1ec] sm:$0xf] }
 0x164   : > { %1237 = vmatmul.bf16.gmra.mxu0 %v5030_v6  ;;  %v3986_v7 = vor.u32 %v4391_v4, %v3983_v5  ;;  %v5060_v5 = vor.u32 %v4352_v37, %v3823_v38  ;;  %v4354_v37 = vld [vmem:[%s4792_s14 + $0x144] sm:$0xf]  ;;  %v3831_v38 = vld [vmem:[%s4792_s14 + $0x148] sm:$0xf0] }
 0x165   : > { %v3223_v13 = vpack.c.bf16 %v1703_v11, %v1365_v10  ;;  %1406 = vmatmul.bf16.gmra.mxu1 %v5032_v9  ;;  %v4175_v10 = vld [vmem:[#allocation5 + $0x200] sm:$0xf0] }
 0x166   : > { %1575 = vmatmul.bf16.gmra.mxu2 %v5030_v6 }
 0x167   : > { %3415 = vst [vmem:[%s4913_s20 + $0x198] sm:$0xff] %v3223_v13  ;;  %1744 = vmatmul.bf16.gmra.mxu3 %v5032_v9  ;;  %v4178_v13 = vor.u32 %v4439_v8, %v4175_v10  ;;  %2163 = vmatpush.bf16.msrb.mxu2 %v3986_v7 }
 0x169   : > { %v1536_v18 = vpop.f32.mrf.mxu2  ;;  %v1200_v23 = vpop.f32.mrf.mxu0  ;;  %2332 = vmatpush.bf16.msrb.mxu3 %v4178_v13 }
 0x16a   : > { %v1705_v22 = vpop.f32.mrf.mxu3  ;;  %v1369_v34 = vpop.f32.mrf.mxu1 }
 0x16b   : > { %v1706_v29 = vadd.f32 %v1705_v22, %v1536_v18  ;;  %v1370_v52 = vadd.f32 %v1369_v34, %v1200_v23  ;;  %v3821_v34 = vld [vmem:[%s4792_s14 + $0x130] sm:$0xf] }
 0x16d   : > { %v3226_v36 = vpack.c.bf16 %v1706_v29, %v1368_v17 }
 0x16f   : > { %3418 = vst [vmem:[%s4913_s20 + $0x1b0] sm:$0xff] %v3226_v36  ;;  %v4353_v36 = vld [vmem:[%s4792_s14 + $0x134] sm:$0xf0] }
 0x171   : > { %v1538_v41 = vpop.f32.mrf.mxu2  ;;  %v1203_v48 = vpop.f32.mrf.mxu0 }
 0x172   : > { %v1707_v45 = vpop.f32.mrf.mxu3  ;;  %v1372_v63 = vpop.f32.mrf.mxu1 }
 0x173   : > { %v1708_v56 = vadd.f32 %v1707_v45, %v1538_v41  ;;  %v1373_v11 = vadd.f32 %v1372_v63, %v1203_v48  ;;  %v3982_v41 = vor.u32 %v4394_v40, %v3981_v39  ;;  %v4173_v45 = vld [vmem:[#allocation5 + $0x1e8] sm:$0xf] }
 0x174   : > { %1242 = vmatmul.bf16.gmra.mxu0 %v5044_v44 }
 0x175   : > { %v3229_v2 = vpack.c.bf16 %v1708_v56, %v1370_v52  ;;  %1411 = vmatmul.bf16.gmra.mxu1 %v5046_v50  ;;  %v4442_v52 = vld [vmem:[#allocation5 + $0x1fc] sm:$0xf0]  ;;  %v5058_v56 = vor.u32 %v4353_v36, %v3821_v34  ;;  %1825 = vmatpush.bf16.msrb.mxu0 %v3982_v41  ;;  %v4355_v36 = vld [vmem:[%s4792_s14 + $0x144] sm:$0xf0] }
 0x176   : > { %1580 = vmatmul.bf16.gmra.mxu2 %v5044_v44  ;;  %v4174_v63 = vor.u32 %v4442_v52, %v4173_v45  ;;  %v3829_v34 = vld [vmem:[%s4792_s14 + $0x140] sm:$0xf]  ;;  %v5074_v52 = vor.u32 %v4354_v37, %v3831_v38 }
 0x177   : > { %3421 = vst [vmem:[%s4913_s20 + $0x1c8] sm:$0xff] %v3229_v2  ;;  %1749 = vmatmul.bf16.gmra.mxu3 %v5046_v50  ;;  %v5072_v40 = vor.u32 %v4355_v36, %v3829_v34 }
 0x178   : > { %1994 = vmatpush.bf16.msrb.mxu1 %v4174_v63 }
 0x179   : > { %v1541_v12 = vpop.f32.mrf.mxu2  ;;  %v1205_v18 = vpop.f32.mrf.mxu0 }
 0x17a   : > { %v1710_v17 = vpop.f32.mrf.mxu3  ;;  %v1374_v23 = vpop.f32.mrf.mxu1 }
 0x17b   : > { %v1711_v22 = vadd.f32 %v1710_v17, %v1541_v12  ;;  %v1375_v7 = vadd.f32 %v1374_v23, %v1205_v18 }
 0x17d   : > { %v3232_v29 = vpack.c.bf16 %v1711_v22, %v1373_v11 }
 0x17f   : > { %3424 = vst [vmem:[%s4913_s20 + $0x1e0] sm:$0xff] %v3232_v29 }
 0x181   : > { %v1543_v48 = vpop.f32.mrf.mxu2  ;;  %v1208_v4 = vpop.f32.mrf.mxu0 }
 0x182   : > { %v1712_v2 = vpop.f32.mrf.mxu3  ;;  %v1377_v10 = vpop.f32.mrf.mxu1 }
 0x183   : > { %v1713_v8 = vadd.f32 %v1712_v2, %v1543_v48  ;;  %v1378_v12 = vadd.f32 %v1377_v10, %v1208_v4 }
 0x184   : > { %1247 = vmatmul.bf16.gmra.mxu0 %v5058_v56 }
 0x185   : > { %v3235_v11 = vpack.c.bf16 %v1713_v8, %v1375_v7  ;;  %1416 = vmatmul.bf16.gmra.mxu1 %v5060_v5 }
 0x186   : > { %1585 = vmatmul.bf16.gmra.mxu2 %v5058_v56 }
 0x187   : > { %3427 = vst [vmem:[%s4913_s20 + $0x1f8] sm:$0xff] %v3235_v11  ;;  %1754 = vmatmul.bf16.gmra.mxu3 %v5060_v5 }
 0x189   : > { %v1546_v13 = vpop.f32.mrf.mxu2  ;;  %v1210_v18 = vpop.f32.mrf.mxu0 }
 0x18a   : > { %v1715_v17 = vpop.f32.mrf.mxu3  ;;  %v1379_v23 = vpop.f32.mrf.mxu1 }
 0x18b   : > { %v1716_v22 = vadd.f32 %v1715_v17, %v1546_v13  ;;  %v1380_v48 = vadd.f32 %v1379_v23, %v1210_v18  ;;  %v3837_v18 = vld [vmem:[%s4792_s14 + $0x150] sm:$0xf]  ;;  %v4356_v23 = vld [vmem:[%s4792_s14 + $0x154] sm:$0xf] }
 0x18d   : > { %v3238_v29 = vpack.c.bf16 %v1716_v22, %v1378_v12  ;;  %v4357_v22 = vld [vmem:[%s4792_s14 + $0x154] sm:$0xf0] }
 0x18e   : > { %v5086_v36 = vor.u32 %v4357_v22, %v3837_v18  ;;  %v4358_v18 = vld [vmem:[%s4792_s14 + $0x164] sm:$0xf]  ;;  %v3847_v22 = vld [vmem:[%s4792_s14 + $0x168] sm:$0xf0] }
 0x18f   : > { %3430 = vst [vmem:[%s4913_s20 + $0x210] sm:$0xff] %v3238_v29  ;;  %v3839_v29 = vld [vmem:[%s4792_s14 + $0x158] sm:$0xf0] }
 0x190   : > { %5738 = vst [vmem:[#allocation12_spill] sm:$0xff] %v5086_v36 }
 0x191   : > { %v1548_v39 = vpop.f32.mrf.mxu2  ;;  %v1213_v45 = vpop.f32.mrf.mxu0 }
 0x192   : > { %v1717_v41 = vpop.f32.mrf.mxu3  ;;  %v1382_v2 = vpop.f32.mrf.mxu1 }
 0x193   : > { %v1718_v63 = vadd.f32 %v1717_v41, %v1548_v39  ;;  %v1383_v7 = vadd.f32 %v1382_v2, %v1213_v45  ;;  %v5088_v39 = vor.u32 %v4356_v23, %v3839_v29 }
 0x194   : > { %1252 = vmatmul.bf16.gmra.mxu0 %v5072_v40 }
 0x195   : > { %v3241_v4 = vpack.c.bf16 %v1718_v63, %v1380_v48  ;;  %1421 = vmatmul.bf16.gmra.mxu1 %v5074_v52  ;;  %5739 = vst [vmem:[#allocation13_spill] sm:$0xff] %v5088_v39 }
 0x196   : > { %1590 = vmatmul.bf16.gmra.mxu2 %v5072_v40 }
 0x197   : > { %3433 = vst [vmem:[%s4913_s20 + $0x228] sm:$0xff] %v3241_v4  ;;  %1759 = vmatmul.bf16.gmra.mxu3 %v5074_v52 }
 0x199   : > { %v1551_v8 = vpop.f32.mrf.mxu2  ;;  %v1215_v11 = vpop.f32.mrf.mxu0 }
 0x19a   : > { %v1720_v10 = vpop.f32.mrf.mxu3  ;;  %v1384_v13 = vpop.f32.mrf.mxu1 }
 0x19b   : > { %v1721_v12 = vadd.f32 %v1720_v10, %v1551_v8  ;;  %v1385_v41 = vadd.f32 %v1384_v13, %v1215_v11  ;;  %v3845_v13 = vld [vmem:[%s4792_s14 + $0x160] sm:$0xf] }
 0x19d   : > { %v3244_v17 = vpack.c.bf16 %v1721_v12, %v1383_v7 }
 0x19f   : > { %3436 = vst [vmem:[%s4913_s20 + $0x240] sm:$0xff] %v3244_v17  ;;  %v4359_v17 = vld [vmem:[%s4792_s14 + $0x164] sm:$0xf0] }
 0x1a0   : > { %v5100_v29 = vor.u32 %v4359_v17, %v3845_v13 }
 0x1a1   : > { %v1553_v34 = vpop.f32.mrf.mxu2  ;;  %v1218_v38 = vpop.f32.mrf.mxu0 }
 0x1a2   : > { %v1722_v37 = vpop.f32.mrf.mxu3  ;;  %v1387_v48 = vpop.f32.mrf.mxu1  ;;  %5740 = vst [vmem:[#allocation14_spill] sm:$0xff] %v5100_v29 }
 0x1a3   : > { %v1723_v45 = vadd.f32 %v1722_v37, %v1553_v34  ;;  %v1388_v2 = vadd.f32 %v1387_v48, %v1218_v38 }
 0x1a4   : > { %1257 = vmatmul.bf16.gmra.mxu0 %v5086_v36 }
 0x1a5   : > { %v3247_v63 = vpack.c.bf16 %v1723_v45, %v1385_v41  ;;  %1426 = vmatmul.bf16.gmra.mxu1 %v5088_v39  ;;  %v5102_v41 = vor.u32 %v4358_v18, %v3847_v22 }
 0x1a6   : > { %1595 = vmatmul.bf16.gmra.mxu2 %v5086_v36  ;;  %v4436_v36 = vld [vmem:[#allocation5 + $0x1cc] sm:$0xf0] }
 0x1a7   : > { %3439 = vst [vmem:[%s4913_s20 + $0x258] sm:$0xff] %v3247_v63  ;;  %1764 = vmatmul.bf16.gmra.mxu3 %v5088_v39  ;;  %v4149_v39 = vld [vmem:[#allocation5 + $0x1b8] sm:$0xf] }
 0x1a8   : > { %5741 = vst [vmem:[#allocation15_spill] sm:$0xff] %v5102_v41 }
 0x1a9   : > { %v1556_v4 = vpop.f32.mrf.mxu2  ;;  %v1220_v8 = vpop.f32.mrf.mxu0 }
 0x1aa   : > { %v1725_v7 = vpop.f32.mrf.mxu3  ;;  %v1389_v11 = vpop.f32.mrf.mxu1 }
 0x1ab   : > { %v1726_v10 = vadd.f32 %v1725_v7, %v1556_v4  ;;  %v1390_v38 = vadd.f32 %v1389_v11, %v1220_v8  ;;  %v3959_v4 = vld [vmem:[#allocation5 + $0x50] sm:$0xf0]  ;;  %v4433_v8 = vld [vmem:[#allocation5 + $0x1bc] sm:$0xf] }
 0x1ad   : > { %v3250_v12 = vpack.c.bf16 %v1726_v10, %v1388_v2  ;;  %v4385_v2 = vld [vmem:[#allocation5 + $0x3c] sm:$0xf]  ;;  %v4151_v10 = vld [vmem:[#allocation5 + $0x1d0] sm:$0xf0] }
 0x1ae   : > { %v3962_v7 = vor.u32 %v4385_v2, %v3959_v4  ;;  %v4154_v13 = vor.u32 %v4433_v8, %v4151_v10  ;;  %v3957_v2 = vld [vmem:[#allocation5 + $0x38] sm:$0xf]  ;;  %v4388_v4 = vld [vmem:[#allocation5 + $0x4c] sm:$0xf0]  ;;  %v4150_v8 = vor.u32 %v4436_v36, %v4149_v39 }
 0x1af   : > { %3442 = vst [vmem:[%s4913_s20 + $0x270] sm:$0xff] %v3250_v12 }
 0x1b0   : > { %2164 = vmatpush.bf16.msrb.mxu2 %v3962_v7  ;;  %2333 = vmatpush.bf16.msrb.mxu3 %v4154_v13 }
 0x1b1   : > { %v1558_v23 = vpop.f32.mrf.mxu2  ;;  %v1223_v37 = vpop.f32.mrf.mxu0  ;;  %1995 = vmatpush.bf16.msrb.mxu1 %v4150_v8 }
 0x1b2   : > { %v1727_v34 = vpop.f32.mrf.mxu3  ;;  %v1392_v48 = vpop.f32.mrf.mxu1 }
 0x1b3   : > { %v1728_v45 = vadd.f32 %v1727_v34, %v1558_v23  ;;  %v1393_v11 = vadd.f32 %v1392_v48, %v1223_v37 }
 0x1b4   : > { %1262 = vmatmul.bf16.gmra.mxu0 %v5100_v29 }
 0x1b5   : > { %v3253_v63 = vpack.c.bf16 %v1728_v45, %v1390_v38  ;;  %1431 = vmatmul.bf16.gmra.mxu1 %v5102_v41  ;;  %v3853_v38 = vld [vmem:[%s4792_s14 + $0x170] sm:$0xf]  ;;  %v4361_v45 = vld [vmem:[%s4792_s14 + $0x174] sm:$0xf0] }
 0x1b6   : > { %1600 = vmatmul.bf16.gmra.mxu2 %v5100_v29  ;;  %v3958_v29 = vor.u32 %v4388_v4, %v3957_v2  ;;  %v5114_v48 = vor.u32 %v4361_v45, %v3853_v38  ;;  %v3861_v38 = vld [vmem:[%s4792_s14 + $0x180] sm:$0xf]  ;;  %v4363_v45 = vld [vmem:[%s4792_s14 + $0x184] sm:$0xf0]  ;;  %v3863_v2 = vld [vmem:[%s4792_s14 + $0x188] sm:$0xf0] }
 0x1b7   : > { %3445 = vst [vmem:[%s4913_s20 + $0x288] sm:$0xff] %v3253_v63  ;;  %1769 = vmatmul.bf16.gmra.mxu3 %v5102_v41  ;;  %v4360_v63 = vld [vmem:[%s4792_s14 + $0x174] sm:$0xf]  ;;  %v3855_v41 = vld [vmem:[%s4792_s14 + $0x178] sm:$0xf0] }
 0x1b8   : > { %5742 = vst [vmem:[#allocation16_spill] sm:$0xff] %v5114_v48  ;;  %1826 = vmatpush.bf16.msrb.mxu0 %v3958_v29 }
 0x1b9   : > { %v1561_v12 = vpop.f32.mrf.mxu2  ;;  %v1225_v18 = vpop.f32.mrf.mxu0 }
 0x1ba   : > { %v1730_v17 = vpop.f32.mrf.mxu3  ;;  %v1394_v23 = vpop.f32.mrf.mxu1 }
 0x1bb   : > { %v1731_v22 = vadd.f32 %v1730_v17, %v1561_v12  ;;  %v5116_v12 = vor.u32 %v4360_v63, %v3855_v41  ;;  %v4362_v63 = vld [vmem:[%s4792_s14 + $0x184] sm:$0xf] }
 0x1bd   : > { %v3256_v34 = vpack.c.bf16 %v1731_v22, %v1393_v11  ;;  %5743 = vst [vmem:[#allocation17_spill] sm:$0xff] %v5116_v12  ;;  %v1395_v11 = vadd.f32 %v1394_v23, %v1225_v18 }
 0x1bf   : > { %3448 = vst [vmem:[%s4913_s20 + $0x2a0] sm:$0xff] %v3256_v34 }
 0x1c1   : > { %v1563_v37 = vpop.f32.mrf.mxu2  ;;  %v1228_v10 = vpop.f32.mrf.mxu0 }
 0x1c2   : > { %v1732_v7 = vpop.f32.mrf.mxu3  ;;  %v1397_v17 = vpop.f32.mrf.mxu1 }
 0x1c3   : > { %v1733_v13 = vadd.f32 %v1732_v7, %v1563_v37  ;;  %v1398_v36 = vadd.f32 %v1397_v17, %v1228_v10  ;;  %v5128_v37 = vor.u32 %v4363_v45, %v3861_v38  ;;  %v3869_v38 = vld [vmem:[%s4792_s14 + $0x190] sm:$0xf]  ;;  %v4365_v45 = vld [vmem:[%s4792_s14 + $0x194] sm:$0xf0] }
 0x1c4   : > { %1267 = vmatmul.bf16.gmra.mxu0 %v5114_v48 }
 0x1c5   : > { %v3259_v22 = vpack.c.bf16 %v1733_v13, %v1395_v11  ;;  %1436 = vmatmul.bf16.gmra.mxu1 %v5116_v12  ;;  %5744 = vst [vmem:[#allocation18_spill] sm:$0xff] %v5128_v37  ;;  %v5130_v11 = vor.u32 %v4362_v63, %v3863_v2  ;;  %v4364_v63 = vld [vmem:[%s4792_s14 + $0x194] sm:$0xf]  ;;  %v3871_v2 = vld [vmem:[%s4792_s14 + $0x198] sm:$0xf0] }
 0x1c6   : > { %1605 = vmatmul.bf16.gmra.mxu2 %v5114_v48  ;;  %v4430_v48 = vld [vmem:[#allocation5 + $0x19c] sm:$0xf0] }
 0x1c7   : > { %3451 = vst [vmem:[%s4913_s20 + $0x2b8] sm:$0xff] %v3259_v22  ;;  %1774 = vmatmul.bf16.gmra.mxu3 %v5116_v12  ;;  %v4125_v12 = vld [vmem:[#allocation5 + $0x188] sm:$0xf] }
 0x1c8   : > { %5745 = vst [vmem:[#allocation19_spill] sm:$0xff] %v5130_v11 }
 0x1c9   : > { %v1566_v39 = vpop.f32.mrf.mxu2  ;;  %v1230_v41 = vpop.f32.mrf.mxu0 }
 0x1ca   : > { %v1735_v29 = vpop.f32.mrf.mxu3  ;;  %v1399_v23 = vpop.f32.mrf.mxu1 }
 0x1cb   : > { %v1736_v18 = vadd.f32 %v1735_v29, %v1566_v39  ;;  %v1400_v10 = vadd.f32 %v1399_v23, %v1230_v41 }
 0x1cd   : > { %v3262_v34 = vpack.c.bf16 %v1736_v18, %v1398_v36 }
 0x1cf   : > { %3454 = vst [vmem:[%s4913_s20 + $0x2d0] sm:$0xff] %v3262_v34 }
 0x1d1   : > { %v1568_v4 = vpop.f32.mrf.mxu2  ;;  %v1233_v7 = vpop.f32.mrf.mxu0 }
 0x1d2   : > { %v1737_v8 = vpop.f32.mrf.mxu3  ;;  %v1402_v17 = vpop.f32.mrf.mxu1 }
 0x1d3   : > { %v1738_v13 = vadd.f32 %v1737_v8, %v1568_v4  ;;  %v1403_v36 = vadd.f32 %v1402_v17, %v1233_v7  ;;  %v5142_v8 = vor.u32 %v4365_v45, %v3869_v38 }
 0x1d4   : > { %1272 = vmatmul.bf16.gmra.mxu0 %v5128_v37 }
 0x1d5   : > { %v3265_v22 = vpack.c.bf16 %v1738_v13, %v1400_v10  ;;  %1441 = vmatmul.bf16.gmra.mxu1 %v5130_v11  ;;  %5746 = vst [vmem:[#allocation20_spill] sm:$0xff] %v5142_v8 }
 0x1d6   : > { %1610 = vmatmul.bf16.gmra.mxu2 %v5128_v37 }
 0x1d7   : > { %3457 = vst [vmem:[%s4913_s20 + $0x2e8] sm:$0xff] %v3265_v22  ;;  %1779 = vmatmul.bf16.gmra.mxu3 %v5130_v11  ;;  %v5144_v22 = vor.u32 %v4364_v63, %v3871_v2  ;;  %v3877_v63 = vld [vmem:[%s4792_s14 + $0x1a0] sm:$0xf]  ;;  %v4367_v2 = vld [vmem:[%s4792_s14 + $0x1a4] sm:$0xf0] }
 0x1d9   : > { %v1571_v39 = vpop.f32.mrf.mxu2  ;;  %v1235_v41 = vpop.f32.mrf.mxu0  ;;  %5747 = vst [vmem:[#allocation21_spill] sm:$0xff] %v5144_v22 }
 0x1da   : > { %v1740_v29 = vpop.f32.mrf.mxu3  ;;  %v1404_v23 = vpop.f32.mrf.mxu1 }
 0x1db   : > { %v1741_v18 = vadd.f32 %v1740_v29, %v1571_v39  ;;  %v1405_v7 = vadd.f32 %v1404_v23, %v1235_v41 }
 0x1dd   : > { %v3268_v34 = vpack.c.bf16 %v1741_v18, %v1403_v36 }
 0x1df   : > { %3460 = vst [vmem:[%s4913_s20 + $0x300] sm:$0xff] %v3268_v34 }
 0x1e1   : > { %v1573_v4 = vpop.f32.mrf.mxu2  ;;  %v1238_v13 = vpop.f32.mrf.mxu0 }
 0x1e2   : > { %v1742_v10 = vpop.f32.mrf.mxu3  ;;  %v1407_v39 = vpop.f32.mrf.mxu1 }
 0x1e3   : > { %v1743_v17 = vadd.f32 %v1742_v10, %v1573_v4  ;;  %v1408_v29 = vadd.f32 %v1407_v39, %v1238_v13  ;;  %v4366_v4 = vld [vmem:[%s4792_s14 + $0x1a4] sm:$0xf]  ;;  %v3879_v10 = vld [vmem:[%s4792_s14 + $0x1a8] sm:$0xf0] }
 0x1e4   : > { %1277 = vmatmul.bf16.gmra.mxu0 %v5142_v8  ;;  %v5158_v11 = vor.u32 %v4366_v4, %v3879_v10 }
 0x1e5   : > { %v3271_v36 = vpack.c.bf16 %v1743_v17, %v1405_v7  ;;  %1446 = vmatmul.bf16.gmra.mxu1 %v5144_v22  ;;  %v5156_v17 = vor.u32 %v4367_v2, %v3877_v63 }
 0x1e6   : > { %1615 = vmatmul.bf16.gmra.mxu2 %v5142_v8  ;;  %5749 = vst [vmem:[#allocation23_spill] sm:$0xff] %v5158_v11 }
 0x1e7   : > { %3463 = vst [vmem:[%s4913_s20 + $0x318] sm:$0xff] %v3271_v36  ;;  %1784 = vmatmul.bf16.gmra.mxu3 %v5144_v22 }
 0x1e8   : > { %5748 = vst [vmem:[#allocation22_spill] sm:$0xff] %v5156_v17 }
 0x1e9   : > { %v1576_v18 = vpop.f32.mrf.mxu2  ;;  %v1240_v23 = vpop.f32.mrf.mxu0 }
 0x1ea   : > { %v1745_v41 = vpop.f32.mrf.mxu3  ;;  %v1409_v38 = vpop.f32.mrf.mxu1 }
 0x1eb   : > { %v1746_v34 = vadd.f32 %v1745_v41, %v1576_v18  ;;  %v1410_v13 = vadd.f32 %v1409_v38, %v1240_v23  ;;  %v3935_v18 = vld [vmem:[#allocation5 + $0x20] sm:$0xf0]  ;;  %v4427_v23 = vld [vmem:[#allocation5 + $0x18c] sm:$0xf] }
 0x1ed   : > { %v3274_v45 = vpack.c.bf16 %v1746_v34, %v1408_v29  ;;  %v4379_v29 = vld [vmem:[#allocation5 + $0xc] sm:$0xf] }
 0x1ee   : > { %v3938_v41 = vor.u32 %v4379_v29, %v3935_v18  ;;  %v3933_v29 = vld [vmem:[#allocation5 + $0x8] sm:$0xf]  ;;  %v4382_v18 = vld [vmem:[#allocation5 + $0x1c] sm:$0xf0] }
 0x1ef   : > { %3466 = vst [vmem:[%s4913_s20 + $0x330] sm:$0xff] %v3274_v45 }
 0x1f0   : > { %2165 = vmatpush.bf16.msrb.mxu2 %v3938_v41 }
 0x1f1   : > { %v1578_v7 = vpop.f32.mrf.mxu2  ;;  %v1243_v36 = vpop.f32.mrf.mxu0 }
 0x1f2   : > { %v1747_v8 = vpop.f32.mrf.mxu3  ;;  %v1412_v22 = vpop.f32.mrf.mxu1 }
 0x1f3   : > { %v1748_v39 = vadd.f32 %v1747_v8, %v1578_v7  ;;  %v4127_v8 = vld [vmem:[#allocation5 + $0x1a0] sm:$0xf0]  ;;  %v1413_v34 = vadd.f32 %v1412_v22, %v1243_v36  ;;  %v3885_v7 = vld [vmem:[%s4792_s14 + $0x1b0] sm:$0xf] }
 0x1f4   : > { %1282 = vmatmul.bf16.gmra.mxu0 %v5156_v17  ;;  %v4130_v45 = vor.u32 %v4427_v23, %v4127_v8  ;;  %v4126_v23 = vor.u32 %v4430_v48, %v4125_v12 }
 0x1f5   : > { %v3277_v37 = vpack.c.bf16 %v1748_v39, %v1410_v13  ;;  %1451 = vmatmul.bf16.gmra.mxu1 %v5158_v11  ;;  %v4369_v13 = vld [vmem:[%s4792_s14 + $0x1b4] sm:$0xf0]  ;;  %v4368_v39 = vld [vmem:[%s4792_s14 + $0x1b4] sm:$0xf] }
 0x1f6   : > { %1620 = vmatmul.bf16.gmra.mxu2 %v5156_v17  ;;  %2334 = vmatpush.bf16.msrb.mxu3 %v4130_v45  ;;  %v3934_v17 = vor.u32 %v4382_v18, %v3933_v29  ;;  %v5170_v36 = vor.u32 %v4369_v13, %v3885_v7  ;;  %v3893_v7 = vld [vmem:[%s4792_s14 + $0x1c0] sm:$0xf]  ;;  %v4371_v13 = vld [vmem:[%s4792_s14 + $0x1c4] sm:$0xf0]  ;;  %v3895_v29 = vld [vmem:[%s4792_s14 + $0x1c8] sm:$0xf0] }
 0x1f7   : > { %3469 = vst [vmem:[%s4913_s20 + $0x348] sm:$0xff] %v3277_v37  ;;  %1789 = vmatmul.bf16.gmra.mxu3 %v5158_v11  ;;  %v3887_v11 = vld [vmem:[%s4792_s14 + $0x1b8] sm:$0xf0]  ;;  %1996 = vmatpush.bf16.msrb.mxu1 %v4126_v23 }
 0x1f8   : > { %5750 = vst [vmem:[#allocation24_spill] sm:$0xff] %v5170_v36  ;;  %1827 = vmatpush.bf16.msrb.mxu0 %v3934_v17 }
 0x1f9   : > { %v1581_v38 = vpop.f32.mrf.mxu2  ;;  %v1245_v2 = vpop.f32.mrf.mxu0 }
 0x1fa   : > { %v1750_v63 = vpop.f32.mrf.mxu3  ;;  %v1414_v37 = vpop.f32.mrf.mxu1 }
 0x1fb   : > { %v1751_v4 = vadd.f32 %v1750_v63, %v1581_v38  ;;  %v5172_v38 = vor.u32 %v4368_v39, %v3887_v11  ;;  %v4370_v39 = vld [vmem:[%s4792_s14 + $0x1c4] sm:$0xf] }
 0x1fd   : > { %v3280_v10 = vpack.c.bf16 %v1751_v4, %v1413_v34  ;;  %5751 = vst [vmem:[#allocation25_spill] sm:$0xff] %v5172_v38  ;;  %v1415_v34 = vadd.f32 %v1414_v37, %v1245_v2 }
 0x1ff   : > { %3472 = vst [vmem:[%s4913_s20 + $0x360] sm:$0xff] %v3280_v10 }
 0x201   : > { %v1583_v22 = vpop.f32.mrf.mxu2  ;;  %v1248_v8 = vpop.f32.mrf.mxu0 }
 0x202   : > { %v1752_v41 = vpop.f32.mrf.mxu3  ;;  %v1417_v63 = vpop.f32.mrf.mxu1 }
 0x203   : > { %v1753_v45 = vadd.f32 %v1752_v41, %v1583_v22  ;;  %v1418_v48 = vadd.f32 %v1417_v63, %v1248_v8  ;;  %v5184_v22 = vor.u32 %v4371_v13, %v3893_v7  ;;  %v3901_v7 = vld [vmem:[%s4792_s14 + $0x1d0] sm:$0xf]  ;;  %v4373_v13 = vld [vmem:[%s4792_s14 + $0x1d4] sm:$0xf0] }
 0x204   : > { %1287 = vmatmul.bf16.gmra.mxu0 %v5170_v36 }
 0x205   : > { %v3283_v4 = vpack.c.bf16 %v1753_v45, %v1415_v34  ;;  %1456 = vmatmul.bf16.gmra.mxu1 %v5172_v38  ;;  %5752 = vst [vmem:[#allocation26_spill] sm:$0xff] %v5184_v22  ;;  %v5186_v34 = vor.u32 %v4370_v39, %v3895_v29  ;;  %v4372_v39 = vld [vmem:[%s4792_s14 + $0x1d4] sm:$0xf]  ;;  %v3903_v29 = vld [vmem:[%s4792_s14 + $0x1d8] sm:$0xf0] }
 0x206   : > { %1625 = vmatmul.bf16.gmra.mxu2 %v5170_v36  ;;  %v4473_v36 = vld [vmem:[#allocation5 + $0x2f4] sm:$0xf0] }
 0x207   : > { %3475 = vst [vmem:[%s4913_s20 + $0x378] sm:$0xff] %v3283_v4  ;;  %1794 = vmatmul.bf16.gmra.mxu3 %v5172_v38  ;;  %v4301_v38 = vld [vmem:[#allocation5 + $0x2e0] sm:$0xf] }
 0x208   : > { %5753 = vst [vmem:[#allocation27_spill] sm:$0xff] %v5186_v34 }
 0x209   : > { %v1586_v12 = vpop.f32.mrf.mxu2  ;;  %v1250_v17 = vpop.f32.mrf.mxu0 }
 0x20a   : > { %v1755_v11 = vpop.f32.mrf.mxu3  ;;  %v1419_v37 = vpop.f32.mrf.mxu1 }
 0x20b   : > { %v1756_v2 = vadd.f32 %v1755_v11, %v1586_v12  ;;  %v1420_v8 = vadd.f32 %v1419_v37, %v1250_v17 }
 0x20d   : > { %v3286_v10 = vpack.c.bf16 %v1756_v2, %v1418_v48 }
 0x20f   : > { %3478 = vst [vmem:[%s4913_s20 + $0x390] sm:$0xff] %v3286_v10 }
 0x211   : > { %v1588_v18 = vpop.f32.mrf.mxu2  ;;  %v1253_v41 = vpop.f32.mrf.mxu0 }
 0x212   : > { %v1757_v23 = vpop.f32.mrf.mxu3  ;;  %v1422_v63 = vpop.f32.mrf.mxu1 }
 0x213   : > { %v1758_v45 = vadd.f32 %v1757_v23, %v1588_v18  ;;  %v1423_v48 = vadd.f32 %v1422_v63, %v1253_v41  ;;  %v5198_v23 = vor.u32 %v4373_v13, %v3901_v7 }
 0x214   : > { %1292 = vmatmul.bf16.gmra.mxu0 %v5184_v22 }
 0x215   : > { %v3289_v4 = vpack.c.bf16 %v1758_v45, %v1420_v8  ;;  %1461 = vmatmul.bf16.gmra.mxu1 %v5186_v34  ;;  %5754 = vst [vmem:[#allocation28_spill] sm:$0xff] %v5198_v23 }
 0x216   : > { %1630 = vmatmul.bf16.gmra.mxu2 %v5184_v22 }
 0x217   : > { %3481 = vst [vmem:[%s4913_s20 + $0x3a8] sm:$0xff] %v3289_v4  ;;  %1799 = vmatmul.bf16.gmra.mxu3 %v5186_v34  ;;  %v5200_v4 = vor.u32 %v4372_v39, %v3903_v29  ;;  %v3909_v39 = vld [vmem:[%s4792_s14 + $0x1e0] sm:$0xf]  ;;  %v4375_v29 = vld [vmem:[%s4792_s14 + $0x1e4] sm:$0xf0] }
 0x219   : > { %v1591_v12 = vpop.f32.mrf.mxu2  ;;  %v1255_v17 = vpop.f32.mrf.mxu0  ;;  %5755 = vst [vmem:[#allocation29_spill] sm:$0xff] %v5200_v4 }
 0x21a   : > { %v1760_v11 = vpop.f32.mrf.mxu3  ;;  %v1424_v37 = vpop.f32.mrf.mxu1 }
 0x21b   : > { %v1761_v2 = vadd.f32 %v1760_v11, %v1591_v12  ;;  %v1425_v41 = vadd.f32 %v1424_v37, %v1255_v17 }
 0x21d   : > { %v3292_v10 = vpack.c.bf16 %v1761_v2, %v1423_v48 }
 0x21f   : > { %3484 = vst [vmem:[%s4913_s20 + $0x3c0] sm:$0xff] %v3292_v10 }
 0x221   : > { %v1593_v18 = vpop.f32.mrf.mxu2  ;;  %v1258_v45 = vpop.f32.mrf.mxu0 }
 0x222   : > { %v1762_v8 = vpop.f32.mrf.mxu3  ;;  %v1427_v12 = vpop.f32.mrf.mxu1 }
 0x223   : > { %v1763_v63 = vadd.f32 %v1762_v8, %v1593_v18  ;;  %v1428_v11 = vadd.f32 %v1427_v12, %v1258_v45  ;;  %v4374_v18 = vld [vmem:[%s4792_s14 + $0x1e4] sm:$0xf]  ;;  %v3911_v8 = vld [vmem:[%s4792_s14 + $0x1e8] sm:$0xf0] }
 0x224   : > { %1297 = vmatmul.bf16.gmra.mxu0 %v5198_v23  ;;  %v5214_v34 = vor.u32 %v4374_v18, %v3911_v8 }
 0x225   : > { %v3295_v48 = vpack.c.bf16 %v1763_v63, %v1425_v41  ;;  %1466 = vmatmul.bf16.gmra.mxu1 %v5200_v4  ;;  %v5212_v63 = vor.u32 %v4375_v29, %v3909_v39 }
 0x226   : > { %1635 = vmatmul.bf16.gmra.mxu2 %v5198_v23  ;;  %5757 = vst [vmem:[#allocation31_spill] sm:$0xff] %v5214_v34 }
 0x227   : > { %3487 = vst [vmem:[%s4913_s20 + $0x3d8] sm:$0xff] %v3295_v48  ;;  %1804 = vmatmul.bf16.gmra.mxu3 %v5200_v4 }
 0x228   : > { %5756 = vst [vmem:[#allocation30_spill] sm:$0xff] %v5212_v63 }
 0x229   : > { %v1596_v2 = vpop.f32.mrf.mxu2  ;;  %v1260_v37 = vpop.f32.mrf.mxu0 }
 0x22a   : > { %v1765_v17 = vpop.f32.mrf.mxu3  ;;  %v1429_v7 = vpop.f32.mrf.mxu1 }
 0x22b   : > { %v1766_v10 = vadd.f32 %v1765_v17, %v1596_v2  ;;  %v1430_v45 = vadd.f32 %v1429_v7, %v1260_v37  ;;  %v4111_v2 = vld [vmem:[#allocation5 + $0x178] sm:$0xf0]  ;;  %v4470_v37 = vld [vmem:[#allocation5 + $0x2e4] sm:$0xf] }
 0x22d   : > { %v3298_v13 = vpack.c.bf16 %v1766_v10, %v1428_v11  ;;  %v4422_v11 = vld [vmem:[#allocation5 + $0x164] sm:$0xf] }
 0x22e   : > { %v4114_v17 = vor.u32 %v4422_v11, %v4111_v2  ;;  %v4109_v11 = vld [vmem:[#allocation5 + $0x160] sm:$0xf]  ;;  %v4425_v2 = vld [vmem:[#allocation5 + $0x174] sm:$0xf0] }
 0x22f   : > { %3490 = vst [vmem:[%s4913_s20 + $0x3f0] sm:$0xff] %v3298_v13 }
 0x230   : > { %2834 = vmatpush.bf16.msra.mxu2 %v4114_v17 }
 0x231   : > { %v1598_v41 = vpop.f32.mrf.mxu2  ;;  %v1263_v48 = vpop.f32.mrf.mxu0 }
 0x232   : > { %v1767_v23 = vpop.f32.mrf.mxu3  ;;  %v1432_v4 = vpop.f32.mrf.mxu1 }
 0x233   : > { %v1768_v12 = vadd.f32 %v1767_v23, %v1598_v41  ;;  %v4303_v23 = vld [vmem:[#allocation5 + $0x2f8] sm:$0xf0]  ;;  %v1433_v10 = vadd.f32 %v1432_v4, %v1263_v48  ;;  %v3917_v41 = vld [vmem:[%s4792_s14 + $0x1f0] sm:$0xf] }
 0x234   : > { %1302 = vmatmul.bf16.gmra.mxu0 %v5212_v63  ;;  %v4306_v13 = vor.u32 %v4470_v37, %v4303_v23  ;;  %v4302_v37 = vor.u32 %v4473_v36, %v4301_v38 }
 0x235   : > { %v3301_v22 = vpack.c.bf16 %v1768_v12, %v1430_v45  ;;  %1471 = vmatmul.bf16.gmra.mxu1 %v5214_v34  ;;  %v4377_v45 = vld [vmem:[%s4792_s14 + $0x1f4] sm:$0xf0]  ;;  %v4376_v12 = vld [vmem:[%s4792_s14 + $0x1f4] sm:$0xf] }
 0x236   : > { %1640 = vmatmul.bf16.gmra.mxu2 %v5212_v63  ;;  %3003 = vmatpush.bf16.msra.mxu3 %v4306_v13  ;;  %v4110_v63 = vor.u32 %v4425_v2, %v4109_v11  ;;  %v5226_v48 = vor.u32 %v4377_v45, %v3917_v41 }
 0x237   : > { %3493 = vst [vmem:[%s4913_s20 + $0x408] sm:$0xff] %v3301_v22  ;;  %1809 = vmatmul.bf16.gmra.mxu3 %v5214_v34  ;;  %v3919_v34 = vld [vmem:[%s4792_s14 + $0x1f8] sm:$0xf0]  ;;  %2665 = vmatpush.bf16.msra.mxu1 %v4302_v37 }
 0x238   : > { %2496 = vmatpush.bf16.msra.mxu0 %v4110_v63 }
 0x239   : > { %v1601_v7 = vpop.f32.mrf.mxu2  ;;  %v1265_v29 = vpop.f32.mrf.mxu0 }
 0x23a   : > { %v1770_v39 = vpop.f32.mrf.mxu3  ;;  %v1434_v22 = vpop.f32.mrf.mxu1 }
 0x23b   : > { %v1771_v18 = vadd.f32 %v1770_v39, %v1601_v7  ;;  %v5228_v7 = vor.u32 %v4376_v12, %v3919_v34 }
 0x23d   : > { %v3304_v8 = vpack.c.bf16 %v1771_v18, %v1433_v10  ;;  %v1435_v10 = vadd.f32 %v1434_v22, %v1265_v29 }
 0x23f   : > { %3496 = vst [vmem:[%s4913_s20 + $0x420] sm:$0xff] %v3304_v8 }
 0x241   : > { %v1603_v4 = vpop.f32.mrf.mxu2  ;;  %v1268_v23 = vpop.f32.mrf.mxu0 }
 0x242   : > { %v1772_v17 = vpop.f32.mrf.mxu3  ;;  %v1437_v39 = vpop.f32.mrf.mxu1 }
 0x243   : > { %v1773_v13 = vadd.f32 %v1772_v17, %v1603_v4  ;;  %v1438_v36 = vadd.f32 %v1437_v39, %v1268_v23 }
 0x244   : > { %1307 = vmatmul.bf16.gmra.mxu0 %v5226_v48 }
 0x245   : > { %v3307_v18 = vpack.c.bf16 %v1773_v13, %v1435_v10  ;;  %1476 = vmatmul.bf16.gmra.mxu1 %v5228_v7 }
 0x246   : > { %1645 = vmatmul.bf16.gmra.mxu2 %v5226_v48 }
 0x247   : > { %3499 = vst [vmem:[%s4913_s20 + $0x438] sm:$0xff] %v3307_v18  ;;  %1814 = vmatmul.bf16.gmra.mxu3 %v5228_v7 }
 0x249   : > { %v1606_v38 = vpop.f32.mrf.mxu2  ;;  %v1270_v63 = vpop.f32.mrf.mxu0 }
 0x24a   : > { %v1775_v34 = vpop.f32.mrf.mxu3  ;;  %v1439_v22 = vpop.f32.mrf.mxu1 }
 0x24b   : > { %v1776_v29 = vadd.f32 %v1775_v34, %v1606_v38  ;;  %v1440_v11 = vadd.f32 %v1439_v22, %v1270_v63 }
 0x24d   : > { %v3310_v8 = vpack.c.bf16 %v1776_v29, %v1438_v36 }
 0x24f   : > { %3502 = vst [vmem:[%s4913_s20 + $0x450] sm:$0xff] %v3310_v8 }
 0x251   : > { %v1608_v41 = vpop.f32.mrf.mxu2  ;;  %v1273_v12 = vpop.f32.mrf.mxu0 }
 0x252   : > { %v1777_v45 = vpop.f32.mrf.mxu3  ;;  %v1442_v4 = vpop.f32.mrf.mxu1 }
 0x253   : > { %v1778_v2 = vadd.f32 %v1777_v45, %v1608_v41  ;;  %v1443_v17 = vadd.f32 %v1442_v4, %v1273_v12 }
 0x254   : > { %1828 = vmatmul.bf16.vlgmr.msrb.gmra.mxu0 %v4806_v43 }
 0x255   : > { %v3313_v37 = vpack.c.bf16 %v1778_v2, %v1440_v11  ;;  %1997 = vmatmul.bf16.vlgmr.msrb.gmra.mxu1 %v4808_v47 }
 0x256   : > { %2166 = vmatmul.bf16.vlgmr.msrb.gmra.mxu2 %v4806_v43 }
 0x257   : > { %3505 = vst [vmem:[%s4913_s20 + $0x468] sm:$0xff] %v3313_v37  ;;  %2335 = vmatmul.bf16.vlgmr.msrb.gmra.mxu3 %v4808_v47 }
 0x259   : > { %v1611_v23 = vpop.f32.mrf.mxu2  ;;  %v1275_v13 = vpop.f32.mrf.mxu0 }
 0x25a   : > { %v1780_v10 = vpop.f32.mrf.mxu3  ;;  %v1444_v18 = vpop.f32.mrf.mxu1 }
 0x25b   : > { %v1781_v39 = vadd.f32 %v1780_v10, %v1611_v23  ;;  %v1445_v29 = vadd.f32 %v1444_v18, %v1275_v13 }
 0x25d   : > { %v3316_v36 = vpack.c.bf16 %v1781_v39, %v1443_v17 }
 0x25f   : > { %3508 = vst [vmem:[%s4913_s20 + $0x480] sm:$0xff] %v3316_v36 }
 0x261   : > { %v1613_v38 = vpop.f32.mrf.mxu2  ;;  %v1278_v63 = vpop.f32.mrf.mxu0 }
 0x262   : > { %v1782_v34 = vpop.f32.mrf.mxu3  ;;  %v1447_v8 = vpop.f32.mrf.mxu1 }
 0x263   : > { %v1783_v22 = vadd.f32 %v1782_v34, %v1613_v38  ;;  %v1448_v45 = vadd.f32 %v1447_v8, %v1278_v63  ;;  %v4416_v34 = vld [vmem:[#allocation5 + $0x134] sm:$0xf]  ;;  %v4087_v63 = vld [vmem:[#allocation5 + $0x148] sm:$0xf0] }
 0x264   : > { %1833 = vmatmul.bf16.gmra.mxu0 %v4818_v54  ;;  %v4279_v8 = vld [vmem:[#allocation5 + $0x2c8] sm:$0xf0] }
 0x265   : > { %v3319_v41 = vpack.c.bf16 %v1783_v22, %v1445_v29  ;;  %2002 = vmatmul.bf16.gmra.mxu1 %v4820_v55  ;;  %v4090_v29 = vor.u32 %v4416_v34, %v4087_v63  ;;  %v4464_v22 = vld [vmem:[#allocation5 + $0x2b4] sm:$0xf] }
 0x266   : > { %2171 = vmatmul.bf16.gmra.mxu2 %v4818_v54 }
 0x267   : > { %3511 = vst [vmem:[%s4913_s20 + $0x498] sm:$0xff] %v3319_v41  ;;  %2340 = vmatmul.bf16.gmra.mxu3 %v4820_v55  ;;  %2835 = vmatpush.bf16.msra.mxu2 %v4090_v29 }
 0x269   : > { %v1616_v12 = vpop.f32.mrf.mxu2  ;;  %v1280_v2 = vpop.f32.mrf.mxu0 }
 0x26a   : > { %v1785_v11 = vpop.f32.mrf.mxu3  ;;  %v1449_v37 = vpop.f32.mrf.mxu1 }
 0x26b   : > { %v1786_v4 = vadd.f32 %v1785_v11, %v1616_v12  ;;  %v1450_v39 = vadd.f32 %v1449_v37, %v1280_v2  ;;  %v4282_v12 = vor.u32 %v4464_v22, %v4279_v8 }
 0x26d   : > { %v3322_v17 = vpack.c.bf16 %v1786_v4, %v1448_v45  ;;  %3004 = vmatpush.bf16.msra.mxu3 %v4282_v12 }
 0x26f   : > { %3514 = vst [vmem:[%s4913_s20 + $0x4b0] sm:$0xff] %v3322_v17 }
 0x271   : > { %v1618_v23 = vpop.f32.mrf.mxu2  ;;  %v1283_v13 = vpop.f32.mrf.mxu0 }
 0x272   : > { %v1787_v10 = vpop.f32.mrf.mxu3  ;;  %v1452_v36 = vpop.f32.mrf.mxu1 }
 0x273   : > { %v1788_v18 = vadd.f32 %v1787_v10, %v1618_v23  ;;  %v1453_v41 = vadd.f32 %v1452_v36, %v1283_v13  ;;  %v4085_v23 = vld [vmem:[#allocation5 + $0x130] sm:$0xf]  ;;  %v4419_v10 = vld [vmem:[#allocation5 + $0x144] sm:$0xf0] }
 0x274   : > { %1838 = vmatmul.bf16.gmra.mxu0 %v4830_v60 }
 0x275   : > { %v3325_v38 = vpack.c.bf16 %v1788_v18, %v1450_v39  ;;  %2007 = vmatmul.bf16.gmra.mxu1 %v4832_v61  ;;  %v4086_v39 = vor.u32 %v4419_v10, %v4085_v23  ;;  %v4277_v18 = vld [vmem:[#allocation5 + $0x2b0] sm:$0xf] }
 0x276   : > { %2176 = vmatmul.bf16.gmra.mxu2 %v4830_v60 }
 0x277   : > { %3517 = vst [vmem:[%s4913_s20 + $0x4c8] sm:$0xff] %v3325_v38  ;;  %2345 = vmatmul.bf16.gmra.mxu3 %v4832_v61  ;;  %v4467_v38 = vld [vmem:[#allocation5 + $0x2c4] sm:$0xf0]  ;;  %2497 = vmatpush.bf16.msra.mxu0 %v4086_v39 }
 0x278   : > { %v4278_v63 = vor.u32 %v4467_v38, %v4277_v18 }
 0x279   : > { %v1621_v45 = vpop.f32.mrf.mxu2  ;;  %v1285_v2 = vpop.f32.mrf.mxu0 }
 0x27a   : > { %v1790_v11 = vpop.f32.mrf.mxu3  ;;  %v1454_v37 = vpop.f32.mrf.mxu1  ;;  %2666 = vmatpush.bf16.msra.mxu1 %v4278_v63 }
 0x27b   : > { %v1791_v4 = vadd.f32 %v1790_v11, %v1621_v45  ;;  %v1455_v36 = vadd.f32 %v1454_v37, %v1285_v2 }
 0x27d   : > { %v3328_v17 = vpack.c.bf16 %v1791_v4, %v1453_v41 }
 0x27f   : > { %3520 = vst [vmem:[%s4913_s20 + $0x4e0] sm:$0xff] %v3328_v17 }
 0x281   : > { %v1623_v34 = vpop.f32.mrf.mxu2  ;;  %v1288_v13 = vpop.f32.mrf.mxu0 }
 0x282   : > { %v1792_v61 = vpop.f32.mrf.mxu3  ;;  %v1457_v29 = vpop.f32.mrf.mxu1 }
 0x283   : > { %v1793_v22 = vadd.f32 %v1792_v61, %v1623_v34  ;;  %v1458_v41 = vadd.f32 %v1457_v29, %v1288_v13 }
 0x284   : > { %1843 = vmatmul.bf16.gmra.mxu0 %v4842_v14 }
 0x285   : > { %v3331_v8 = vpack.c.bf16 %v1793_v22, %v1455_v36  ;;  %2012 = vmatmul.bf16.gmra.mxu1 %v4844_v15 }
 0x286   : > { %2181 = vmatmul.bf16.gmra.mxu2 %v4842_v14 }
 0x287   : > { %3523 = vst [vmem:[%s4913_s20 + $0x4f8] sm:$0xff] %v3331_v8  ;;  %2350 = vmatmul.bf16.gmra.mxu3 %v4844_v15 }
 0x289   : > { %v1626_v45 = vpop.f32.mrf.mxu2  ;;  %v1290_v11 = vpop.f32.mrf.mxu0 }
 0x28a   : > { %v1795_v12 = vpop.f32.mrf.mxu3  ;;  %v1459_v61 = vpop.f32.mrf.mxu1 }
 0x28b   : > { %v1796_v2 = vadd.f32 %v1795_v12, %v1626_v45  ;;  %v1460_v10 = vadd.f32 %v1459_v61, %v1290_v11 }
 0x28d   : > { %v3334_v4 = vpack.c.bf16 %v1796_v2, %v1458_v41 }
 0x28f   : > { %3526 = vst [vmem:[%s4913_s20 + $0x510] sm:$0xff] %v3334_v4 }
 0x291   : > { %v1628_v37 = vpop.f32.mrf.mxu2  ;;  %v1293_v23 = vpop.f32.mrf.mxu0 }
 0x292   : > { %v1797_v17 = vpop.f32.mrf.mxu3  ;;  %v1462_v18 = vpop.f32.mrf.mxu1 }
 0x293   : > { %v1798_v39 = vadd.f32 %v1797_v17, %v1628_v37  ;;  %v1463_v34 = vadd.f32 %v1462_v18, %v1293_v23 }
 0x294   : > { %1848 = vmatmul.bf16.gmra.mxu0 %v4854_v20 }
 0x295   : > { %v3337_v38 = vpack.c.bf16 %v1798_v39, %v1460_v10  ;;  %2017 = vmatmul.bf16.gmra.mxu1 %v4856_v21 }
 0x296   : > { %2186 = vmatmul.bf16.gmra.mxu2 %v4854_v20 }
 0x297   : > { %3529 = vst [vmem:[%s4913_s20 + $0x528] sm:$0xff] %v3337_v38  ;;  %2355 = vmatmul.bf16.gmra.mxu3 %v4856_v21 }
 0x299   : > { %v1631_v63 = vpop.f32.mrf.mxu2  ;;  %v1295_v36 = vpop.f32.mrf.mxu0 }
 0x29a   : > { %v1800_v13 = vpop.f32.mrf.mxu3  ;;  %v1464_v29 = vpop.f32.mrf.mxu1 }
 0x29b   : > { %v1801_v22 = vadd.f32 %v1800_v13, %v1631_v63  ;;  %v1465_v11 = vadd.f32 %v1464_v29, %v1295_v36 }
 0x29d   : > { %v3340_v8 = vpack.c.bf16 %v1801_v22, %v1463_v34 }
 0x29f   : > { %3532 = vst [vmem:[%s4913_s20 + $0x540] sm:$0xff] %v3340_v8 }
 0x2a1   : > { %v1633_v41 = vpop.f32.mrf.mxu2  ;;  %v1298_v12 = vpop.f32.mrf.mxu0 }
 0x2a2   : > { %v1802_v45 = vpop.f32.mrf.mxu3  ;;  %v1467_v61 = vpop.f32.mrf.mxu1 }
 0x2a3   : > { %v1803_v2 = vadd.f32 %v1802_v45, %v1633_v41  ;;  %v1468_v37 = vadd.f32 %v1467_v61, %v1298_v12  ;;  %v4410_v41 = vld [vmem:[#allocation5 + $0x104] sm:$0xf]  ;;  %v4063_v45 = vld [vmem:[#allocation5 + $0x118] sm:$0xf0] }
 0x2a4   : > { %1853 = vmatmul.bf16.gmra.mxu0 %v4866_v26  ;;  %v4066_v12 = vor.u32 %v4410_v41, %v4063_v45 }
 0x2a5   : > { %v3343_v4 = vpack.c.bf16 %v1803_v2, %v1465_v11  ;;  %2022 = vmatmul.bf16.gmra.mxu1 %v4868_v27  ;;  %v4458_v11 = vld [vmem:[#allocation5 + $0x284] sm:$0xf]  ;;  %v4255_v2 = vld [vmem:[#allocation5 + $0x298] sm:$0xf0] }
 0x2a6   : > { %2191 = vmatmul.bf16.gmra.mxu2 %v4866_v26 }
 0x2a7   : > { %3535 = vst [vmem:[%s4913_s20 + $0x558] sm:$0xff] %v3343_v4  ;;  %2360 = vmatmul.bf16.gmra.mxu3 %v4868_v27  ;;  %2836 = vmatpush.bf16.msra.mxu2 %v4066_v12 }
 0x2a9   : > { %v1636_v17 = vpop.f32.mrf.mxu2  ;;  %v1300_v10 = vpop.f32.mrf.mxu0 }
 0x2aa   : > { %v1805_v23 = vpop.f32.mrf.mxu3  ;;  %v1469_v18 = vpop.f32.mrf.mxu1 }
 0x2ab   : > { %v1806_v39 = vadd.f32 %v1805_v23, %v1636_v17  ;;  %v1470_v36 = vadd.f32 %v1469_v18, %v1300_v10 }
 0x2ad   : > { %v3346_v38 = vpack.c.bf16 %v1806_v39, %v1468_v37  ;;  %v4258_v37 = vor.u32 %v4458_v11, %v4255_v2 }
 0x2af   : > { %3538 = vst [vmem:[%s4913_s20 + $0x570] sm:$0xff] %v3346_v38  ;;  %3005 = vmatpush.bf16.msra.mxu3 %v4258_v37  ;;  %v4061_v38 = vld [vmem:[#allocation5 + $0x100] sm:$0xf] }
 0x2b1   : > { %v1638_v34 = vpop.f32.mrf.mxu2  ;;  %v1303_v13 = vpop.f32.mrf.mxu0 }
 0x2b2   : > { %v1807_v63 = vpop.f32.mrf.mxu3  ;;  %v1472_v29 = vpop.f32.mrf.mxu1 }
 0x2b3   : > { %v1808_v22 = vadd.f32 %v1807_v63, %v1638_v34  ;;  %v1473_v61 = vadd.f32 %v1472_v29, %v1303_v13  ;;  %v4413_v34 = vld [vmem:[#allocation5 + $0x114] sm:$0xf0] }
 0x2b4   : > { %1858 = vmatmul.bf16.gmra.mxu0 %v4878_v32  ;;  %v4062_v63 = vor.u32 %v4413_v34, %v4061_v38 }
 0x2b5   : > { %v3349_v8 = vpack.c.bf16 %v1808_v22, %v1470_v36  ;;  %2027 = vmatmul.bf16.gmra.mxu1 %v4880_v33  ;;  %v4253_v36 = vld [vmem:[#allocation5 + $0x280] sm:$0xf]  ;;  %v4461_v22 = vld [vmem:[#allocation5 + $0x294] sm:$0xf0] }
 0x2b6   : > { %2196 = vmatmul.bf16.gmra.mxu2 %v4878_v32  ;;  %v4254_v41 = vor.u32 %v4461_v22, %v4253_v36  ;;  %2498 = vmatpush.bf16.msra.mxu0 %v4062_v63 }
 0x2b7   : > { %3541 = vst [vmem:[%s4913_s20 + $0x588] sm:$0xff] %v3349_v8  ;;  %2365 = vmatmul.bf16.gmra.mxu3 %v4880_v33 }
 0x2b8   : > { %2667 = vmatpush.bf16.msra.mxu1 %v4254_v41 }
 0x2b9   : > { %v1641_v4 = vpop.f32.mrf.mxu2  ;;  %v1305_v23 = vpop.f32.mrf.mxu0 }
 0x2ba   : > { %v1810_v17 = vpop.f32.mrf.mxu3  ;;  %v1474_v39 = vpop.f32.mrf.mxu1 }
 0x2bb   : > { %v1811_v10 = vadd.f32 %v1810_v17, %v1641_v4  ;;  %v1475_v29 = vadd.f32 %v1474_v39, %v1305_v23 }
 0x2bd   : > { %v3352_v18 = vpack.c.bf16 %v1811_v10, %v1473_v61 }
 0x2bf   : > { %3544 = vst [vmem:[%s4913_s20 + $0x5a0] sm:$0xff] %v3352_v18 }
 0x2c1   : > { %v1643_v8 = vpop.f32.mrf.mxu2  ;;  %v1308_v13 = vpop.f32.mrf.mxu0 }
 0x2c2   : > { %v1812_v45 = vpop.f32.mrf.mxu3  ;;  %v1477_v12 = vpop.f32.mrf.mxu1 }
 0x2c3   : > { %v1813_v11 = vadd.f32 %v1812_v45, %v1643_v8  ;;  %v1478_v61 = vadd.f32 %v1477_v12, %v1308_v13 }
 0x2c4   : > { %1863 = vmatmul.bf16.gmra.mxu0 %v4890_v51 }
 0x2c5   : > { %v3355_v2 = vpack.c.bf16 %v1813_v11, %v1475_v29  ;;  %2032 = vmatmul.bf16.gmra.mxu1 %v4892_v53 }
 0x2c6   : > { %2201 = vmatmul.bf16.gmra.mxu2 %v4890_v51 }
 0x2c7   : > { %3547 = vst [vmem:[%s4913_s20 + $0x5b8] sm:$0xff] %v3355_v2  ;;  %2370 = vmatmul.bf16.gmra.mxu3 %v4892_v53 }
 0x2c9   : > { %v1646_v4 = vpop.f32.mrf.mxu2  ;;  %v1310_v17 = vpop.f32.mrf.mxu0 }
 0x2ca   : > { %v1815_v37 = vpop.f32.mrf.mxu3  ;;  %v1479_v10 = vpop.f32.mrf.mxu1 }
 0x2cb   : > { %v1816_v23 = vadd.f32 %v1815_v37, %v1646_v4  ;;  %v1480_v63 = vadd.f32 %v1479_v10, %v1310_v17 }
 0x2cd   : > { %v3358_v39 = vpack.c.bf16 %v1816_v23, %v1478_v61 }
 0x2cf   : > { %3550 = vst [vmem:[%s4913_s20 + $0x5d0] sm:$0xff] %v3358_v39 }
 0x2d1   : > { %v1648_v18 = vpop.f32.mrf.mxu2  ;;  %v1829_v34 = vpop.f32.mrf.mxu0 }
 0x2d2   : > { %v1817_v38 = vpop.f32.mrf.mxu3  ;;  %v1998_v22 = vpop.f32.mrf.mxu1 }
 0x2d3   : > { %v1818_v36 = vadd.f32 %v1817_v38, %v1648_v18  ;;  %v1999_v41 = vadd.f32 %v1998_v22, %v1829_v34 }
 0x2d4   : > { %1868 = vmatmul.bf16.gmra.mxu0 %v4902_v62 }
 0x2d5   : > { %v3361_v8 = vpack.c.bf16 %v1818_v36, %v1480_v63  ;;  %2037 = vmatmul.bf16.gmra.mxu1 %v4904_v0 }
 0x2d6   : > { %2206 = vmatmul.bf16.gmra.mxu2 %v4902_v62 }
 0x2d7   : > { %3553 = vst [vmem:[%s4913_s20 + $0x5e8] sm:$0xff] %v3361_v8  ;;  %2375 = vmatmul.bf16.gmra.mxu3 %v4904_v0 }
 0x2d9   : > { %v2167_v45 = vpop.f32.mrf.mxu2  ;;  %v1831_v29 = vpop.f32.mrf.mxu0 }
 0x2da   : > { %v2336_v13 = vpop.f32.mrf.mxu3  ;;  %v2000_v12 = vpop.f32.mrf.mxu1 }
 0x2db   : > { %v2337_v11 = vadd.f32 %v2336_v13, %v2167_v45  ;;  %v2001_v17 = vadd.f32 %v2000_v12, %v1831_v29 }
 0x2dd   : > { %v3173_v2 = vpack.c.bf16 %v2337_v11, %v1999_v41 }
 0x2df   : > { %3365 = vst [vmem:[%s4913_s20 + $0x8] sm:$0xff] %v3173_v2 }
 0x2e1   : > { %v2169_v61 = vpop.f32.mrf.mxu2  ;;  %v1834_v37 = vpop.f32.mrf.mxu0 }
 0x2e2   : > { %v2338_v4 = vpop.f32.mrf.mxu3  ;;  %v2003_v10 = vpop.f32.mrf.mxu1 }
 0x2e3   : > { %v2339_v23 = vadd.f32 %v2338_v4, %v2169_v61  ;;  %v2004_v18 = vadd.f32 %v2003_v10, %v1834_v37  ;;  %v4404_v61 = vld [vmem:[#allocation5 + $0xd4] sm:$0xf]  ;;  %v4039_v4 = vld [vmem:[#allocation5 + $0xe8] sm:$0xf0] }
 0x2e4   : > { %1873 = vmatmul.bf16.gmra.mxu0 %v4918_v16  ;;  %v4042_v37 = vor.u32 %v4404_v61, %v4039_v4 }
 0x2e5   : > { %v3176_v39 = vpack.c.bf16 %v2339_v23, %v2001_v17  ;;  %2042 = vmatmul.bf16.gmra.mxu1 %v4920_v19  ;;  %v4452_v17 = vld [vmem:[#allocation5 + $0x254] sm:$0xf]  ;;  %v4231_v23 = vld [vmem:[#allocation5 + $0x268] sm:$0xf0] }
 0x2e6   : > { %2211 = vmatmul.bf16.gmra.mxu2 %v4918_v16 }
 0x2e7   : > { %3368 = vst [vmem:[%s4913_s20 + $0x20] sm:$0xff] %v3176_v39  ;;  %2380 = vmatmul.bf16.gmra.mxu3 %v4920_v19  ;;  %2837 = vmatpush.bf16.msra.mxu2 %v4042_v37 }
 0x2e9   : > { %v2172_v38 = vpop.f32.mrf.mxu2  ;;  %v1836_v63 = vpop.f32.mrf.mxu0 }
 0x2ea   : > { %v2341_v34 = vpop.f32.mrf.mxu3  ;;  %v2005_v22 = vpop.f32.mrf.mxu1 }
 0x2eb   : > { %v2342_v36 = vadd.f32 %v2341_v34, %v2172_v38  ;;  %v2006_v29 = vadd.f32 %v2005_v22, %v1836_v63 }
 0x2ed   : > { %v3179_v8 = vpack.c.bf16 %v2342_v36, %v2004_v18  ;;  %v4234_v18 = vor.u32 %v4452_v17, %v4231_v23 }
 0x2ef   : > { %3371 = vst [vmem:[%s4913_s20 + $0x38] sm:$0xff] %v3179_v8  ;;  %3006 = vmatpush.bf16.msra.mxu3 %v4234_v18  ;;  %v4037_v8 = vld [vmem:[#allocation5 + $0xd0] sm:$0xf] }
 0x2f1   : > { %v2174_v41 = vpop.f32.mrf.mxu2  ;;  %v1839_v13 = vpop.f32.mrf.mxu0 }
 0x2f2   : > { %v2343_v45 = vpop.f32.mrf.mxu3  ;;  %v2008_v12 = vpop.f32.mrf.mxu1 }
 0x2f3   : > { %v2344_v11 = vadd.f32 %v2343_v45, %v2174_v41  ;;  %v2009_v10 = vadd.f32 %v2008_v12, %v1839_v13  ;;  %v4407_v41 = vld [vmem:[#allocation5 + $0xe4] sm:$0xf0] }
 0x2f4   : > { %1878 = vmatmul.bf16.gmra.mxu0 %v4932_v42  ;;  %v4038_v45 = vor.u32 %v4407_v41, %v4037_v8 }
 0x2f5   : > { %v3182_v2 = vpack.c.bf16 %v2344_v11, %v2006_v29  ;;  %2047 = vmatmul.bf16.gmra.mxu1 %v4934_v46  ;;  %v4229_v29 = vld [vmem:[#allocation5 + $0x250] sm:$0xf]  ;;  %v4455_v11 = vld [vmem:[#allocation5 + $0x264] sm:$0xf0] }
 0x2f6   : > { %2216 = vmatmul.bf16.gmra.mxu2 %v4932_v42  ;;  %v4230_v61 = vor.u32 %v4455_v11, %v4229_v29  ;;  %2499 = vmatpush.bf16.msra.mxu0 %v4038_v45 }
 0x2f7   : > { %3374 = vst [vmem:[%s4913_s20 + $0x50] sm:$0xff] %v3182_v2  ;;  %2385 = vmatmul.bf16.gmra.mxu3 %v4934_v46 }
 0x2f8   : > { %2668 = vmatpush.bf16.msra.mxu1 %v4230_v61 }
 0x2f9   : > { %v2177_v39 = vpop.f32.mrf.mxu2  ;;  %v1841_v34 = vpop.f32.mrf.mxu0 }
 0x2fa   : > { %v2346_v38 = vpop.f32.mrf.mxu3  ;;  %v2010_v36 = vpop.f32.mrf.mxu1 }
 0x2fb   : > { %v2347_v63 = vadd.f32 %v2346_v38, %v2177_v39  ;;  %v2011_v12 = vadd.f32 %v2010_v36, %v1841_v34 }
 0x2fd   : > { %v3185_v22 = vpack.c.bf16 %v2347_v63, %v2009_v10 }
 0x2ff   : > { %3377 = vst [vmem:[%s4913_s20 + $0x68] sm:$0xff] %v3185_v22 }
 0x301   : > { %v2179_v2 = vpop.f32.mrf.mxu2  ;;  %v1844_v13 = vpop.f32.mrf.mxu0 }
 0x302   : > { %v2348_v4 = vpop.f32.mrf.mxu3  ;;  %v2013_v37 = vpop.f32.mrf.mxu1 }
 0x303   : > { %v2349_v17 = vadd.f32 %v2348_v4, %v2179_v2  ;;  %v2014_v10 = vadd.f32 %v2013_v37, %v1844_v13 }
 0x304   : > { %1883 = vmatmul.bf16.gmra.mxu0 %v4946_v25 }
 0x305   : > { %v3188_v23 = vpack.c.bf16 %v2349_v17, %v2011_v12  ;;  %2052 = vmatmul.bf16.gmra.mxu1 %v4948_v31 }
 0x306   : > { %2221 = vmatmul.bf16.gmra.mxu2 %v4946_v25 }
 0x307   : > { %3380 = vst [vmem:[%s4913_s20 + $0x80] sm:$0xff] %v3188_v23  ;;  %2390 = vmatmul.bf16.gmra.mxu3 %v4948_v31 }
 0x309   : > { %v2182_v39 = vpop.f32.mrf.mxu2  ;;  %v1846_v38 = vpop.f32.mrf.mxu0 }
 0x30a   : > { %v2351_v18 = vpop.f32.mrf.mxu3  ;;  %v2015_v63 = vpop.f32.mrf.mxu1 }
 0x30b   : > { %v2352_v34 = vadd.f32 %v2351_v18, %v2182_v39  ;;  %v2016_v45 = vadd.f32 %v2015_v63, %v1846_v38 }
 0x30d   : > { %v3191_v36 = vpack.c.bf16 %v2352_v34, %v2014_v10 }
 0x30f   : > { %3383 = vst [vmem:[%s4913_s20 + $0x98] sm:$0xff] %v3191_v36 }
 0x311   : > { %v2184_v22 = vpop.f32.mrf.mxu2  ;;  %v1849_v41 = vpop.f32.mrf.mxu0 }
 0x312   : > { %v2353_v8 = vpop.f32.mrf.mxu3  ;;  %v2018_v11 = vpop.f32.mrf.mxu1 }
 0x313   : > { %v2354_v29 = vadd.f32 %v2353_v8, %v2184_v22  ;;  %v2019_v61 = vadd.f32 %v2018_v11, %v1849_v41 }
 0x314   : > { %1888 = vmatmul.bf16.gmra.mxu0 %v4960_v58 }
 0x315   : > { %v3194_v2 = vpack.c.bf16 %v2354_v29, %v2016_v45  ;;  %2057 = vmatmul.bf16.gmra.mxu1 %v4962_v1 }
 0x316   : > { %2226 = vmatmul.bf16.gmra.mxu2 %v4960_v58 }
 0x317   : > { %3386 = vst [vmem:[%s4913_s20 + $0xb0] sm:$0xff] %v3194_v2  ;;  %2395 = vmatmul.bf16.gmra.mxu3 %v4962_v1 }
 0x319   : > { %v2187_v4 = vpop.f32.mrf.mxu2  ;;  %v1851_v12 = vpop.f32.mrf.mxu0 }
 0x31a   : > { %v2356_v13 = vpop.f32.mrf.mxu3  ;;  %v2020_v37 = vpop.f32.mrf.mxu1 }
 0x31b   : > { %v2357_v17 = vadd.f32 %v2356_v13, %v2187_v4  ;;  %v2021_v38 = vadd.f32 %v2020_v37, %v1851_v12 }
 0x31d   : > { %v3197_v23 = vpack.c.bf16 %v2357_v17, %v2019_v61 }
 0x31f   : > { %3389 = vst [vmem:[%s4913_s20 + $0xc8] sm:$0xff] %v3197_v23 }
 0x321   : > { %v2189_v10 = vpop.f32.mrf.mxu2  ;;  %v1854_v18 = vpop.f32.mrf.mxu0 }
 0x322   : > { %v2358_v39 = vpop.f32.mrf.mxu3  ;;  %v2023_v63 = vpop.f32.mrf.mxu1 }
 0x323   : > { %v2359_v34 = vadd.f32 %v2358_v39, %v2189_v10  ;;  %v2024_v22 = vadd.f32 %v2023_v63, %v1854_v18  ;;  %v4398_v10 = vld [vmem:[#allocation5 + $0xa4] sm:$0xf]  ;;  %v4015_v39 = vld [vmem:[#allocation5 + $0xb8] sm:$0xf0] }
 0x324   : > { %1893 = vmatmul.bf16.gmra.mxu0 %v4974_v24  ;;  %v4018_v18 = vor.u32 %v4398_v10, %v4015_v39 }
 0x325   : > { %v3200_v36 = vpack.c.bf16 %v2359_v34, %v2021_v38  ;;  %2062 = vmatmul.bf16.gmra.mxu1 %v4976_v30  ;;  %v4446_v38 = vld [vmem:[#allocation5 + $0x224] sm:$0xf]  ;;  %v4207_v34 = vld [vmem:[#allocation5 + $0x238] sm:$0xf0] }
 0x326   : > { %2231 = vmatmul.bf16.gmra.mxu2 %v4974_v24 }
 0x327   : > { %3392 = vst [vmem:[%s4913_s20 + $0xe0] sm:$0xff] %v3200_v36  ;;  %2400 = vmatmul.bf16.gmra.mxu3 %v4976_v30  ;;  %2838 = vmatpush.bf16.msra.mxu2 %v4018_v18 }
 0x329   : > { %v2192_v8 = vpop.f32.mrf.mxu2  ;;  %v1856_v45 = vpop.f32.mrf.mxu0 }
 0x32a   : > { %v2361_v41 = vpop.f32.mrf.mxu3  ;;  %v2025_v11 = vpop.f32.mrf.mxu1 }
 0x32b   : > { %v2362_v29 = vadd.f32 %v2361_v41, %v2192_v8  ;;  %v2026_v12 = vadd.f32 %v2025_v11, %v1856_v45 }
 0x32d   : > { %v3203_v2 = vpack.c.bf16 %v2362_v29, %v2024_v22  ;;  %v4210_v22 = vor.u32 %v4446_v38, %v4207_v34 }
 0x32f   : > { %3395 = vst [vmem:[%s4913_s20 + $0xf8] sm:$0xff] %v3203_v2  ;;  %3007 = vmatpush.bf16.msra.mxu3 %v4210_v22  ;;  %v4013_v2 = vld [vmem:[#allocation5 + $0xa0] sm:$0xf] }
 0x331   : > { %v2194_v61 = vpop.f32.mrf.mxu2  ;;  %v1859_v13 = vpop.f32.mrf.mxu0 }
 0x332   : > { %v2363_v4 = vpop.f32.mrf.mxu3  ;;  %v2028_v37 = vpop.f32.mrf.mxu1 }
 0x333   : > { %v2364_v17 = vadd.f32 %v2363_v4, %v2194_v61  ;;  %v2029_v63 = vadd.f32 %v2028_v37, %v1859_v13  ;;  %v4401_v61 = vld [vmem:[#allocation5 + $0xb4] sm:$0xf0] }
 0x334   : > { %1898 = vmatmul.bf16.gmra.mxu0 %v4988_v59  ;;  %v4014_v4 = vor.u32 %v4401_v61, %v4013_v2 }
 0x335   : > { %v3206_v23 = vpack.c.bf16 %v2364_v17, %v2026_v12  ;;  %2067 = vmatmul.bf16.gmra.mxu1 %v4990_v3  ;;  %v4205_v12 = vld [vmem:[#allocation5 + $0x220] sm:$0xf]  ;;  %v4449_v17 = vld [vmem:[#allocation5 + $0x234] sm:$0xf0] }
 0x336   : > { %2236 = vmatmul.bf16.gmra.mxu2 %v4988_v59  ;;  %v4206_v10 = vor.u32 %v4449_v17, %v4205_v12  ;;  %2500 = vmatpush.bf16.msra.mxu0 %v4014_v4 }
 0x337   : > { %3398 = vst [vmem:[%s4913_s20 + $0x110] sm:$0xff] %v3206_v23  ;;  %2405 = vmatmul.bf16.gmra.mxu3 %v4990_v3 }
 0x338   : > { %2669 = vmatpush.bf16.msra.mxu1 %v4206_v10 }
 0x339   : > { %v2197_v36 = vpop.f32.mrf.mxu2  ;;  %v1861_v41 = vpop.f32.mrf.mxu0 }
 0x33a   : > { %v2366_v8 = vpop.f32.mrf.mxu3  ;;  %v2030_v29 = vpop.f32.mrf.mxu1 }
 0x33b   : > { %v2367_v45 = vadd.f32 %v2366_v8, %v2197_v36  ;;  %v2031_v37 = vadd.f32 %v2030_v29, %v1861_v41 }
 0x33d   : > { %v3209_v11 = vpack.c.bf16 %v2367_v45, %v2029_v63 }
 0x33f   : > { %3401 = vst [vmem:[%s4913_s20 + $0x128] sm:$0xff] %v3209_v11 }
 0x341   : > { %v2199_v23 = vpop.f32.mrf.mxu2  ;;  %v1864_v13 = vpop.f32.mrf.mxu0 }
 0x342   : > { %v2368_v39 = vpop.f32.mrf.mxu3  ;;  %v2033_v18 = vpop.f32.mrf.mxu1 }
 0x343   : > { %v2369_v38 = vadd.f32 %v2368_v39, %v2199_v23  ;;  %v2034_v63 = vadd.f32 %v2033_v18, %v1864_v13 }
 0x344   : > { %1903 = vmatmul.bf16.gmra.mxu0 %v5002_v49 }
 0x345   : > { %v3212_v34 = vpack.c.bf16 %v2369_v38, %v2031_v37  ;;  %2072 = vmatmul.bf16.gmra.mxu1 %v5004_v57 }
 0x346   : > { %2241 = vmatmul.bf16.gmra.mxu2 %v5002_v49 }
 0x347   : > { %3404 = vst [vmem:[%s4913_s20 + $0x140] sm:$0xff] %v3212_v34  ;;  %2410 = vmatmul.bf16.gmra.mxu3 %v5004_v57 }
 0x349   : > { %v2202_v36 = vpop.f32.mrf.mxu2  ;;  %v1866_v8 = vpop.f32.mrf.mxu0 }
 0x34a   : > { %v2371_v22 = vpop.f32.mrf.mxu3  ;;  %v2035_v45 = vpop.f32.mrf.mxu1 }
 0x34b   : > { %v2372_v41 = vadd.f32 %v2371_v22, %v2202_v36  ;;  %v2036_v4 = vadd.f32 %v2035_v45, %v1866_v8 }
 0x34d   : > { %v3215_v29 = vpack.c.bf16 %v2372_v41, %v2034_v63 }
 0x34f   : > { %3407 = vst [vmem:[%s4913_s20 + $0x158] sm:$0xff] %v3215_v29 }
 0x351   : > { %v2204_v11 = vpop.f32.mrf.mxu2  ;;  %v1869_v61 = vpop.f32.mrf.mxu0 }
 0x352   : > { %v2373_v2 = vpop.f32.mrf.mxu3  ;;  %v2038_v17 = vpop.f32.mrf.mxu1 }
 0x353   : > { %v2374_v12 = vadd.f32 %v2373_v2, %v2204_v11  ;;  %v2039_v10 = vadd.f32 %v2038_v17, %v1869_v61 }
 0x354   : > { %1908 = vmatmul.bf16.gmra.mxu0 %v5016_v28 }
 0x355   : > { %v3218_v23 = vpack.c.bf16 %v2374_v12, %v2036_v4  ;;  %2077 = vmatmul.bf16.gmra.mxu1 %v5018_v35 }
 0x356   : > { %2246 = vmatmul.bf16.gmra.mxu2 %v5016_v28 }
 0x357   : > { %3410 = vst [vmem:[%s4913_s20 + $0x170] sm:$0xff] %v3218_v23  ;;  %2415 = vmatmul.bf16.gmra.mxu3 %v5018_v35 }
 0x359   : > { %v2207_v39 = vpop.f32.mrf.mxu2  ;;  %v1871_v37 = vpop.f32.mrf.mxu0 }
 0x35a   : > { %v2376_v13 = vpop.f32.mrf.mxu3  ;;  %v2040_v18 = vpop.f32.mrf.mxu1 }
 0x35b   : > { %v2377_v38 = vadd.f32 %v2376_v13, %v2207_v39  ;;  %v2041_v8 = vadd.f32 %v2040_v18, %v1871_v37 }
 0x35d   : > { %v3221_v34 = vpack.c.bf16 %v2377_v38, %v2039_v10 }
 0x35f   : > { %3413 = vst [vmem:[%s4913_s20 + $0x188] sm:$0xff] %v3221_v34 }
 0x361   : > { %v2209_v63 = vpop.f32.mrf.mxu2  ;;  %v1874_v22 = vpop.f32.mrf.mxu0 }
 0x362   : > { %v2378_v36 = vpop.f32.mrf.mxu3  ;;  %v2043_v45 = vpop.f32.mrf.mxu1 }
 0x363   : > { %v2379_v41 = vadd.f32 %v2378_v36, %v2209_v63  ;;  %v2044_v11 = vadd.f32 %v2043_v45, %v1874_v22  ;;  %v4392_v63 = vld [vmem:[#allocation5 + $0x74] sm:$0xf]  ;;  %v3991_v36 = vld [vmem:[#allocation5 + $0x88] sm:$0xf0] }
 0x364   : > { %1913 = vmatmul.bf16.gmra.mxu0 %v5030_v6  ;;  %v3994_v22 = vor.u32 %v4392_v63, %v3991_v36 }
 0x365   : > { %v3224_v29 = vpack.c.bf16 %v2379_v41, %v2041_v8  ;;  %2082 = vmatmul.bf16.gmra.mxu1 %v5032_v9  ;;  %v4440_v8 = vld [vmem:[#allocation5 + $0x1f4] sm:$0xf]  ;;  %v4183_v41 = vld [vmem:[#allocation5 + $0x208] sm:$0xf0] }
 0x366   : > { %2251 = vmatmul.bf16.gmra.mxu2 %v5030_v6 }
 0x367   : > { %3416 = vst [vmem:[%s4913_s20 + $0x1a0] sm:$0xff] %v3224_v29  ;;  %2420 = vmatmul.bf16.gmra.mxu3 %v5032_v9  ;;  %2839 = vmatpush.bf16.msra.mxu2 %v3994_v22 }
 0x369   : > { %v2212_v2 = vpop.f32.mrf.mxu2  ;;  %v1876_v4 = vpop.f32.mrf.mxu0 }
 0x36a   : > { %v2381_v61 = vpop.f32.mrf.mxu3  ;;  %v2045_v17 = vpop.f32.mrf.mxu1 }
 0x36b   : > { %v2382_v12 = vadd.f32 %v2381_v61, %v2212_v2  ;;  %v2046_v37 = vadd.f32 %v2045_v17, %v1876_v4 }
 0x36d   : > { %v3227_v23 = vpack.c.bf16 %v2382_v12, %v2044_v11  ;;  %v4186_v11 = vor.u32 %v4440_v8, %v4183_v41 }
 0x36f   : > { %3419 = vst [vmem:[%s4913_s20 + $0x1b8] sm:$0xff] %v3227_v23  ;;  %3008 = vmatpush.bf16.msra.mxu3 %v4186_v11  ;;  %v3989_v23 = vld [vmem:[#allocation5 + $0x70] sm:$0xf] }
 0x371   : > { %v2214_v10 = vpop.f32.mrf.mxu2  ;;  %v1879_v13 = vpop.f32.mrf.mxu0 }
 0x372   : > { %v2383_v39 = vpop.f32.mrf.mxu3  ;;  %v2048_v18 = vpop.f32.mrf.mxu1 }
 0x373   : > { %v2384_v38 = vadd.f32 %v2383_v39, %v2214_v10  ;;  %v2049_v45 = vadd.f32 %v2048_v18, %v1879_v13  ;;  %v4395_v10 = vld [vmem:[#allocation5 + $0x84] sm:$0xf0] }
 0x374   : > { %1918 = vmatmul.bf16.gmra.mxu0 %v5044_v44  ;;  %v3990_v39 = vor.u32 %v4395_v10, %v3989_v23 }
 0x375   : > { %v3230_v34 = vpack.c.bf16 %v2384_v38, %v2046_v37  ;;  %2087 = vmatmul.bf16.gmra.mxu1 %v5046_v50  ;;  %v4181_v37 = vld [vmem:[#allocation5 + $0x1f0] sm:$0xf]  ;;  %v4443_v38 = vld [vmem:[#allocation5 + $0x204] sm:$0xf0] }
 0x376   : > { %2256 = vmatmul.bf16.gmra.mxu2 %v5044_v44  ;;  %v4182_v63 = vor.u32 %v4443_v38, %v4181_v37  ;;  %2501 = vmatpush.bf16.msra.mxu0 %v3990_v39 }
 0x377   : > { %3422 = vst [vmem:[%s4913_s20 + $0x1d0] sm:$0xff] %v3230_v34  ;;  %2425 = vmatmul.bf16.gmra.mxu3 %v5046_v50 }
 0x378   : > { %2670 = vmatpush.bf16.msra.mxu1 %v4182_v63 }
 0x379   : > { %v2217_v29 = vpop.f32.mrf.mxu2  ;;  %v1881_v61 = vpop.f32.mrf.mxu0 }
 0x37a   : > { %v2386_v2 = vpop.f32.mrf.mxu3  ;;  %v2050_v12 = vpop.f32.mrf.mxu1 }
 0x37b   : > { %v2387_v4 = vadd.f32 %v2386_v2, %v2217_v29  ;;  %v2051_v18 = vadd.f32 %v2050_v12, %v1881_v61 }
 0x37d   : > { %v3233_v17 = vpack.c.bf16 %v2387_v4, %v2049_v45 }
 0x37f   : > { %3425 = vst [vmem:[%s4913_s20 + $0x1e8] sm:$0xff] %v3233_v17 }
 0x381   : > { %v2219_v34 = vpop.f32.mrf.mxu2  ;;  %v1884_v13 = vpop.f32.mrf.mxu0 }
 0x382   : > { %v2388_v36 = vpop.f32.mrf.mxu3  ;;  %v2053_v22 = vpop.f32.mrf.mxu1 }
 0x383   : > { %v2389_v8 = vadd.f32 %v2388_v36, %v2219_v34  ;;  %v2054_v45 = vadd.f32 %v2053_v22, %v1884_v13 }
 0x384   : > { %1923 = vmatmul.bf16.gmra.mxu0 %v5058_v56 }
 0x385   : > { %v3236_v41 = vpack.c.bf16 %v2389_v8, %v2051_v18  ;;  %2092 = vmatmul.bf16.gmra.mxu1 %v5060_v5 }
 0x386   : > { %2261 = vmatmul.bf16.gmra.mxu2 %v5058_v56 }
 0x387   : > { %3428 = vst [vmem:[%s4913_s20 + $0x200] sm:$0xff] %v3236_v41  ;;  %2430 = vmatmul.bf16.gmra.mxu3 %v5060_v5 }
 0x389   : > { %v2222_v29 = vpop.f32.mrf.mxu2  ;;  %v1886_v2 = vpop.f32.mrf.mxu0 }
 0x38a   : > { %v2391_v11 = vpop.f32.mrf.mxu3  ;;  %v2055_v4 = vpop.f32.mrf.mxu1 }
 0x38b   : > { %v2392_v61 = vadd.f32 %v2391_v11, %v2222_v29  ;;  %v2056_v39 = vadd.f32 %v2055_v4, %v1886_v2 }
 0x38d   : > { %v3239_v12 = vpack.c.bf16 %v2392_v61, %v2054_v45 }
 0x38f   : > { %3431 = vst [vmem:[%s4913_s20 + $0x218] sm:$0xff] %v3239_v12 }
 0x391   : > { %v2224_v17 = vpop.f32.mrf.mxu2  ;;  %v1889_v10 = vpop.f32.mrf.mxu0 }
 0x392   : > { %v2393_v23 = vpop.f32.mrf.mxu3  ;;  %v2058_v38 = vpop.f32.mrf.mxu1 }
 0x393   : > { %v2394_v37 = vadd.f32 %v2393_v23, %v2224_v17  ;;  %v2059_v63 = vadd.f32 %v2058_v38, %v1889_v10  ;;  %v5758_v17 = vld [vmem:[#allocation12_spill] sm:$0xff]  ;;  %v5759_v23 = vld [vmem:[#allocation13_spill] sm:$0xff] }
 0x394   : > { %1928 = vmatmul.bf16.gmra.mxu0 %v5072_v40 }
 0x395   : > { %v3242_v34 = vpack.c.bf16 %v2394_v37, %v2056_v39  ;;  %2097 = vmatmul.bf16.gmra.mxu1 %v5074_v52 }
 0x396   : > { %2266 = vmatmul.bf16.gmra.mxu2 %v5072_v40 }
 0x397   : > { %3434 = vst [vmem:[%s4913_s20 + $0x230] sm:$0xff] %v3242_v34  ;;  %2435 = vmatmul.bf16.gmra.mxu3 %v5074_v52 }
 0x399   : > { %v2227_v36 = vpop.f32.mrf.mxu2  ;;  %v1891_v18 = vpop.f32.mrf.mxu0 }
 0x39a   : > { %v2396_v13 = vpop.f32.mrf.mxu3  ;;  %v2060_v22 = vpop.f32.mrf.mxu1 }
 0x39b   : > { %v2397_v8 = vadd.f32 %v2396_v13, %v2227_v36  ;;  %v2061_v2 = vadd.f32 %v2060_v22, %v1891_v18 }
 0x39d   : > { %v3245_v41 = vpack.c.bf16 %v2397_v8, %v2059_v63 }
 0x39f   : > { %3437 = vst [vmem:[%s4913_s20 + $0x248] sm:$0xff] %v3245_v41 }
 0x3a1   : > { %v2229_v45 = vpop.f32.mrf.mxu2  ;;  %v1894_v11 = vpop.f32.mrf.mxu0 }
 0x3a2   : > { %v2398_v29 = vpop.f32.mrf.mxu3  ;;  %v2063_v4 = vpop.f32.mrf.mxu1 }
 0x3a3   : > { %v2399_v61 = vadd.f32 %v2398_v29, %v2229_v45  ;;  %v2064_v10 = vadd.f32 %v2063_v4, %v1894_v11  ;;  %v4386_v11 = vld [vmem:[#allocation5 + $0x44] sm:$0xf]  ;;  %v3967_v4 = vld [vmem:[#allocation5 + $0x58] sm:$0xf0] }
 0x3a4   : > { %1933 = vmatmul.bf16.gmra.mxu0 %v5758_v17 }
 0x3a5   : > { %v3248_v12 = vpack.c.bf16 %v2399_v61, %v2061_v2  ;;  %2102 = vmatmul.bf16.gmra.mxu1 %v5759_v23  ;;  %v5760_v2 = vld [vmem:[#allocation14_spill] sm:$0xff]  ;;  %v5761_v61 = vld [vmem:[#allocation15_spill] sm:$0xff] }
 0x3a6   : > { %2271 = vmatmul.bf16.gmra.mxu2 %v5758_v17 }
 0x3a7   : > { %3440 = vst [vmem:[%s4913_s20 + $0x260] sm:$0xff] %v3248_v12  ;;  %2440 = vmatmul.bf16.gmra.mxu3 %v5759_v23  ;;  %v3970_v12 = vor.u32 %v4386_v11, %v3967_v4  ;;  %v4437_v23 = vld [vmem:[#allocation5 + $0x1d4] sm:$0xf0] }
 0x3a9   : > { %v2232_v39 = vpop.f32.mrf.mxu2  ;;  %v1896_v38 = vpop.f32.mrf.mxu0  ;;  %2840 = vmatpush.bf16.msra.mxu2 %v3970_v12 }
 0x3aa   : > { %v2401_v37 = vpop.f32.mrf.mxu3  ;;  %v2065_v63 = vpop.f32.mrf.mxu1 }
 0x3ab   : > { %v2402_v34 = vadd.f32 %v2401_v37, %v2232_v39  ;;  %v2066_v22 = vadd.f32 %v2065_v63, %v1896_v38  ;;  %v4159_v39 = vld [vmem:[#allocation5 + $0x1d8] sm:$0xf0] }
 0x3ad   : > { %v3251_v36 = vpack.c.bf16 %v2402_v34, %v2064_v10  ;;  %v4434_v10 = vld [vmem:[#allocation5 + $0x1c4] sm:$0xf] }
 0x3ae   : > { %v4162_v34 = vor.u32 %v4434_v10, %v4159_v39 }
 0x3af   : > { %3443 = vst [vmem:[%s4913_s20 + $0x278] sm:$0xff] %v3251_v36 }
 0x3b0   : > { %3009 = vmatpush.bf16.msra.mxu3 %v4162_v34 }
 0x3b1   : > { %v2234_v13 = vpop.f32.mrf.mxu2  ;;  %v1899_v8 = vpop.f32.mrf.mxu0 }
 0x3b2   : > { %v2403_v18 = vpop.f32.mrf.mxu3  ;;  %v2068_v45 = vpop.f32.mrf.mxu1 }
 0x3b3   : > { %v2404_v41 = vadd.f32 %v2403_v18, %v2234_v13  ;;  %v2069_v37 = vadd.f32 %v2068_v45, %v1899_v8 }
 0x3b4   : > { %1938 = vmatmul.bf16.gmra.mxu0 %v5760_v2 }
 0x3b5   : > { %v3254_v29 = vpack.c.bf16 %v2404_v41, %v2066_v22  ;;  %2107 = vmatmul.bf16.gmra.mxu1 %v5761_v61  ;;  %v3965_v41 = vld [vmem:[#allocation5 + $0x40] sm:$0xf] }
 0x3b6   : > { %2276 = vmatmul.bf16.gmra.mxu2 %v5760_v2  ;;  %v4157_v2 = vld [vmem:[#allocation5 + $0x1c0] sm:$0xf] }
 0x3b7   : > { %3446 = vst [vmem:[%s4913_s20 + $0x290] sm:$0xff] %v3254_v29  ;;  %2445 = vmatmul.bf16.gmra.mxu3 %v5761_v61  ;;  %v4389_v29 = vld [vmem:[#allocation5 + $0x54] sm:$0xf0]  ;;  %v4158_v4 = vor.u32 %v4437_v23, %v4157_v2 }
 0x3b8   : > { %v3966_v61 = vor.u32 %v4389_v29, %v3965_v41 }
 0x3b9   : > { %v2237_v38 = vpop.f32.mrf.mxu2  ;;  %v1901_v36 = vpop.f32.mrf.mxu0  ;;  %2671 = vmatpush.bf16.msra.mxu1 %v4158_v4 }
 0x3ba   : > { %v2406_v63 = vpop.f32.mrf.mxu3  ;;  %v2070_v18 = vpop.f32.mrf.mxu1  ;;  %2502 = vmatpush.bf16.msra.mxu0 %v3966_v61 }
 0x3bb   : > { %v2407_v13 = vadd.f32 %v2406_v63, %v2237_v38  ;;  %v2071_v45 = vadd.f32 %v2070_v18, %v1901_v36  ;;  %v5762_v38 = vld [vmem:[#allocation16_spill] sm:$0xff] }
 0x3bd   : > { %v3257_v22 = vpack.c.bf16 %v2407_v13, %v2069_v37  ;;  %v5763_v37 = vld [vmem:[#allocation17_spill] sm:$0xff] }
 0x3bf   : > { %3449 = vst [vmem:[%s4913_s20 + $0x2a8] sm:$0xff] %v3257_v22 }
 0x3c1   : > { %v2239_v11 = vpop.f32.mrf.mxu2  ;;  %v1904_v8 = vpop.f32.mrf.mxu0 }
 0x3c2   : > { %v2408_v17 = vpop.f32.mrf.mxu3  ;;  %v2073_v12 = vpop.f32.mrf.mxu1 }
 0x3c3   : > { %v2409_v10 = vadd.f32 %v2408_v17, %v2239_v11  ;;  %v2074_v34 = vadd.f32 %v2073_v12, %v1904_v8 }
 0x3c4   : > { %1943 = vmatmul.bf16.gmra.mxu0 %v5762_v38 }
 0x3c5   : > { %v3260_v39 = vpack.c.bf16 %v2409_v10, %v2071_v45  ;;  %2112 = vmatmul.bf16.gmra.mxu1 %v5763_v37  ;;  %v5764_v45 = vld [vmem:[#allocation18_spill] sm:$0xff]  ;;  %v5765_v10 = vld [vmem:[#allocation19_spill] sm:$0xff] }
 0x3c6   : > { %2281 = vmatmul.bf16.gmra.mxu2 %v5762_v38 }
 0x3c7   : > { %3452 = vst [vmem:[%s4913_s20 + $0x2c0] sm:$0xff] %v3260_v39  ;;  %2450 = vmatmul.bf16.gmra.mxu3 %v5763_v37  ;;  %v4431_v37 = vld [vmem:[#allocation5 + $0x1a4] sm:$0xf0] }
 0x3c9   : > { %v2242_v23 = vpop.f32.mrf.mxu2  ;;  %v1906_v61 = vpop.f32.mrf.mxu0 }
 0x3ca   : > { %v2411_v2 = vpop.f32.mrf.mxu3  ;;  %v2075_v17 = vpop.f32.mrf.mxu1 }
 0x3cb   : > { %v2412_v63 = vadd.f32 %v2411_v2, %v2242_v23  ;;  %v2076_v41 = vadd.f32 %v2075_v17, %v1906_v61 }
 0x3cd   : > { %v3263_v36 = vpack.c.bf16 %v2412_v63, %v2074_v34 }
 0x3cf   : > { %3455 = vst [vmem:[%s4913_s20 + $0x2d8] sm:$0xff] %v3263_v36 }
 0x3d1   : > { %v2244_v13 = vpop.f32.mrf.mxu2  ;;  %v1909_v22 = vpop.f32.mrf.mxu0 }
 0x3d2   : > { %v2413_v18 = vpop.f32.mrf.mxu3  ;;  %v2078_v11 = vpop.f32.mrf.mxu1 }
 0x3d3   : > { %v2414_v29 = vadd.f32 %v2413_v18, %v2244_v13  ;;  %v2079_v8 = vadd.f32 %v2078_v11, %v1909_v22 }
 0x3d4   : > { %1948 = vmatmul.bf16.gmra.mxu0 %v5764_v45 }
 0x3d5   : > { %v3266_v4 = vpack.c.bf16 %v2414_v29, %v2076_v41  ;;  %2117 = vmatmul.bf16.gmra.mxu1 %v5765_v10 }
 0x3d6   : > { %2286 = vmatmul.bf16.gmra.mxu2 %v5764_v45 }
 0x3d7   : > { %3458 = vst [vmem:[%s4913_s20 + $0x2f0] sm:$0xff] %v3266_v4  ;;  %2455 = vmatmul.bf16.gmra.mxu3 %v5765_v10  ;;  %v5766_v4 = vld [vmem:[#allocation20_spill] sm:$0xff]  ;;  %v5767_v10 = vld [vmem:[#allocation21_spill] sm:$0xff] }
 0x3d9   : > { %v2247_v12 = vpop.f32.mrf.mxu2  ;;  %v1911_v34 = vpop.f32.mrf.mxu0 }
 0x3da   : > { %v2416_v39 = vpop.f32.mrf.mxu3  ;;  %v2080_v2 = vpop.f32.mrf.mxu1 }
 0x3db   : > { %v2417_v23 = vadd.f32 %v2416_v39, %v2247_v12  ;;  %v2081_v13 = vadd.f32 %v2080_v2, %v1911_v34 }
 0x3dd   : > { %v3269_v61 = vpack.c.bf16 %v2417_v23, %v2079_v8 }
 0x3df   : > { %3461 = vst [vmem:[%s4913_s20 + $0x308] sm:$0xff] %v3269_v61 }
 0x3e1   : > { %v2249_v63 = vpop.f32.mrf.mxu2  ;;  %v1914_v36 = vpop.f32.mrf.mxu0 }
 0x3e2   : > { %v2418_v17 = vpop.f32.mrf.mxu3  ;;  %v2083_v41 = vpop.f32.mrf.mxu1 }
 0x3e3   : > { %v2419_v18 = vadd.f32 %v2418_v17, %v2249_v63  ;;  %v2084_v22 = vadd.f32 %v2083_v41, %v1914_v36  ;;  %v4380_v36 = vld [vmem:[#allocation5 + $0x14] sm:$0xf]  ;;  %v3943_v41 = vld [vmem:[#allocation5 + $0x28] sm:$0xf0] }
 0x3e4   : > { %1953 = vmatmul.bf16.gmra.mxu0 %v5766_v4 }
 0x3e5   : > { %v3272_v29 = vpack.c.bf16 %v2419_v18, %v2081_v13  ;;  %2122 = vmatmul.bf16.gmra.mxu1 %v5767_v10 }
 0x3e6   : > { %2291 = vmatmul.bf16.gmra.mxu2 %v5766_v4  ;;  %v5768_v4 = vld [vmem:[#allocation22_spill] sm:$0xff] }
 0x3e7   : > { %3464 = vst [vmem:[%s4913_s20 + $0x320] sm:$0xff] %v3272_v29  ;;  %2460 = vmatmul.bf16.gmra.mxu3 %v5767_v10  ;;  %v5769_v29 = vld [vmem:[#allocation23_spill] sm:$0xff]  ;;  %v4133_v10 = vld [vmem:[#allocation5 + $0x190] sm:$0xf] }
 0x3e9   : > { %v2252_v11 = vpop.f32.mrf.mxu2  ;;  %v1916_v12 = vpop.f32.mrf.mxu0 }
 0x3ea   : > { %v2421_v8 = vpop.f32.mrf.mxu3  ;;  %v2085_v34 = vpop.f32.mrf.mxu1 }
 0x3eb   : > { %v2422_v39 = vadd.f32 %v2421_v8, %v2252_v11  ;;  %v2086_v17 = vadd.f32 %v2085_v34, %v1916_v12  ;;  %v4428_v11 = vld [vmem:[#allocation5 + $0x194] sm:$0xf]  ;;  %v4135_v8 = vld [vmem:[#allocation5 + $0x1a8] sm:$0xf0] }
 0x3ec   : > { %v4138_v34 = vor.u32 %v4428_v11, %v4135_v8 }
 0x3ed   : > { %v3275_v23 = vpack.c.bf16 %v2422_v39, %v2084_v22  ;;  %v3946_v22 = vor.u32 %v4380_v36, %v3943_v41  ;;  %v4134_v41 = vor.u32 %v4431_v37, %v4133_v10 }
 0x3ee   : > { %3010 = vmatpush.bf16.msra.mxu3 %v4138_v34 }
 0x3ef   : > { %3467 = vst [vmem:[%s4913_s20 + $0x338] sm:$0xff] %v3275_v23  ;;  %2841 = vmatpush.bf16.msra.mxu2 %v3946_v22  ;;  %2672 = vmatpush.bf16.msra.mxu1 %v4134_v41 }
 0x3f1   : > { %v2254_v2 = vpop.f32.mrf.mxu2  ;;  %v1919_v63 = vpop.f32.mrf.mxu0 }
 0x3f2   : > { %v2423_v61 = vpop.f32.mrf.mxu3  ;;  %v2088_v18 = vpop.f32.mrf.mxu1 }
 0x3f3   : > { %v2424_v13 = vadd.f32 %v2423_v61, %v2254_v2  ;;  %v2089_v39 = vadd.f32 %v2088_v18, %v1919_v63 }
 0x3f4   : > { %1958 = vmatmul.bf16.gmra.mxu0 %v5768_v4 }
 0x3f5   : > { %v3278_v45 = vpack.c.bf16 %v2424_v13, %v2086_v17  ;;  %2127 = vmatmul.bf16.gmra.mxu1 %v5769_v29 }
 0x3f6   : > { %2296 = vmatmul.bf16.gmra.mxu2 %v5768_v4  ;;  %v4383_v4 = vld [vmem:[#allocation5 + $0x24] sm:$0xf0] }
 0x3f7   : > { %3470 = vst [vmem:[%s4913_s20 + $0x350] sm:$0xff] %v3278_v45  ;;  %2465 = vmatmul.bf16.gmra.mxu3 %v5769_v29  ;;  %v3941_v45 = vld [vmem:[#allocation5 + $0x10] sm:$0xf] }
 0x3f8   : > { %v3942_v29 = vor.u32 %v4383_v4, %v3941_v45 }
 0x3f9   : > { %v2257_v12 = vpop.f32.mrf.mxu2  ;;  %v1921_v2 = vpop.f32.mrf.mxu0 }
 0x3fa   : > { %v2426_v23 = vpop.f32.mrf.mxu3  ;;  %v2090_v17 = vpop.f32.mrf.mxu1  ;;  %2503 = vmatpush.bf16.msra.mxu0 %v3942_v29 }
 0x3fb   : > { %v2427_v61 = vadd.f32 %v2426_v23, %v2257_v12  ;;  %v2091_v18 = vadd.f32 %v2090_v17, %v1921_v2  ;;  %v5770_v12 = vld [vmem:[#allocation24_spill] sm:$0xff] }
 0x3fd   : > { %v3281_v13 = vpack.c.bf16 %v2427_v61, %v2089_v39  ;;  %v5771_v39 = vld [vmem:[#allocation25_spill] sm:$0xff] }
 0x3ff   : > { %3473 = vst [vmem:[%s4913_s20 + $0x368] sm:$0xff] %v3281_v13 }
 0x401   : > { %v2259_v36 = vpop.f32.mrf.mxu2  ;;  %v1924_v63 = vpop.f32.mrf.mxu0 }
 0x402   : > { %v2428_v38 = vpop.f32.mrf.mxu3  ;;  %v2093_v22 = vpop.f32.mrf.mxu1 }
 0x403   : > { %v2429_v11 = vadd.f32 %v2428_v38, %v2259_v36  ;;  %v2094_v4 = vadd.f32 %v2093_v22, %v1924_v63 }
 0x404   : > { %1963 = vmatmul.bf16.gmra.mxu0 %v5770_v12 }
 0x405   : > { %v3284_v8 = vpack.c.bf16 %v2429_v11, %v2091_v18  ;;  %2132 = vmatmul.bf16.gmra.mxu1 %v5771_v39  ;;  %v5772_v18 = vld [vmem:[#allocation26_spill] sm:$0xff]  ;;  %v5773_v11 = vld [vmem:[#allocation27_spill] sm:$0xff] }
 0x406   : > { %2301 = vmatmul.bf16.gmra.mxu2 %v5770_v12 }
 0x407   : > { %3476 = vst [vmem:[%s4913_s20 + $0x380] sm:$0xff] %v3284_v8  ;;  %2470 = vmatmul.bf16.gmra.mxu3 %v5771_v39 }
 0x409   : > { %v2262_v37 = vpop.f32.mrf.mxu2  ;;  %v1926_v29 = vpop.f32.mrf.mxu0 }
 0x40a   : > { %v2431_v10 = vpop.f32.mrf.mxu3  ;;  %v2095_v38 = vpop.f32.mrf.mxu1 }
 0x40b   : > { %v2432_v34 = vadd.f32 %v2431_v10, %v2262_v37  ;;  %v2096_v13 = vadd.f32 %v2095_v38, %v1926_v29 }
 0x40d   : > { %v3287_v23 = vpack.c.bf16 %v2432_v34, %v2094_v4 }
 0x40f   : > { %3479 = vst [vmem:[%s4913_s20 + $0x398] sm:$0xff] %v3287_v23 }
 0x411   : > { %v2264_v2 = vpop.f32.mrf.mxu2  ;;  %v1929_v17 = vpop.f32.mrf.mxu0 }
 0x412   : > { %v2433_v61 = vpop.f32.mrf.mxu3  ;;  %v2098_v36 = vpop.f32.mrf.mxu1 }
 0x413   : > { %v2434_v45 = vadd.f32 %v2433_v61, %v2264_v2  ;;  %v2099_v63 = vadd.f32 %v2098_v36, %v1929_v17 }
 0x414   : > { %1968 = vmatmul.bf16.gmra.mxu0 %v5772_v18 }
 0x415   : > { %v3290_v41 = vpack.c.bf16 %v2434_v45, %v2096_v13  ;;  %2137 = vmatmul.bf16.gmra.mxu1 %v5773_v11 }
 0x416   : > { %2306 = vmatmul.bf16.gmra.mxu2 %v5772_v18 }
 0x417   : > { %3482 = vst [vmem:[%s4913_s20 + $0x3b0] sm:$0xff] %v3290_v41  ;;  %2475 = vmatmul.bf16.gmra.mxu3 %v5773_v11  ;;  %v5774_v41 = vld [vmem:[#allocation28_spill] sm:$0xff]  ;;  %v5775_v11 = vld [vmem:[#allocation29_spill] sm:$0xff] }
 0x419   : > { %v2267_v22 = vpop.f32.mrf.mxu2  ;;  %v1931_v4 = vpop.f32.mrf.mxu0 }
 0x41a   : > { %v2436_v8 = vpop.f32.mrf.mxu3  ;;  %v2100_v10 = vpop.f32.mrf.mxu1 }
 0x41b   : > { %v2437_v37 = vadd.f32 %v2436_v8, %v2267_v22  ;;  %v2101_v2 = vadd.f32 %v2100_v10, %v1931_v4 }
 0x41d   : > { %v3293_v29 = vpack.c.bf16 %v2437_v37, %v2099_v63 }
 0x41f   : > { %3485 = vst [vmem:[%s4913_s20 + $0x3c8] sm:$0xff] %v3293_v29 }
 0x421   : > { %v2269_v34 = vpop.f32.mrf.mxu2  ;;  %v1934_v23 = vpop.f32.mrf.mxu0 }
 0x422   : > { %v2438_v38 = vpop.f32.mrf.mxu3  ;;  %v2103_v13 = vpop.f32.mrf.mxu1 }
 0x423   : > { %v2439_v61 = vadd.f32 %v2438_v38, %v2269_v34  ;;  %v2104_v17 = vadd.f32 %v2103_v13, %v1934_v23 }
 0x424   : > { %1973 = vmatmul.bf16.gmra.mxu0 %v5774_v41 }
 0x425   : > { %v3296_v45 = vpack.c.bf16 %v2439_v61, %v2101_v2  ;;  %2142 = vmatmul.bf16.gmra.mxu1 %v5775_v11 }
 0x426   : > { %2311 = vmatmul.bf16.gmra.mxu2 %v5774_v41 }
 0x427   : > { %3488 = vst [vmem:[%s4913_s20 + $0x3e0] sm:$0xff] %v3296_v45  ;;  %2480 = vmatmul.bf16.gmra.mxu3 %v5775_v11  ;;  %v5776_v45 = vld [vmem:[#allocation30_spill] sm:$0xff]  ;;  %v5777_v11 = vld [vmem:[#allocation31_spill] sm:$0xff] }
 0x429   : > { %v2272_v36 = vpop.f32.mrf.mxu2  ;;  %v1936_v22 = vpop.f32.mrf.mxu0 }
 0x42a   : > { %v2441_v63 = vpop.f32.mrf.mxu3  ;;  %v2105_v4 = vpop.f32.mrf.mxu1 }
 0x42b   : > { %v2442_v8 = vadd.f32 %v2441_v63, %v2272_v36  ;;  %v2106_v38 = vadd.f32 %v2105_v4, %v1936_v22 }
 0x42d   : > { %v3299_v37 = vpack.c.bf16 %v2442_v8, %v2104_v17 }
 0x42f   : > { %3491 = vst [vmem:[%s4913_s20 + $0x3f8] sm:$0xff] %v3299_v37 }
 0x431   : > { %v2274_v10 = vpop.f32.mrf.mxu2  ;;  %v1939_v34 = vpop.f32.mrf.mxu0 }
 0x432   : > { %v2443_v29 = vpop.f32.mrf.mxu3  ;;  %v2108_v61 = vpop.f32.mrf.mxu1 }
 0x433   : > { %v2444_v2 = vadd.f32 %v2443_v29, %v2274_v10  ;;  %v2109_v23 = vadd.f32 %v2108_v61, %v1939_v34 }
 0x434   : > { %1978 = vmatmul.bf16.gmra.mxu0 %v5776_v45 }
 0x435   : > { %v3302_v41 = vpack.c.bf16 %v2444_v2, %v2106_v38  ;;  %2147 = vmatmul.bf16.gmra.mxu1 %v5777_v11 }
 0x436   : > { %2316 = vmatmul.bf16.gmra.mxu2 %v5776_v45 }
 0x437   : > { %3494 = vst [vmem:[%s4913_s20 + $0x410] sm:$0xff] %v3302_v41  ;;  %2485 = vmatmul.bf16.gmra.mxu3 %v5777_v11 }
 0x439   : > { %v2277_v13 = vpop.f32.mrf.mxu2  ;;  %v1941_v36 = vpop.f32.mrf.mxu0 }
 0x43a   : > { %v2446_v17 = vpop.f32.mrf.mxu3  ;;  %v2110_v22 = vpop.f32.mrf.mxu1 }
 0x43b   : > { %v2447_v63 = vadd.f32 %v2446_v17, %v2277_v13  ;;  %v2111_v29 = vadd.f32 %v2110_v22, %v1941_v36 }
 0x43d   : > { %v3305_v8 = vpack.c.bf16 %v2447_v63, %v2109_v23 }
 0x43f   : > { %3497 = vst [vmem:[%s4913_s20 + $0x428] sm:$0xff] %v3305_v8 }
 0x441   : > { %v2279_v4 = vpop.f32.mrf.mxu2  ;;  %v1944_v10 = vpop.f32.mrf.mxu0 }
 0x442   : > { %v2448_v37 = vpop.f32.mrf.mxu3  ;;  %v2113_v2 = vpop.f32.mrf.mxu1 }
 0x443   : > { %v2449_v38 = vadd.f32 %v2448_v37, %v2279_v4  ;;  %v2114_v41 = vadd.f32 %v2113_v2, %v1944_v10 }
 0x444   : > { %1983 = vmatmul.bf16.gmra.mxu0 %v5226_v48 }
 0x445   : > { %v3308_v45 = vpack.c.bf16 %v2449_v38, %v2111_v29  ;;  %2152 = vmatmul.bf16.gmra.mxu1 %v5228_v7 }
 0x446   : > { %2321 = vmatmul.bf16.gmra.mxu2 %v5226_v48 }
 0x447   : > { %3500 = vst [vmem:[%s4913_s20 + $0x440] sm:$0xff] %v3308_v45  ;;  %2490 = vmatmul.bf16.gmra.mxu3 %v5228_v7 }
 0x449   : > { %v2282_v34 = vpop.f32.mrf.mxu2  ;;  %v1946_v23 = vpop.f32.mrf.mxu0 }
 0x44a   : > { %v2451_v61 = vpop.f32.mrf.mxu3  ;;  %v2115_v17 = vpop.f32.mrf.mxu1 }
 0x44b   : > { %v2452_v13 = vadd.f32 %v2451_v61, %v2282_v34  ;;  %v2116_v4 = vadd.f32 %v2115_v17, %v1946_v23 }
 0x44d   : > { %v3311_v36 = vpack.c.bf16 %v2452_v13, %v2114_v41 }
 0x44f   : > { %3503 = vst [vmem:[%s4913_s20 + $0x458] sm:$0xff] %v3311_v36 }
 0x451   : > { %v2284_v63 = vpop.f32.mrf.mxu2  ;;  %v1949_v8 = vpop.f32.mrf.mxu0 }
 0x452   : > { %v2453_v22 = vpop.f32.mrf.mxu3  ;;  %v2118_v29 = vpop.f32.mrf.mxu1 }
 0x453   : > { %v2454_v37 = vadd.f32 %v2453_v22, %v2284_v63  ;;  %v2119_v45 = vadd.f32 %v2118_v29, %v1949_v8 }
 0x454   : > { %2504 = vmatmul.bf16.vlgmr.msra.gmra.mxu0 %v4806_v43 }
 0x455   : > { %v3314_v38 = vpack.c.bf16 %v2454_v37, %v2116_v4  ;;  %2673 = vmatmul.bf16.vlgmr.msra.gmra.mxu1 %v4808_v47 }
 0x456   : > { %2842 = vmatmul.bf16.vlgmr.msra.gmra.mxu2 %v4806_v43 }
 0x457   : > { %3506 = vst [vmem:[%s4913_s20 + $0x470] sm:$0xff] %v3314_v38  ;;  %3011 = vmatmul.bf16.vlgmr.msra.gmra.mxu3 %v4808_v47 }
 0x459   : > { %v2287_v10 = vpop.f32.mrf.mxu2  ;;  %v1951_v41 = vpop.f32.mrf.mxu0 }
 0x45a   : > { %v2456_v2 = vpop.f32.mrf.mxu3  ;;  %v2120_v61 = vpop.f32.mrf.mxu1 }
 0x45b   : > { %v2457_v34 = vadd.f32 %v2456_v2, %v2287_v10  ;;  %v2121_v63 = vadd.f32 %v2120_v61, %v1951_v41 }
 0x45d   : > { %v3317_v23 = vpack.c.bf16 %v2457_v34, %v2119_v45 }
 0x45f   : > { %3509 = vst [vmem:[%s4913_s20 + $0x488] sm:$0xff] %v3317_v23 }
 0x461   : > { %v2289_v13 = vpop.f32.mrf.mxu2  ;;  %v1954_v36 = vpop.f32.mrf.mxu0 }
 0x462   : > { %v2458_v17 = vpop.f32.mrf.mxu3  ;;  %v2123_v4 = vpop.f32.mrf.mxu1 }
 0x463   : > { %v2459_v22 = vadd.f32 %v2458_v17, %v2289_v13  ;;  %v2124_v47 = vadd.f32 %v2123_v4, %v1954_v36 }
 0x464   : > { %2509 = vmatmul.bf16.gmra.mxu0 %v4818_v54 }
 0x465   : > { %v3320_v43 = vpack.c.bf16 %v2459_v22, %v2121_v63  ;;  %2678 = vmatmul.bf16.gmra.mxu1 %v4820_v55 }
 0x466   : > { %2847 = vmatmul.bf16.gmra.mxu2 %v4818_v54 }
 0x467   : > { %3512 = vst [vmem:[%s4913_s20 + $0x4a0] sm:$0xff] %v3320_v43  ;;  %3016 = vmatmul.bf16.gmra.mxu3 %v4820_v55  ;;  %v5778_v55 = vld [vmem:[#allocation11_spill] sm:$0xff] }
 0x469   : > { %v2292_v8 = vpop.f32.mrf.mxu2  ;;  %v1956_v29 = vpop.f32.mrf.mxu0 }
 0x46a   : > { %v2461_v37 = vpop.f32.mrf.mxu3  ;;  %v2125_v45 = vpop.f32.mrf.mxu1 }
 0x46b   : > { %v2462_v38 = vadd.f32 %v2461_v37, %v2292_v8  ;;  %v2126_v61 = vadd.f32 %v2125_v45, %v1956_v29 }
 0x46d   : > { %v3323_v10 = vpack.c.bf16 %v2462_v38, %v2124_v47 }
 0x46f   : > { %3515 = vst [vmem:[%s4913_s20 + $0x4b8] sm:$0xff] %v3323_v10 }
 0x471   : > { %v2294_v2 = vpop.f32.mrf.mxu2  ;;  %v1959_v34 = vpop.f32.mrf.mxu0 }
 0x472   : > { %v2463_v41 = vpop.f32.mrf.mxu3  ;;  %v2128_v13 = vpop.f32.mrf.mxu1 }
 0x473   : > { %v2464_v23 = vadd.f32 %v2463_v41, %v2294_v2  ;;  %v2129_v17 = vadd.f32 %v2128_v13, %v1959_v34 }
 0x474   : > { %2514 = vmatmul.bf16.gmra.mxu0 %v4830_v60 }
 0x475   : > { %v3326_v54 = vpack.c.bf16 %v2464_v23, %v2126_v61  ;;  %2683 = vmatmul.bf16.gmra.mxu1 %v5778_v55 }
 0x476   : > { %2852 = vmatmul.bf16.gmra.mxu2 %v4830_v60 }
 0x477   : > { %3518 = vst [vmem:[%s4913_s20 + $0x4d0] sm:$0xff] %v3326_v54  ;;  %3021 = vmatmul.bf16.gmra.mxu3 %v5778_v55 }
 0x479   : > { %v2297_v36 = vpop.f32.mrf.mxu2  ;;  %v1961_v22 = vpop.f32.mrf.mxu0 }
 0x47a   : > { %v2466_v63 = vpop.f32.mrf.mxu3  ;;  %v2130_v43 = vpop.f32.mrf.mxu1 }
 0x47b   : > { %v2467_v4 = vadd.f32 %v2466_v63, %v2297_v36  ;;  %v2131_v38 = vadd.f32 %v2130_v43, %v1961_v22 }
 0x47d   : > { %v3329_v47 = vpack.c.bf16 %v2467_v4, %v2129_v17 }
 0x47f   : > { %3521 = vst [vmem:[%s4913_s20 + $0x4e8] sm:$0xff] %v3329_v47 }
 0x481   : > { %v2299_v8 = vpop.f32.mrf.mxu2  ;;  %v1964_v29 = vpop.f32.mrf.mxu0 }
 0x482   : > { %v2468_v37 = vpop.f32.mrf.mxu3  ;;  %v2133_v10 = vpop.f32.mrf.mxu1 }
 0x483   : > { %v2469_v45 = vadd.f32 %v2468_v37, %v2299_v8  ;;  %v2134_v2 = vadd.f32 %v2133_v10, %v1964_v29 }
 0x484   : > { %2519 = vmatmul.bf16.gmra.mxu0 %v4842_v14 }
 0x485   : > { %v3332_v60 = vpack.c.bf16 %v2469_v45, %v2131_v38  ;;  %2688 = vmatmul.bf16.gmra.mxu1 %v4844_v15 }
 0x486   : > { %2857 = vmatmul.bf16.gmra.mxu2 %v4842_v14 }
 0x487   : > { %3524 = vst [vmem:[%s4913_s20 + $0x500] sm:$0xff] %v3332_v60  ;;  %3026 = vmatmul.bf16.gmra.mxu3 %v4844_v15 }
 0x489   : > { %v2302_v41 = vpop.f32.mrf.mxu2  ;;  %v1966_v61 = vpop.f32.mrf.mxu0 }
 0x48a   : > { %v2471_v34 = vpop.f32.mrf.mxu3  ;;  %v2135_v13 = vpop.f32.mrf.mxu1 }
 0x48b   : > { %v2472_v23 = vadd.f32 %v2471_v34, %v2302_v41  ;;  %v2136_v63 = vadd.f32 %v2135_v13, %v1966_v61 }
 0x48d   : > { %v3335_v54 = vpack.c.bf16 %v2472_v23, %v2134_v2 }
 0x48f   : > { %3527 = vst [vmem:[%s4913_s20 + $0x518] sm:$0xff] %v3335_v54 }
 0x491   : > { %v2304_v55 = vpop.f32.mrf.mxu2  ;;  %v1969_v36 = vpop.f32.mrf.mxu0 }
 0x492   : > { %v2473_v17 = vpop.f32.mrf.mxu3  ;;  %v2138_v4 = vpop.f32.mrf.mxu1 }
 0x493   : > { %v2474_v22 = vadd.f32 %v2473_v17, %v2304_v55  ;;  %v2139_v15 = vadd.f32 %v2138_v4, %v1969_v36 }
 0x494   : > { %2524 = vmatmul.bf16.gmra.mxu0 %v4854_v20 }
 0x495   : > { %v3338_v14 = vpack.c.bf16 %v2474_v22, %v2136_v63  ;;  %2693 = vmatmul.bf16.gmra.mxu1 %v4856_v21 }
 0x496   : > { %2862 = vmatmul.bf16.gmra.mxu2 %v4854_v20 }
 0x497   : > { %3530 = vst [vmem:[%s4913_s20 + $0x530] sm:$0xff] %v3338_v14  ;;  %3031 = vmatmul.bf16.gmra.mxu3 %v4856_v21 }
 0x499   : > { %v2307_v43 = vpop.f32.mrf.mxu2  ;;  %v1971_v8 = vpop.f32.mrf.mxu0 }
 0x49a   : > { %v2476_v47 = vpop.f32.mrf.mxu3  ;;  %v2140_v29 = vpop.f32.mrf.mxu1 }
 0x49b   : > { %v2477_v37 = vadd.f32 %v2476_v47, %v2307_v43  ;;  %v2141_v2 = vadd.f32 %v2140_v29, %v1971_v8 }
 0x49d   : > { %v3341_v38 = vpack.c.bf16 %v2477_v37, %v2139_v15 }
 0x49f   : > { %3533 = vst [vmem:[%s4913_s20 + $0x548] sm:$0xff] %v3341_v38 }
 0x4a1   : > { %v2309_v45 = vpop.f32.mrf.mxu2  ;;  %v1974_v60 = vpop.f32.mrf.mxu0 }
 0x4a2   : > { %v2478_v10 = vpop.f32.mrf.mxu3  ;;  %v2143_v34 = vpop.f32.mrf.mxu1 }
 0x4a3   : > { %v2479_v41 = vadd.f32 %v2478_v10, %v2309_v45  ;;  %v2144_v21 = vadd.f32 %v2143_v34, %v1974_v60 }
 0x4a4   : > { %2529 = vmatmul.bf16.gmra.mxu0 %v4866_v26 }
 0x4a5   : > { %v3344_v20 = vpack.c.bf16 %v2479_v41, %v2141_v2  ;;  %2698 = vmatmul.bf16.gmra.mxu1 %v4868_v27 }
 0x4a6   : > { %2867 = vmatmul.bf16.gmra.mxu2 %v4866_v26 }
 0x4a7   : > { %3536 = vst [vmem:[%s4913_s20 + $0x560] sm:$0xff] %v3344_v20  ;;  %3036 = vmatmul.bf16.gmra.mxu3 %v4868_v27 }
 0x4a9   : > { %v2312_v61 = vpop.f32.mrf.mxu2  ;;  %v1976_v13 = vpop.f32.mrf.mxu0 }
 0x4aa   : > { %v2481_v23 = vpop.f32.mrf.mxu3  ;;  %v2145_v55 = vpop.f32.mrf.mxu1 }
 0x4ab   : > { %v2482_v54 = vadd.f32 %v2481_v23, %v2312_v61  ;;  %v2146_v4 = vadd.f32 %v2145_v55, %v1976_v13 }
 0x4ad   : > { %v3347_v17 = vpack.c.bf16 %v2482_v54, %v2144_v21 }
 0x4af   : > { %3539 = vst [vmem:[%s4913_s20 + $0x578] sm:$0xff] %v3347_v17 }
 0x4b1   : > { %v2314_v36 = vpop.f32.mrf.mxu2  ;;  %v1979_v22 = vpop.f32.mrf.mxu0 }
 0x4b2   : > { %v2483_v63 = vpop.f32.mrf.mxu3  ;;  %v2148_v15 = vpop.f32.mrf.mxu1 }
 0x4b3   : > { %v2484_v14 = vadd.f32 %v2483_v63, %v2314_v36  ;;  %v2149_v27 = vadd.f32 %v2148_v15, %v1979_v22 }
 0x4b4   : > { %2534 = vmatmul.bf16.gmra.mxu0 %v4878_v32 }
 0x4b5   : > { %v3350_v26 = vpack.c.bf16 %v2484_v14, %v2146_v4  ;;  %2703 = vmatmul.bf16.gmra.mxu1 %v4880_v33 }
 0x4b6   : > { %2872 = vmatmul.bf16.gmra.mxu2 %v4878_v32 }
 0x4b7   : > { %3542 = vst [vmem:[%s4913_s20 + $0x590] sm:$0xff] %v3350_v26  ;;  %3041 = vmatmul.bf16.gmra.mxu3 %v4880_v33 }
 0x4b9   : > { %v2317_v43 = vpop.f32.mrf.mxu2  ;;  %v1981_v8 = vpop.f32.mrf.mxu0 }
 0x4ba   : > { %v2486_v47 = vpop.f32.mrf.mxu3  ;;  %v2150_v29 = vpop.f32.mrf.mxu1 }
 0x4bb   : > { %v2487_v37 = vadd.f32 %v2486_v47, %v2317_v43  ;;  %v2151_v2 = vadd.f32 %v2150_v29, %v1981_v8 }
 0x4bd   : > { %v3353_v38 = vpack.c.bf16 %v2487_v37, %v2149_v27 }
 0x4bf   : > { %3545 = vst [vmem:[%s4913_s20 + $0x5a8] sm:$0xff] %v3353_v38 }
 0x4c1   : > { %v2319_v45 = vpop.f32.mrf.mxu2  ;;  %v1984_v60 = vpop.f32.mrf.mxu0 }
 0x4c2   : > { %v2488_v10 = vpop.f32.mrf.mxu3  ;;  %v2153_v34 = vpop.f32.mrf.mxu1 }
 0x4c3   : > { %v2489_v41 = vadd.f32 %v2488_v10, %v2319_v45  ;;  %v2154_v33 = vadd.f32 %v2153_v34, %v1984_v60 }
 0x4c4   : > { %2539 = vmatmul.bf16.gmra.mxu0 %v4890_v51 }
 0x4c5   : > { %v3356_v32 = vpack.c.bf16 %v2489_v41, %v2151_v2  ;;  %2708 = vmatmul.bf16.gmra.mxu1 %v4892_v53 }
 0x4c6   : > { %2877 = vmatmul.bf16.gmra.mxu2 %v4890_v51 }
 0x4c7   : > { %3548 = vst [vmem:[%s4913_s20 + $0x5c0] sm:$0xff] %v3356_v32  ;;  %3046 = vmatmul.bf16.gmra.mxu3 %v4892_v53 }
 0x4c9   : > { %v2322_v20 = vpop.f32.mrf.mxu2  ;;  %v1986_v61 = vpop.f32.mrf.mxu0 }
 0x4ca   : > { %v2491_v21 = vpop.f32.mrf.mxu3  ;;  %v2155_v13 = vpop.f32.mrf.mxu1 }
 0x4cb   : > { %v2492_v23 = vadd.f32 %v2491_v21, %v2322_v20  ;;  %v2156_v63 = vadd.f32 %v2155_v13, %v1986_v61 }
 0x4cd   : > { %v3359_v54 = vpack.c.bf16 %v2492_v23, %v2154_v33 }
 0x4cf   : > { %3551 = vst [vmem:[%s4913_s20 + $0x5d8] sm:$0xff] %v3359_v54 }
 0x4d1   : > { %v2324_v55 = vpop.f32.mrf.mxu2  ;;  %v2505_v36 = vpop.f32.mrf.mxu0 }
 0x4d2   : > { %v2493_v17 = vpop.f32.mrf.mxu3  ;;  %v2674_v4 = vpop.f32.mrf.mxu1 }
 0x4d3   : > { %v2494_v22 = vadd.f32 %v2493_v17, %v2324_v55  ;;  %v2675_v53 = vadd.f32 %v2674_v4, %v2505_v36 }
 0x4d4   : > { %2544 = vmatmul.bf16.gmra.mxu0 %v4902_v62 }
 0x4d5   : > { %v3362_v51 = vpack.c.bf16 %v2494_v22, %v2156_v63  ;;  %2713 = vmatmul.bf16.gmra.mxu1 %v4904_v0 }
 0x4d6   : > { %2882 = vmatmul.bf16.gmra.mxu2 %v4902_v62 }
 0x4d7   : > { %3554 = vst [vmem:[%s4913_s20 + $0x5f0] sm:$0xff] %v3362_v51  ;;  %3051 = vmatmul.bf16.gmra.mxu3 %v4904_v0 }
 0x4d9   : > { %v2843_v14 = vpop.f32.mrf.mxu2  ;;  %v2507_v26 = vpop.f32.mrf.mxu0 }
 0x4da   : > { %v3012_v15 = vpop.f32.mrf.mxu3  ;;  %v2676_v43 = vpop.f32.mrf.mxu1 }
 0x4db   : > { %v3013_v27 = vadd.f32 %v3012_v15, %v2843_v14  ;;  %v2677_v38 = vadd.f32 %v2676_v43, %v2507_v26 }
 0x4dd   : > { %v3174_v47 = vpack.c.bf16 %v3013_v27, %v2675_v53 }
 0x4df   : > { %3366 = vst [vmem:[%s4913_s20 + $0x10] sm:$0xff] %v3174_v47 }
 0x4e1   : > { %v2845_v8 = vpop.f32.mrf.mxu2  ;;  %v2510_v29 = vpop.f32.mrf.mxu0 }
 0x4e2   : > { %v3014_v37 = vpop.f32.mrf.mxu3  ;;  %v2679_v10 = vpop.f32.mrf.mxu1 }
 0x4e3   : > { %v3015_v45 = vadd.f32 %v3014_v37, %v2845_v8  ;;  %v2680_v0 = vadd.f32 %v2679_v10, %v2510_v29 }
 0x4e4   : > { %2549 = vmatmul.bf16.gmra.mxu0 %v4918_v16 }
 0x4e5   : > { %v3177_v62 = vpack.c.bf16 %v3015_v45, %v2677_v38  ;;  %2718 = vmatmul.bf16.gmra.mxu1 %v4920_v19 }
 0x4e6   : > { %2887 = vmatmul.bf16.gmra.mxu2 %v4918_v16 }
 0x4e7   : > { %3369 = vst [vmem:[%s4913_s20 + $0x28] sm:$0xff] %v3177_v62  ;;  %3056 = vmatmul.bf16.gmra.mxu3 %v4920_v19 }
 0x4e9   : > { %v2848_v60 = vpop.f32.mrf.mxu2  ;;  %v2512_v41 = vpop.f32.mrf.mxu0 }
 0x4ea   : > { %v3017_v2 = vpop.f32.mrf.mxu3  ;;  %v2681_v32 = vpop.f32.mrf.mxu1 }
 0x4eb   : > { %v3018_v34 = vadd.f32 %v3017_v2, %v2848_v60  ;;  %v2682_v23 = vadd.f32 %v2681_v32, %v2512_v41 }
 0x4ed   : > { %v3180_v33 = vpack.c.bf16 %v3018_v34, %v2680_v0 }
 0x4ef   : > { %3372 = vst [vmem:[%s4913_s20 + $0x40] sm:$0xff] %v3180_v33 }
 0x4f1   : > { %v2850_v20 = vpop.f32.mrf.mxu2  ;;  %v2515_v61 = vpop.f32.mrf.mxu0 }
 0x4f2   : > { %v3019_v21 = vpop.f32.mrf.mxu3  ;;  %v2684_v54 = vpop.f32.mrf.mxu1 }
 0x4f3   : > { %v3020_v13 = vadd.f32 %v3019_v21, %v2850_v20  ;;  %v2685_v19 = vadd.f32 %v2684_v54, %v2515_v61 }
 0x4f4   : > { %2554 = vmatmul.bf16.gmra.mxu0 %v4932_v42 }
 0x4f5   : > { %v3183_v16 = vpack.c.bf16 %v3020_v13, %v2682_v23  ;;  %2723 = vmatmul.bf16.gmra.mxu1 %v4934_v46 }
 0x4f6   : > { %2892 = vmatmul.bf16.gmra.mxu2 %v4932_v42 }
 0x4f7   : > { %3375 = vst [vmem:[%s4913_s20 + $0x58] sm:$0xff] %v3183_v16  ;;  %3061 = vmatmul.bf16.gmra.mxu3 %v4934_v46 }
 0x4f9   : > { %v2853_v55 = vpop.f32.mrf.mxu2  ;;  %v2517_v36 = vpop.f32.mrf.mxu0 }
 0x4fa   : > { %v3022_v17 = vpop.f32.mrf.mxu3  ;;  %v2686_v22 = vpop.f32.mrf.mxu1 }
 0x4fb   : > { %v3023_v63 = vadd.f32 %v3022_v17, %v2853_v55  ;;  %v2687_v15 = vadd.f32 %v2686_v22, %v2517_v36 }
 0x4fd   : > { %v3186_v4 = vpack.c.bf16 %v3023_v63, %v2685_v19 }
 0x4ff   : > { %3378 = vst [vmem:[%s4913_s20 + $0x70] sm:$0xff] %v3186_v4 }
 0x501   : > { %v2855_v51 = vpop.f32.mrf.mxu2  ;;  %v2520_v14 = vpop.f32.mrf.mxu0 }
 0x502   : > { %v3024_v53 = vpop.f32.mrf.mxu3  ;;  %v2689_v27 = vpop.f32.mrf.mxu1 }
 0x503   : > { %v3025_v26 = vadd.f32 %v3024_v53, %v2855_v51  ;;  %v2690_v46 = vadd.f32 %v2689_v27, %v2520_v14 }
 0x504   : > { %2559 = vmatmul.bf16.gmra.mxu0 %v4946_v25 }
 0x505   : > { %v3189_v42 = vpack.c.bf16 %v3025_v26, %v2687_v15  ;;  %2728 = vmatmul.bf16.gmra.mxu1 %v4948_v31 }
 0x506   : > { %2897 = vmatmul.bf16.gmra.mxu2 %v4946_v25 }
 0x507   : > { %3381 = vst [vmem:[%s4913_s20 + $0x88] sm:$0xff] %v3189_v42  ;;  %3066 = vmatmul.bf16.gmra.mxu3 %v4948_v31 }
 0x509   : > { %v2858_v43 = vpop.f32.mrf.mxu2  ;;  %v2522_v8 = vpop.f32.mrf.mxu0 }
 0x50a   : > { %v3027_v47 = vpop.f32.mrf.mxu3  ;;  %v2691_v29 = vpop.f32.mrf.mxu1 }
 0x50b   : > { %v3028_v37 = vadd.f32 %v3027_v47, %v2858_v43  ;;  %v2692_v0 = vadd.f32 %v2691_v29, %v2522_v8 }
 0x50d   : > { %v3192_v38 = vpack.c.bf16 %v3028_v37, %v2690_v46 }
 0x50f   : > { %3384 = vst [vmem:[%s4913_s20 + $0xa0] sm:$0xff] %v3192_v38 }
 0x511   : > { %v2860_v45 = vpop.f32.mrf.mxu2  ;;  %v2525_v62 = vpop.f32.mrf.mxu0 }
 0x512   : > { %v3029_v10 = vpop.f32.mrf.mxu3  ;;  %v2694_v2 = vpop.f32.mrf.mxu1 }
 0x513   : > { %v3030_v60 = vadd.f32 %v3029_v10, %v2860_v45  ;;  %v2695_v31 = vadd.f32 %v2694_v2, %v2525_v62 }
 0x514   : > { %2564 = vmatmul.bf16.gmra.mxu0 %v4960_v58 }
 0x515   : > { %v3195_v25 = vpack.c.bf16 %v3030_v60, %v2692_v0  ;;  %2733 = vmatmul.bf16.gmra.mxu1 %v4962_v1 }
 0x516   : > { %2902 = vmatmul.bf16.gmra.mxu2 %v4960_v58 }
 0x517   : > { %3387 = vst [vmem:[%s4913_s20 + $0xb8] sm:$0xff] %v3195_v25  ;;  %3071 = vmatmul.bf16.gmra.mxu3 %v4962_v1 }
 0x519   : > { %v2863_v41 = vpop.f32.mrf.mxu2  ;;  %v2527_v32 = vpop.f32.mrf.mxu0 }
 0x51a   : > { %v3032_v34 = vpop.f32.mrf.mxu3  ;;  %v2696_v20 = vpop.f32.mrf.mxu1 }
 0x51b   : > { %v3033_v33 = vadd.f32 %v3032_v34, %v2863_v41  ;;  %v2697_v54 = vadd.f32 %v2696_v20, %v2527_v32 }
 0x51d   : > { %v3198_v21 = vpack.c.bf16 %v3033_v33, %v2695_v31 }
 0x51f   : > { %3390 = vst [vmem:[%s4913_s20 + $0xd0] sm:$0xff] %v3198_v21 }
 0x521   : > { %v2865_v61 = vpop.f32.mrf.mxu2  ;;  %v2530_v13 = vpop.f32.mrf.mxu0 }
 0x522   : > { %v3034_v23 = vpop.f32.mrf.mxu3  ;;  %v2699_v19 = vpop.f32.mrf.mxu1 }
 0x523   : > { %v3035_v16 = vadd.f32 %v3034_v23, %v2865_v61  ;;  %v2700_v1 = vadd.f32 %v2699_v19, %v2530_v13 }
 0x524   : > { %2569 = vmatmul.bf16.gmra.mxu0 %v4974_v24 }
 0x525   : > { %v3201_v58 = vpack.c.bf16 %v3035_v16, %v2697_v54  ;;  %2738 = vmatmul.bf16.gmra.mxu1 %v4976_v30 }
 0x526   : > { %2907 = vmatmul.bf16.gmra.mxu2 %v4974_v24 }
 0x527   : > { %3393 = vst [vmem:[%s4913_s20 + $0xe8] sm:$0xff] %v3201_v58  ;;  %3076 = vmatmul.bf16.gmra.mxu3 %v4976_v30 }
 0x529   : > { %v2868_v55 = vpop.f32.mrf.mxu2  ;;  %v2532_v36 = vpop.f32.mrf.mxu0 }
 0x52a   : > { %v3037_v17 = vpop.f32.mrf.mxu3  ;;  %v2701_v22 = vpop.f32.mrf.mxu1 }
 0x52b   : > { %v3038_v63 = vadd.f32 %v3037_v17, %v2868_v55  ;;  %v2702_v15 = vadd.f32 %v2701_v22, %v2532_v36 }
 0x52d   : > { %v3204_v4 = vpack.c.bf16 %v3038_v63, %v2700_v1 }
 0x52f   : > { %3396 = vst [vmem:[%s4913_s20 + $0x100] sm:$0xff] %v3204_v4 }
 0x531   : > { %v2870_v51 = vpop.f32.mrf.mxu2  ;;  %v2535_v14 = vpop.f32.mrf.mxu0 }
 0x532   : > { %v3039_v53 = vpop.f32.mrf.mxu3  ;;  %v2704_v27 = vpop.f32.mrf.mxu1 }
 0x533   : > { %v3040_v26 = vadd.f32 %v3039_v53, %v2870_v51  ;;  %v2705_v30 = vadd.f32 %v2704_v27, %v2535_v14 }
 0x534   : > { %2574 = vmatmul.bf16.gmra.mxu0 %v4988_v59 }
 0x535   : > { %v3207_v24 = vpack.c.bf16 %v3040_v26, %v2702_v15  ;;  %2743 = vmatmul.bf16.gmra.mxu1 %v4990_v3 }
 0x536   : > { %2912 = vmatmul.bf16.gmra.mxu2 %v4988_v59 }
 0x537   : > { %3399 = vst [vmem:[%s4913_s20 + $0x118] sm:$0xff] %v3207_v24  ;;  %3081 = vmatmul.bf16.gmra.mxu3 %v4990_v3 }
 0x539   : > { %v2873_v42 = vpop.f32.mrf.mxu2  ;;  %v2537_v43 = vpop.f32.mrf.mxu0 }
 0x53a   : > { %v3042_v46 = vpop.f32.mrf.mxu3  ;;  %v2706_v8 = vpop.f32.mrf.mxu1 }
 0x53b   : > { %v3043_v47 = vadd.f32 %v3042_v46, %v2873_v42  ;;  %v2707_v10 = vadd.f32 %v2706_v8, %v2537_v43 }
 0x53d   : > { %v3210_v37 = vpack.c.bf16 %v3043_v47, %v2705_v30 }
 0x53f   : > { %3402 = vst [vmem:[%s4913_s20 + $0x130] sm:$0xff] %v3210_v37 }
 0x541   : > { %v2875_v29 = vpop.f32.mrf.mxu2  ;;  %v2540_v45 = vpop.f32.mrf.mxu0 }
 0x542   : > { %v3044_v38 = vpop.f32.mrf.mxu3  ;;  %v2709_v0 = vpop.f32.mrf.mxu1 }
 0x543   : > { %v3045_v62 = vadd.f32 %v3044_v38, %v2875_v29  ;;  %v2710_v3 = vadd.f32 %v2709_v0, %v2540_v45 }
 0x544   : > { %2579 = vmatmul.bf16.gmra.mxu0 %v5002_v49 }
 0x545   : > { %v3213_v59 = vpack.c.bf16 %v3045_v62, %v2707_v10  ;;  %2748 = vmatmul.bf16.gmra.mxu1 %v5004_v57 }
 0x546   : > { %2917 = vmatmul.bf16.gmra.mxu2 %v5002_v49 }
 0x547   : > { %3405 = vst [vmem:[%s4913_s20 + $0x148] sm:$0xff] %v3213_v59  ;;  %3086 = vmatmul.bf16.gmra.mxu3 %v5004_v57 }
 0x549   : > { %v2878_v60 = vpop.f32.mrf.mxu2  ;;  %v2542_v25 = vpop.f32.mrf.mxu0 }
 0x54a   : > { %v3047_v2 = vpop.f32.mrf.mxu3  ;;  %v2711_v41 = vpop.f32.mrf.mxu1 }
 0x54b   : > { %v3048_v31 = vadd.f32 %v3047_v2, %v2878_v60  ;;  %v2712_v21 = vadd.f32 %v2711_v41, %v2542_v25 }
 0x54d   : > { %v3216_v34 = vpack.c.bf16 %v3048_v31, %v2710_v3 }
 0x54f   : > { %3408 = vst [vmem:[%s4913_s20 + $0x160] sm:$0xff] %v3216_v34 }
 0x551   : > { %v2880_v32 = vpop.f32.mrf.mxu2  ;;  %v2545_v20 = vpop.f32.mrf.mxu0 }
 0x552   : > { %v3049_v33 = vpop.f32.mrf.mxu3  ;;  %v2714_v23 = vpop.f32.mrf.mxu1 }
 0x553   : > { %v3050_v61 = vadd.f32 %v3049_v33, %v2880_v32  ;;  %v2715_v57 = vadd.f32 %v2714_v23, %v2545_v20 }
 0x554   : > { %2584 = vmatmul.bf16.gmra.mxu0 %v5016_v28 }
 0x555   : > { %v3219_v49 = vpack.c.bf16 %v3050_v61, %v2712_v21  ;;  %2753 = vmatmul.bf16.gmra.mxu1 %v5018_v35 }
 0x556   : > { %2922 = vmatmul.bf16.gmra.mxu2 %v5016_v28 }
 0x557   : > { %3411 = vst [vmem:[%s4913_s20 + $0x178] sm:$0xff] %v3219_v49  ;;  %3091 = vmatmul.bf16.gmra.mxu3 %v5018_v35 }
 0x559   : > { %v2883_v13 = vpop.f32.mrf.mxu2  ;;  %v2547_v16 = vpop.f32.mrf.mxu0 }
 0x55a   : > { %v3052_v54 = vpop.f32.mrf.mxu3  ;;  %v2716_v58 = vpop.f32.mrf.mxu1 }
 0x55b   : > { %v3053_v19 = vadd.f32 %v3052_v54, %v2883_v13  ;;  %v2717_v63 = vadd.f32 %v2716_v58, %v2547_v16 }
 0x55d   : > { %v3222_v1 = vpack.c.bf16 %v3053_v19, %v2715_v57 }
 0x55f   : > { %3414 = vst [vmem:[%s4913_s20 + $0x190] sm:$0xff] %v3222_v1 }
 0x561   : > { %v2885_v55 = vpop.f32.mrf.mxu2  ;;  %v2550_v36 = vpop.f32.mrf.mxu0 }
 0x562   : > { %v3054_v17 = vpop.f32.mrf.mxu3  ;;  %v2719_v4 = vpop.f32.mrf.mxu1 }
 0x563   : > { %v3055_v22 = vadd.f32 %v3054_v17, %v2885_v55  ;;  %v2720_v35 = vadd.f32 %v2719_v4, %v2550_v36 }
 0x564   : > { %2589 = vmatmul.bf16.gmra.mxu0 %v5030_v6 }
 0x565   : > { %v3225_v28 = vpack.c.bf16 %v3055_v22, %v2717_v63  ;;  %2758 = vmatmul.bf16.gmra.mxu1 %v5032_v9 }
 0x566   : > { %2927 = vmatmul.bf16.gmra.mxu2 %v5030_v6 }
 0x567   : > { %3417 = vst [vmem:[%s4913_s20 + $0x1a8] sm:$0xff] %v3225_v28  ;;  %3096 = vmatmul.bf16.gmra.mxu3 %v5032_v9  ;;  %v5779_v28 = vld [vmem:[#allocation12_spill] sm:$0xff] }
 0x569   : > { %v2888_v51 = vpop.f32.mrf.mxu2  ;;  %v2552_v14 = vpop.f32.mrf.mxu0 }
 0x56a   : > { %v3057_v53 = vpop.f32.mrf.mxu3  ;;  %v2721_v26 = vpop.f32.mrf.mxu1 }
 0x56b   : > { %v3058_v15 = vadd.f32 %v3057_v53, %v2888_v51  ;;  %v2722_v46 = vadd.f32 %v2721_v26, %v2552_v14 }
 0x56d   : > { %v3228_v27 = vpack.c.bf16 %v3058_v15, %v2720_v35 }
 0x56f   : > { %3420 = vst [vmem:[%s4913_s20 + $0x1c0] sm:$0xff] %v3228_v27 }
 0x571   : > { %v2890_v24 = vpop.f32.mrf.mxu2  ;;  %v2555_v42 = vpop.f32.mrf.mxu0 }
 0x572   : > { %v3059_v30 = vpop.f32.mrf.mxu3  ;;  %v2724_v47 = vpop.f32.mrf.mxu1 }
 0x573   : > { %v3060_v43 = vadd.f32 %v3059_v30, %v2890_v24  ;;  %v2725_v9 = vadd.f32 %v2724_v47, %v2555_v42 }
 0x574   : > { %2594 = vmatmul.bf16.gmra.mxu0 %v5044_v44 }
 0x575   : > { %v3231_v6 = vpack.c.bf16 %v3060_v43, %v2722_v46  ;;  %2763 = vmatmul.bf16.gmra.mxu1 %v5046_v50 }
 0x576   : > { %2932 = vmatmul.bf16.gmra.mxu2 %v5044_v44 }
 0x577   : > { %3423 = vst [vmem:[%s4913_s20 + $0x1d8] sm:$0xff] %v3231_v6  ;;  %3101 = vmatmul.bf16.gmra.mxu3 %v5046_v50 }
 0x579   : > { %v2893_v8 = vpop.f32.mrf.mxu2  ;;  %v2557_v29 = vpop.f32.mrf.mxu0 }
 0x57a   : > { %v3062_v37 = vpop.f32.mrf.mxu3  ;;  %v2726_v45 = vpop.f32.mrf.mxu1 }
 0x57b   : > { %v3063_v38 = vadd.f32 %v3062_v37, %v2893_v8  ;;  %v2727_v3 = vadd.f32 %v2726_v45, %v2557_v29  ;;  %v5782_v8 = vld [vmem:[#allocation15_spill] sm:$0xff] }
 0x57d   : > { %v3234_v10 = vpack.c.bf16 %v3063_v38, %v2725_v9  ;;  %v5781_v9 = vld [vmem:[#allocation14_spill] sm:$0xff] }
 0x57f   : > { %3426 = vst [vmem:[%s4913_s20 + $0x1f0] sm:$0xff] %v3234_v10 }
 0x581   : > { %v2895_v62 = vpop.f32.mrf.mxu2  ;;  %v2560_v59 = vpop.f32.mrf.mxu0 }
 0x582   : > { %v3064_v0 = vpop.f32.mrf.mxu3  ;;  %v2729_v2 = vpop.f32.mrf.mxu1 }
 0x583   : > { %v3065_v60 = vadd.f32 %v3064_v0, %v2895_v62  ;;  %v2730_v50 = vadd.f32 %v2729_v2, %v2560_v59 }
 0x584   : > { %2599 = vmatmul.bf16.gmra.mxu0 %v5058_v56 }
 0x585   : > { %v3237_v44 = vpack.c.bf16 %v3065_v60, %v2727_v3  ;;  %2768 = vmatmul.bf16.gmra.mxu1 %v5060_v5 }
 0x586   : > { %2937 = vmatmul.bf16.gmra.mxu2 %v5058_v56 }
 0x587   : > { %3429 = vst [vmem:[%s4913_s20 + $0x208] sm:$0xff] %v3237_v44  ;;  %3106 = vmatmul.bf16.gmra.mxu3 %v5060_v5 }
 0x589   : > { %v2898_v25 = vpop.f32.mrf.mxu2  ;;  %v2562_v41 = vpop.f32.mrf.mxu0 }
 0x58a   : > { %v3067_v31 = vpop.f32.mrf.mxu3  ;;  %v2731_v32 = vpop.f32.mrf.mxu1 }
 0x58b   : > { %v3068_v34 = vadd.f32 %v3067_v31, %v2898_v25  ;;  %v2732_v23 = vadd.f32 %v2731_v32, %v2562_v41  ;;  %v5783_v31 = vld [vmem:[#allocation16_spill] sm:$0xff]  ;;  %v5784_v41 = vld [vmem:[#allocation17_spill] sm:$0xff] }
 0x58d   : > { %v3240_v33 = vpack.c.bf16 %v3068_v34, %v2730_v50 }
 0x58f   : > { %3432 = vst [vmem:[%s4913_s20 + $0x220] sm:$0xff] %v3240_v33 }
 0x591   : > { %v2900_v20 = vpop.f32.mrf.mxu2  ;;  %v2565_v61 = vpop.f32.mrf.mxu0 }
 0x592   : > { %v3069_v21 = vpop.f32.mrf.mxu3  ;;  %v2734_v57 = vpop.f32.mrf.mxu1 }
 0x593   : > { %v3070_v49 = vadd.f32 %v3069_v21, %v2900_v20  ;;  %v2735_v5 = vadd.f32 %v2734_v57, %v2565_v61 }
 0x594   : > { %2604 = vmatmul.bf16.gmra.mxu0 %v5072_v40 }
 0x595   : > { %v3243_v56 = vpack.c.bf16 %v3070_v49, %v2732_v23  ;;  %2773 = vmatmul.bf16.gmra.mxu1 %v5074_v52 }
 0x596   : > { %2942 = vmatmul.bf16.gmra.mxu2 %v5072_v40 }
 0x597   : > { %3435 = vst [vmem:[%s4913_s20 + $0x238] sm:$0xff] %v3243_v56  ;;  %3111 = vmatmul.bf16.gmra.mxu3 %v5074_v52  ;;  %v5780_v52 = vld [vmem:[#allocation13_spill] sm:$0xff] }
 0x599   : > { %v2903_v13 = vpop.f32.mrf.mxu2  ;;  %v2567_v16 = vpop.f32.mrf.mxu0 }
 0x59a   : > { %v3072_v54 = vpop.f32.mrf.mxu3  ;;  %v2736_v58 = vpop.f32.mrf.mxu1 }
 0x59b   : > { %v3073_v19 = vadd.f32 %v3072_v54, %v2903_v13  ;;  %v2737_v63 = vadd.f32 %v2736_v58, %v2567_v16  ;;  %v5786_v58 = vld [vmem:[#allocation19_spill] sm:$0xff] }
 0x59d   : > { %v3246_v1 = vpack.c.bf16 %v3073_v19, %v2735_v5  ;;  %v5785_v19 = vld [vmem:[#allocation18_spill] sm:$0xff] }
 0x59f   : > { %3438 = vst [vmem:[%s4913_s20 + $0x250] sm:$0xff] %v3246_v1 }
 0x5a1   : > { %v2905_v55 = vpop.f32.mrf.mxu2  ;;  %v2570_v36 = vpop.f32.mrf.mxu0 }
 0x5a2   : > { %v3074_v17 = vpop.f32.mrf.mxu3  ;;  %v2739_v4 = vpop.f32.mrf.mxu1 }
 0x5a3   : > { %v3075_v22 = vadd.f32 %v3074_v17, %v2905_v55  ;;  %v2740_v35 = vadd.f32 %v2739_v4, %v2570_v36 }
 0x5a4   : > { %2609 = vmatmul.bf16.gmra.mxu0 %v5779_v28 }
 0x5a5   : > { %v3249_v40 = vpack.c.bf16 %v3075_v22, %v2737_v63  ;;  %2778 = vmatmul.bf16.gmra.mxu1 %v5780_v52 }
 0x5a6   : > { %2947 = vmatmul.bf16.gmra.mxu2 %v5779_v28 }
 0x5a7   : > { %3441 = vst [vmem:[%s4913_s20 + $0x268] sm:$0xff] %v3249_v40  ;;  %3116 = vmatmul.bf16.gmra.mxu3 %v5780_v52 }
 0x5a9   : > { %v2908_v51 = vpop.f32.mrf.mxu2  ;;  %v2572_v14 = vpop.f32.mrf.mxu0 }
 0x5aa   : > { %v3077_v53 = vpop.f32.mrf.mxu3  ;;  %v2741_v26 = vpop.f32.mrf.mxu1 }
 0x5ab   : > { %v3078_v15 = vadd.f32 %v3077_v53, %v2908_v51  ;;  %v2742_v46 = vadd.f32 %v2741_v26, %v2572_v14  ;;  %v5788_v26 = vld [vmem:[#allocation21_spill] sm:$0xff] }
 0x5ad   : > { %v3252_v27 = vpack.c.bf16 %v3078_v15, %v2740_v35  ;;  %v5787_v15 = vld [vmem:[#allocation20_spill] sm:$0xff] }
 0x5af   : > { %3444 = vst [vmem:[%s4913_s20 + $0x280] sm:$0xff] %v3252_v27 }
 0x5b1   : > { %v2910_v24 = vpop.f32.mrf.mxu2  ;;  %v2575_v42 = vpop.f32.mrf.mxu0 }
 0x5b2   : > { %v3079_v30 = vpop.f32.mrf.mxu3  ;;  %v2744_v47 = vpop.f32.mrf.mxu1 }
 0x5b3   : > { %v3080_v43 = vadd.f32 %v3079_v30, %v2910_v24  ;;  %v2745_v37 = vadd.f32 %v2744_v47, %v2575_v42 }
 0x5b4   : > { %2614 = vmatmul.bf16.gmra.mxu0 %v5781_v9 }
 0x5b5   : > { %v3255_v6 = vpack.c.bf16 %v3080_v43, %v2742_v46  ;;  %2783 = vmatmul.bf16.gmra.mxu1 %v5782_v8 }
 0x5b6   : > { %2952 = vmatmul.bf16.gmra.mxu2 %v5781_v9 }
 0x5b7   : > { %3447 = vst [vmem:[%s4913_s20 + $0x298] sm:$0xff] %v3255_v6  ;;  %3121 = vmatmul.bf16.gmra.mxu3 %v5782_v8 }
 0x5b9   : > { %v2913_v29 = vpop.f32.mrf.mxu2  ;;  %v2577_v45 = vpop.f32.mrf.mxu0 }
 0x5ba   : > { %v3082_v38 = vpop.f32.mrf.mxu3  ;;  %v2746_v62 = vpop.f32.mrf.mxu1 }
 0x5bb   : > { %v3083_v10 = vadd.f32 %v3082_v38, %v2913_v29  ;;  %v2747_v2 = vadd.f32 %v2746_v62, %v2577_v45  ;;  %v5790_v62 = vld [vmem:[#allocation23_spill] sm:$0xff] }
 0x5bd   : > { %v3258_v0 = vpack.c.bf16 %v3083_v10, %v2745_v37  ;;  %v5789_v10 = vld [vmem:[#allocation22_spill] sm:$0xff] }
 0x5bf   : > { %3450 = vst [vmem:[%s4913_s20 + $0x2b0] sm:$0xff] %v3258_v0 }
 0x5c1   : > { %v2915_v59 = vpop.f32.mrf.mxu2  ;;  %v2580_v60 = vpop.f32.mrf.mxu0 }
 0x5c2   : > { %v3084_v3 = vpop.f32.mrf.mxu3  ;;  %v2749_v50 = vpop.f32.mrf.mxu1 }
 0x5c3   : > { %v3085_v44 = vadd.f32 %v3084_v3, %v2915_v59  ;;  %v2750_v34 = vadd.f32 %v2749_v50, %v2580_v60 }
 0x5c4   : > { %2619 = vmatmul.bf16.gmra.mxu0 %v5783_v31 }
 0x5c5   : > { %v3261_v25 = vpack.c.bf16 %v3085_v44, %v2747_v2  ;;  %2788 = vmatmul.bf16.gmra.mxu1 %v5784_v41 }
 0x5c6   : > { %2957 = vmatmul.bf16.gmra.mxu2 %v5783_v31 }
 0x5c7   : > { %3453 = vst [vmem:[%s4913_s20 + $0x2c8] sm:$0xff] %v3261_v25  ;;  %3126 = vmatmul.bf16.gmra.mxu3 %v5784_v41 }
 0x5c9   : > { %v2918_v32 = vpop.f32.mrf.mxu2  ;;  %v2582_v20 = vpop.f32.mrf.mxu0 }
 0x5ca   : > { %v3087_v33 = vpop.f32.mrf.mxu3  ;;  %v2751_v61 = vpop.f32.mrf.mxu1 }
 0x5cb   : > { %v3088_v21 = vadd.f32 %v3087_v33, %v2918_v32  ;;  %v2752_v5 = vadd.f32 %v2751_v61, %v2582_v20 }
 0x5cd   : > { %v3264_v23 = vpack.c.bf16 %v3088_v21, %v2750_v34 }
 0x5cf   : > { %3456 = vst [vmem:[%s4913_s20 + $0x2e0] sm:$0xff] %v3264_v23 }
 0x5d1   : > { %v2920_v49 = vpop.f32.mrf.mxu2  ;;  %v2585_v56 = vpop.f32.mrf.mxu0 }
 0x5d2   : > { %v3089_v57 = vpop.f32.mrf.mxu3  ;;  %v2754_v54 = vpop.f32.mrf.mxu1 }
 0x5d3   : > { %v3090_v13 = vadd.f32 %v3089_v57, %v2920_v49  ;;  %v2755_v1 = vadd.f32 %v2754_v54, %v2585_v56 }
 0x5d4   : > { %2624 = vmatmul.bf16.gmra.mxu0 %v5785_v19 }
 0x5d5   : > { %v3267_v16 = vpack.c.bf16 %v3090_v13, %v2752_v5  ;;  %2793 = vmatmul.bf16.gmra.mxu1 %v5786_v58 }
 0x5d6   : > { %2962 = vmatmul.bf16.gmra.mxu2 %v5785_v19 }
 0x5d7   : > { %3459 = vst [vmem:[%s4913_s20 + $0x2f8] sm:$0xff] %v3267_v16  ;;  %3131 = vmatmul.bf16.gmra.mxu3 %v5786_v58 }
 0x5d9   : > { %v2923_v55 = vpop.f32.mrf.mxu2  ;;  %v2587_v36 = vpop.f32.mrf.mxu0 }
 0x5da   : > { %v3092_v17 = vpop.f32.mrf.mxu3  ;;  %v2756_v22 = vpop.f32.mrf.mxu1 }
 0x5db   : > { %v3093_v63 = vadd.f32 %v3092_v17, %v2923_v55  ;;  %v2757_v35 = vadd.f32 %v2756_v22, %v2587_v36 }
 0x5dd   : > { %v3270_v4 = vpack.c.bf16 %v3093_v63, %v2755_v1 }
 0x5df   : > { %3462 = vst [vmem:[%s4913_s20 + $0x310] sm:$0xff] %v3270_v4 }
 0x5e1   : > { %v2925_v40 = vpop.f32.mrf.mxu2  ;;  %v2590_v52 = vpop.f32.mrf.mxu0 }
 0x5e2   : > { %v3094_v28 = vpop.f32.mrf.mxu3  ;;  %v2759_v53 = vpop.f32.mrf.mxu1 }
 0x5e3   : > { %v3095_v51 = vadd.f32 %v3094_v28, %v2925_v40  ;;  %v2760_v27 = vadd.f32 %v2759_v53, %v2590_v52 }
 0x5e4   : > { %2629 = vmatmul.bf16.gmra.mxu0 %v5787_v15 }
 0x5e5   : > { %v3273_v14 = vpack.c.bf16 %v3095_v51, %v2757_v35  ;;  %2798 = vmatmul.bf16.gmra.mxu1 %v5788_v26 }
 0x5e6   : > { %2967 = vmatmul.bf16.gmra.mxu2 %v5787_v15  ;;  %v5792_v15 = vld [vmem:[#allocation28_spill] sm:$0xff] }
 0x5e7   : > { %3465 = vst [vmem:[%s4913_s20 + $0x328] sm:$0xff] %v3273_v14  ;;  %3136 = vmatmul.bf16.gmra.mxu3 %v5788_v26  ;;  %v5793_v26 = vld [vmem:[#allocation29_spill] sm:$0xff] }
 0x5e9   : > { %v2928_v24 = vpop.f32.mrf.mxu2  ;;  %v2592_v42 = vpop.f32.mrf.mxu0 }
 0x5ea   : > { %v3097_v30 = vpop.f32.mrf.mxu3  ;;  %v2761_v43 = vpop.f32.mrf.mxu1 }
 0x5eb   : > { %v3098_v46 = vadd.f32 %v3097_v30, %v2928_v24  ;;  %v2762_v37 = vadd.f32 %v2761_v43, %v2592_v42 }
 0x5ed   : > { %v3276_v47 = vpack.c.bf16 %v3098_v46, %v2760_v27 }
 0x5ef   : > { %3468 = vst [vmem:[%s4913_s20 + $0x340] sm:$0xff] %v3276_v47 }
 0x5f1   : > { %v2930_v6 = vpop.f32.mrf.mxu2  ;;  %v2595_v8 = vpop.f32.mrf.mxu0 }
 0x5f2   : > { %v3099_v9 = vpop.f32.mrf.mxu3  ;;  %v2764_v38 = vpop.f32.mrf.mxu1 }
 0x5f3   : > { %v3100_v29 = vadd.f32 %v3099_v9, %v2930_v6  ;;  %v2765_v0 = vadd.f32 %v2764_v38, %v2595_v8 }
 0x5f4   : > { %2634 = vmatmul.bf16.gmra.mxu0 %v5789_v10 }
 0x5f5   : > { %v3279_v45 = vpack.c.bf16 %v3100_v29, %v2762_v37  ;;  %2803 = vmatmul.bf16.gmra.mxu1 %v5790_v62 }
 0x5f6   : > { %2972 = vmatmul.bf16.gmra.mxu2 %v5789_v10  ;;  %v5794_v10 = vld [vmem:[#allocation30_spill] sm:$0xff] }
 0x5f7   : > { %3471 = vst [vmem:[%s4913_s20 + $0x358] sm:$0xff] %v3279_v45  ;;  %3141 = vmatmul.bf16.gmra.mxu3 %v5790_v62 }
 0x5f9   : > { %v2933_v59 = vpop.f32.mrf.mxu2  ;;  %v2597_v60 = vpop.f32.mrf.mxu0 }
 0x5fa   : > { %v3102_v3 = vpop.f32.mrf.mxu3  ;;  %v2766_v44 = vpop.f32.mrf.mxu1 }
 0x5fb   : > { %v3103_v2 = vadd.f32 %v3102_v3, %v2933_v59  ;;  %v2767_v34 = vadd.f32 %v2766_v44, %v2597_v60 }
 0x5fd   : > { %v3282_v50 = vpack.c.bf16 %v3103_v2, %v2765_v0 }
 0x5ff   : > { %3474 = vst [vmem:[%s4913_s20 + $0x370] sm:$0xff] %v3282_v50 }
 0x601   : > { %v2935_v25 = vpop.f32.mrf.mxu2  ;;  %v2600_v41 = vpop.f32.mrf.mxu0 }
 0x602   : > { %v3104_v31 = vpop.f32.mrf.mxu3  ;;  %v2769_v33 = vpop.f32.mrf.mxu1 }
 0x603   : > { %v3105_v32 = vadd.f32 %v3104_v31, %v2935_v25  ;;  %v2770_v21 = vadd.f32 %v2769_v33, %v2600_v41 }
 0x604   : > { %2639 = vmatmul.bf16.gmra.mxu0 %v5770_v12 }
 0x605   : > { %v3285_v20 = vpack.c.bf16 %v3105_v32, %v2767_v34  ;;  %2808 = vmatmul.bf16.gmra.mxu1 %v5771_v39 }
 0x606   : > { %2977 = vmatmul.bf16.gmra.mxu2 %v5770_v12 }
 0x607   : > { %3477 = vst [vmem:[%s4913_s20 + $0x388] sm:$0xff] %v3285_v20  ;;  %3146 = vmatmul.bf16.gmra.mxu3 %v5771_v39  ;;  %v5791_v39 = vld [vmem:[#allocation27_spill] sm:$0xff] }
 0x609   : > { %v2938_v61 = vpop.f32.mrf.mxu2  ;;  %v2602_v49 = vpop.f32.mrf.mxu0 }
 0x60a   : > { %v3107_v23 = vpop.f32.mrf.mxu3  ;;  %v2771_v56 = vpop.f32.mrf.mxu1 }
 0x60b   : > { %v3108_v57 = vadd.f32 %v3107_v23, %v2938_v61  ;;  %v2772_v19 = vadd.f32 %v2771_v56, %v2602_v49 }
 0x60d   : > { %v3288_v5 = vpack.c.bf16 %v3108_v57, %v2770_v21 }
 0x60f   : > { %3480 = vst [vmem:[%s4913_s20 + $0x3a0] sm:$0xff] %v3288_v5 }
 0x611   : > { %v2940_v13 = vpop.f32.mrf.mxu2  ;;  %v2605_v16 = vpop.f32.mrf.mxu0 }
 0x612   : > { %v3109_v54 = vpop.f32.mrf.mxu3  ;;  %v2774_v1 = vpop.f32.mrf.mxu1 }
 0x613   : > { %v3110_v58 = vadd.f32 %v3109_v54, %v2940_v13  ;;  %v2775_v55 = vadd.f32 %v2774_v1, %v2605_v16 }
 0x614   : > { %2644 = vmatmul.bf16.gmra.mxu0 %v5772_v18 }
 0x615   : > { %v3291_v12 = vpack.c.bf16 %v3110_v58, %v2772_v19  ;;  %2813 = vmatmul.bf16.gmra.mxu1 %v5791_v39 }
 0x616   : > { %2982 = vmatmul.bf16.gmra.mxu2 %v5772_v18 }
 0x617   : > { %3483 = vst [vmem:[%s4913_s20 + $0x3b8] sm:$0xff] %v3291_v12  ;;  %3151 = vmatmul.bf16.gmra.mxu3 %v5791_v39 }
 0x619   : > { %v2943_v17 = vpop.f32.mrf.mxu2  ;;  %v2607_v63 = vpop.f32.mrf.mxu0 }
 0x61a   : > { %v3112_v36 = vpop.f32.mrf.mxu3  ;;  %v2776_v4 = vpop.f32.mrf.mxu1 }
 0x61b   : > { %v3113_v22 = vadd.f32 %v3112_v36, %v2943_v17  ;;  %v2777_v51 = vadd.f32 %v2776_v4, %v2607_v63 }
 0x61d   : > { %v3294_v40 = vpack.c.bf16 %v3113_v22, %v2775_v55 }
 0x61f   : > { %3486 = vst [vmem:[%s4913_s20 + $0x3d0] sm:$0xff] %v3294_v40 }
 0x621   : > { %v2945_v28 = vpop.f32.mrf.mxu2  ;;  %v2610_v35 = vpop.f32.mrf.mxu0 }
 0x622   : > { %v3114_v52 = vpop.f32.mrf.mxu3  ;;  %v2779_v14 = vpop.f32.mrf.mxu1 }
 0x623   : > { %v3115_v53 = vadd.f32 %v3114_v52, %v2945_v28  ;;  %v2780_v27 = vadd.f32 %v2779_v14, %v2610_v35 }
 0x624   : > { %2649 = vmatmul.bf16.gmra.mxu0 %v5792_v15 }
 0x625   : > { %v3297_v18 = vpack.c.bf16 %v3115_v53, %v2777_v51  ;;  %2818 = vmatmul.bf16.gmra.mxu1 %v5793_v26 }
 0x626   : > { %2987 = vmatmul.bf16.gmra.mxu2 %v5792_v15 }
 0x627   : > { %3489 = vst [vmem:[%s4913_s20 + $0x3e8] sm:$0xff] %v3297_v18  ;;  %3156 = vmatmul.bf16.gmra.mxu3 %v5793_v26 }
 0x629   : > { %v2948_v24 = vpop.f32.mrf.mxu2  ;;  %v2612_v42 = vpop.f32.mrf.mxu0 }
 0x62a   : > { %v3117_v30 = vpop.f32.mrf.mxu3  ;;  %v2781_v43 = vpop.f32.mrf.mxu1 }
 0x62b   : > { %v3118_v46 = vadd.f32 %v3117_v30, %v2948_v24  ;;  %v2782_v37 = vadd.f32 %v2781_v43, %v2612_v42 }
 0x62d   : > { %v3300_v47 = vpack.c.bf16 %v3118_v46, %v2780_v27 }
 0x62f   : > { %3492 = vst [vmem:[%s4913_s20 + $0x400] sm:$0xff] %v3300_v47 }
 0x631   : > { %v2950_v6 = vpop.f32.mrf.mxu2  ;;  %v2615_v8 = vpop.f32.mrf.mxu0 }
 0x632   : > { %v3119_v9 = vpop.f32.mrf.mxu3  ;;  %v2784_v38 = vpop.f32.mrf.mxu1 }
 0x633   : > { %v3120_v29 = vadd.f32 %v3119_v9, %v2950_v6  ;;  %v2785_v62 = vadd.f32 %v2784_v38, %v2615_v8 }
 0x634   : > { %2654 = vmatmul.bf16.gmra.mxu0 %v5794_v10 }
 0x635   : > { %v3303_v45 = vpack.c.bf16 %v3120_v29, %v2782_v37  ;;  %2823 = vmatmul.bf16.gmra.mxu1 %v5777_v11 }
 0x636   : > { %2992 = vmatmul.bf16.gmra.mxu2 %v5794_v10 }
 0x637   : > { %3495 = vst [vmem:[%s4913_s20 + $0x418] sm:$0xff] %v3303_v45  ;;  %3161 = vmatmul.bf16.gmra.mxu3 %v5777_v11 }
 0x639   : > { %v2953_v0 = vpop.f32.mrf.mxu2  ;;  %v2617_v3 = vpop.f32.mrf.mxu0 }
 0x63a   : > { %v3122_v59 = vpop.f32.mrf.mxu3  ;;  %v2786_v2 = vpop.f32.mrf.mxu1 }
 0x63b   : > { %v3123_v60 = vadd.f32 %v3122_v59, %v2953_v0  ;;  %v2787_v41 = vadd.f32 %v2786_v2, %v2617_v3 }
 0x63d   : > { %v3306_v44 = vpack.c.bf16 %v3123_v60, %v2785_v62 }
 0x63f   : > { %3498 = vst [vmem:[%s4913_s20 + $0x430] sm:$0xff] %v3306_v44 }
 0x641   : > { %v2955_v50 = vpop.f32.mrf.mxu2  ;;  %v2620_v31 = vpop.f32.mrf.mxu0 }
 0x642   : > { %v3124_v25 = vpop.f32.mrf.mxu3  ;;  %v2789_v32 = vpop.f32.mrf.mxu1 }
 0x643   : > { %v3125_v34 = vadd.f32 %v3124_v25, %v2955_v50  ;;  %v2790_v11 = vadd.f32 %v2789_v32, %v2620_v31 }
 0x644   : > { %2659 = vmatmul.bf16.gmra.mxu0 %v5226_v48 }
 0x645   : > { %v3309_v33 = vpack.c.bf16 %v3125_v34, %v2787_v41  ;;  %2828 = vmatmul.bf16.gmra.mxu1 %v5228_v7 }
 0x646   : > { %2997 = vmatmul.bf16.gmra.mxu2 %v5226_v48 }
 0x647   : > { %3501 = vst [vmem:[%s4913_s20 + $0x448] sm:$0xff] %v3309_v33  ;;  %3166 = vmatmul.bf16.gmra.mxu3 %v5228_v7 }
 0x649   : > { %v2958_v20 = vpop.f32.mrf.mxu2  ;;  %v2622_v61 = vpop.f32.mrf.mxu0 }
 0x64a   : > { %v3127_v21 = vpop.f32.mrf.mxu3  ;;  %v2791_v49 = vpop.f32.mrf.mxu1 }
 0x64b   : > { %v3128_v23 = vadd.f32 %v3127_v21, %v2958_v20  ;;  %v2792_v54 = vadd.f32 %v2791_v49, %v2622_v61 }
 0x64d   : > { %v3312_v57 = vpack.c.bf16 %v3128_v23, %v2790_v11 }
 0x64f   : > { %3504 = vst [vmem:[%s4913_s20 + $0x460] sm:$0xff] %v3312_v57 }
 0x651   : > { %v2960_v56 = vpop.f32.mrf.mxu2  ;;  %v2625_v13 = vpop.f32.mrf.mxu0 }
 0x652   : > { %v3129_v5 = vpop.f32.mrf.mxu3  ;;  %v2794_v19 = vpop.f32.mrf.mxu1 }
 0x653   : > { %v3130_v16 = vadd.f32 %v3129_v5, %v2960_v56  ;;  %v2795_v7 = vadd.f32 %v2794_v19, %v2625_v13 }
 0x655   : > { %v3315_v48 = vpack.c.bf16 %v3130_v16, %v2792_v54 }
 0x657   : > { %3507 = vst [vmem:[%s4913_s20 + $0x478] sm:$0xff] %v3315_v48 }
 0x659   : > { %v2963_v58 = vpop.f32.mrf.mxu2  ;;  %v2627_v12 = vpop.f32.mrf.mxu0 }
 0x65a   : > { %v3132_v1 = vpop.f32.mrf.mxu3  ;;  %v2796_v55 = vpop.f32.mrf.mxu1 }
 0x65b   : > { %v3133_v39 = vadd.f32 %v3132_v1, %v2963_v58  ;;  %v2797_v4 = vadd.f32 %v2796_v55, %v2627_v12 }
 0x65d   : > { %v3318_v17 = vpack.c.bf16 %v3133_v39, %v2795_v7 }
 0x65f   : > { %3510 = vst [vmem:[%s4913_s20 + $0x490] sm:$0xff] %v3318_v17 }
 0x661   : > { %v2965_v36 = vpop.f32.mrf.mxu2  ;;  %v2630_v22 = vpop.f32.mrf.mxu0 }
 0x662   : > { %v3134_v63 = vpop.f32.mrf.mxu3  ;;  %v2799_v28 = vpop.f32.mrf.mxu1 }
 0x663   : > { %v3135_v40 = vadd.f32 %v3134_v63, %v2965_v36  ;;  %v2800_v35 = vadd.f32 %v2799_v28, %v2630_v22 }
 0x665   : > { %v3321_v52 = vpack.c.bf16 %v3135_v40, %v2797_v4 }
 0x667   : > { %3513 = vst [vmem:[%s4913_s20 + $0x4a8] sm:$0xff] %v3321_v52 }
 0x669   : > { %v2968_v51 = vpop.f32.mrf.mxu2  ;;  %v2632_v14 = vpop.f32.mrf.mxu0 }
 0x66a   : > { %v3137_v53 = vpop.f32.mrf.mxu3  ;;  %v2801_v15 = vpop.f32.mrf.mxu1 }
 0x66b   : > { %v3138_v18 = vadd.f32 %v3137_v53, %v2968_v51  ;;  %v2802_v42 = vadd.f32 %v2801_v15, %v2632_v14 }
 0x66d   : > { %v3324_v26 = vpack.c.bf16 %v3138_v18, %v2800_v35 }
 0x66f   : > { %3516 = vst [vmem:[%s4913_s20 + $0x4c0] sm:$0xff] %v3324_v26 }
 0x671   : > { %v2970_v27 = vpop.f32.mrf.mxu2  ;;  %v2635_v30 = vpop.f32.mrf.mxu0 }
 0x672   : > { %v3139_v24 = vpop.f32.mrf.mxu3  ;;  %v2804_v43 = vpop.f32.mrf.mxu1 }
 0x673   : > { %v3140_v46 = vadd.f32 %v3139_v24, %v2970_v27  ;;  %v2805_v6 = vadd.f32 %v2804_v43, %v2635_v30 }
 0x675   : > { %v3327_v47 = vpack.c.bf16 %v3140_v46, %v2802_v42 }
 0x677   : > { %3519 = vst [vmem:[%s4913_s20 + $0x4d8] sm:$0xff] %v3327_v47 }
 0x679   : > { %v2973_v9 = vpop.f32.mrf.mxu2  ;;  %v2637_v37 = vpop.f32.mrf.mxu0 }
 0x67a   : > { %v3142_v8 = vpop.f32.mrf.mxu3  ;;  %v2806_v38 = vpop.f32.mrf.mxu1 }
 0x67b   : > { %v3143_v29 = vadd.f32 %v3142_v8, %v2973_v9  ;;  %v2807_v59 = vadd.f32 %v2806_v38, %v2637_v37 }
 0x67d   : > { %v3330_v45 = vpack.c.bf16 %v3143_v29, %v2805_v6 }
 0x67f   : > { %3522 = vst [vmem:[%s4913_s20 + $0x4f0] sm:$0xff] %v3330_v45 }
 0x681   : > { %v2975_v10 = vpop.f32.mrf.mxu2  ;;  %v2640_v0 = vpop.f32.mrf.mxu0 }
 0x682   : > { %v3144_v62 = vpop.f32.mrf.mxu3  ;;  %v2809_v60 = vpop.f32.mrf.mxu1 }
 0x683   : > { %v3145_v3 = vadd.f32 %v3144_v62, %v2975_v10  ;;  %v2810_v44 = vadd.f32 %v2809_v60, %v2640_v0 }
 0x685   : > { %v3333_v2 = vpack.c.bf16 %v3145_v3, %v2807_v59 }
 0x687   : > { %3525 = vst [vmem:[%s4913_s20 + $0x508] sm:$0xff] %v3333_v2 }
 0x689   : > { %v2978_v50 = vpop.f32.mrf.mxu2  ;;  %v2642_v31 = vpop.f32.mrf.mxu0 }
 0x68a   : > { %v3147_v25 = vpop.f32.mrf.mxu3  ;;  %v2811_v34 = vpop.f32.mrf.mxu1 }
 0x68b   : > { %v3148_v41 = vadd.f32 %v3147_v25, %v2978_v50  ;;  %v2812_v21 = vadd.f32 %v2811_v34, %v2642_v31 }
 0x68d   : > { %v3336_v32 = vpack.c.bf16 %v3148_v41, %v2810_v44 }
 0x68f   : > { %3528 = vst [vmem:[%s4913_s20 + $0x520] sm:$0xff] %v3336_v32 }
 0x691   : > { %v2980_v33 = vpop.f32.mrf.mxu2  ;;  %v2645_v20 = vpop.f32.mrf.mxu0 }
 0x692   : > { %v3149_v11 = vpop.f32.mrf.mxu3  ;;  %v2814_v23 = vpop.f32.mrf.mxu1 }
 0x693   : > { %v3150_v61 = vadd.f32 %v3149_v11, %v2980_v33  ;;  %v2815_v57 = vadd.f32 %v2814_v23, %v2645_v20 }
 0x695   : > { %v3339_v49 = vpack.c.bf16 %v3150_v61, %v2812_v21 }
 0x697   : > { %3531 = vst [vmem:[%s4913_s20 + $0x538] sm:$0xff] %v3339_v49 }
 0x699   : > { %v2983_v56 = vpop.f32.mrf.mxu2  ;;  %v2647_v13 = vpop.f32.mrf.mxu0 }
 0x69a   : > { %v3152_v5 = vpop.f32.mrf.mxu3  ;;  %v2816_v16 = vpop.f32.mrf.mxu1 }
 0x69b   : > { %v3153_v54 = vadd.f32 %v3152_v5, %v2983_v56  ;;  %v2817_v1 = vadd.f32 %v2816_v16, %v2647_v13 }
 0x69d   : > { %v3342_v19 = vpack.c.bf16 %v3153_v54, %v2815_v57 }
 0x69f   : > { %3534 = vst [vmem:[%s4913_s20 + $0x550] sm:$0xff] %v3342_v19 }
 0x6a1   : > { %v2985_v48 = vpop.f32.mrf.mxu2  ;;  %v2650_v58 = vpop.f32.mrf.mxu0 }
 0x6a2   : > { %v3154_v7 = vpop.f32.mrf.mxu3  ;;  %v2819_v39 = vpop.f32.mrf.mxu1 }
 0x6a3   : > { %v3155_v12 = vadd.f32 %v3154_v7, %v2985_v48  ;;  %v2820_v17 = vadd.f32 %v2819_v39, %v2650_v58 }
 0x6a5   : > { %v3345_v55 = vpack.c.bf16 %v3155_v12, %v2817_v1 }
 0x6a7   : > { %3537 = vst [vmem:[%s4913_s20 + $0x568] sm:$0xff] %v3345_v55 }
 0x6a9   : > { %v2988_v36 = vpop.f32.mrf.mxu2  ;;  %v2652_v22 = vpop.f32.mrf.mxu0 }
 0x6aa   : > { %v3157_v63 = vpop.f32.mrf.mxu3  ;;  %v2821_v40 = vpop.f32.mrf.mxu1 }
 0x6ab   : > { %v3158_v4 = vadd.f32 %v3157_v63, %v2988_v36  ;;  %v2822_v53 = vadd.f32 %v2821_v40, %v2652_v22 }
 0x6ad   : > { %v3348_v28 = vpack.c.bf16 %v3158_v4, %v2820_v17 }
 0x6af   : > { %3540 = vst [vmem:[%s4913_s20 + $0x580] sm:$0xff] %v3348_v28 }
 0x6b1   : > { %v2990_v52 = vpop.f32.mrf.mxu2  ;;  %v2655_v51 = vpop.f32.mrf.mxu0 }
 0x6b2   : > { %v3159_v35 = vpop.f32.mrf.mxu3  ;;  %v2824_v18 = vpop.f32.mrf.mxu1 }
 0x6b3   : > { %v3160_v14 = vadd.f32 %v3159_v35, %v2990_v52  ;;  %v2825_v26 = vadd.f32 %v2824_v18, %v2655_v51 }
 0x6b5   : > { %v3351_v15 = vpack.c.bf16 %v3160_v14, %v2822_v53 }
 0x6b7   : > { %3543 = vst [vmem:[%s4913_s20 + $0x598] sm:$0xff] %v3351_v15 }
 0x6b9   : > { %v2993_v27 = vpop.f32.mrf.mxu2  ;;  %v2657_v42 = vpop.f32.mrf.mxu0 }
 0x6ba   : > { %v3162_v24 = vpop.f32.mrf.mxu3  ;;  %v2826_v46 = vpop.f32.mrf.mxu1 }
 0x6bb   : > { %v3163_v30 = vadd.f32 %v3162_v24, %v2993_v27  ;;  %v2827_v9 = vadd.f32 %v2826_v46, %v2657_v42 }
 0x6bd   : > { %v3354_v43 = vpack.c.bf16 %v3163_v30, %v2825_v26 }
 0x6bf   : > { %3546 = vst [vmem:[%s4913_s20 + $0x5b0] sm:$0xff] %v3354_v43 }
 0x6c1   : > { %v2995_v47 = vpop.f32.mrf.mxu2  ;;  %v2660_v29 = vpop.f32.mrf.mxu0 }
 0x6c2   : > { %v3164_v6 = vpop.f32.mrf.mxu3  ;;  %v2829_v38 = vpop.f32.mrf.mxu1 }
 0x6c3   : > { %v3165_v8 = vadd.f32 %v3164_v6, %v2995_v47  ;;  %v2830_v45 = vadd.f32 %v2829_v38, %v2660_v29 }
 0x6c5   : > { %v3357_v37 = vpack.c.bf16 %v3165_v8, %v2827_v9 }
 0x6c7   : > { %3549 = vst [vmem:[%s4913_s20 + $0x5c8] sm:$0xff] %v3357_v37 }
 0x6c9   : > { %v2998_v10 = vpop.f32.mrf.mxu2  ;;  %v2662_v3 = vpop.f32.mrf.mxu0 }
 0x6ca   : > { %v3167_v62 = vpop.f32.mrf.mxu3  ;;  %v2831_v60 = vpop.f32.mrf.mxu1 }
 0x6cb   : > { %v3168_v0 = vadd.f32 %v3167_v62, %v2998_v10  ;;  %v2832_v50 = vadd.f32 %v2831_v60, %v2662_v3 }
 0x6cd   : > { %v3360_v59 = vpack.c.bf16 %v3168_v0, %v2830_v45 }
 0x6cf   : > { %3552 = vst [vmem:[%s4913_s20 + $0x5e0] sm:$0xff] %v3360_v59 }
 0x6d1   : > { %v3000_v2 = vpop.f32.mrf.mxu2 }
 0x6d2   : > { %v3169_v44 = vpop.f32.mrf.mxu3 }
 0x6d3   : > { %v3170_v25 = vadd.f32 %v3169_v44, %v3000_v2 }
 0x6d5   : > { %v3363_v31 = vpack.c.bf16 %v3170_v25, %v2832_v50 }
 0x6d7   : > { %3555 = vst [vmem:[%s4913_s20 + $0x5f8] sm:$0xff] %v3363_v31 }
 0x6d8   : > { %4626 = shalt.err (!%p4623_p10)
}
 0x6d9   : > { %s4676_s5 = smov 384   ;;  %s4677_s6 = smov 24  }
 0x6da   : > { %4482 = dma.vmem_to_hbm [thread:$0]  (%p4760_p7), %s3571_s21, 24576, %s3573_s22, %s3557_s13, %s4676_s5, %s4676_s5, %s4677_s6  }
 0x6db PF: > { %s3587_s7 = sand.u32 1, %s4657_s9   ;;  %p5795_p12 = scmp.ge.s32.totalorder %s4669_s12, 2 }
 0x6dc   : > { %s3588_s14 = scalar_lea.sflag [#allocation4], %s3587_s7 }
 0x6dd   : > { %p4493_p13 = pnand %p5795_p12, %p4728_p6 }
 0x6df   : > { %p4494_p0 = pneg %p4493_p13 }
 0x6e1   : > { %4652 = dma.done.wait (%p4494_p0), %s3588_s14, 24576  }
 0x6e2   : > { %4654 = vsyncadd (%p4494_p0), %s3588_s14, 4294942720  ;;  %p16_p3 = scmp.ge.s32.totalorder %s4746_s23, 4   ;;  %s5796_s9 = smov %s4661_s10 }
 0x6e3   : > { %s5797_s10 = smov %s4665_s11  ;;  %s5798_s11 = smov %s4756_s28 }
 0x6e4   : > { %s5799_s12 = smov %s4746_s23  ;;  %18 = sbr.rel (!%p16_p3) target bundleno = 6 (0x6), region = 77 }
 0x6e9   :  { %3594 = vsyncpa [#allocation3], 1 }
 0x6ea   :  { %3596 = vsyncpa [#allocation3 + $0x1], 1 }
 0x6eb   :  { %3597 = vsyncpa [#allocation6], 1 }
 0x6ec   :  { %3598 = vsyncpa [#allocation4], 1 }
 0x6ed   :  { %3600 = vsyncpa [#allocation4 + $0x1], 1 }

</bundles_post_ra>
